<compile_context>
chip_gen: v6e
topology: v6e:2x2x1
jax: 0.10.0
libtpu: 0.0.40
codegen_flags: <defaults>
</compile_context>

<pallas_src>
import functools

import jax
import jax.numpy as jnp
from jax.experimental import pallas as pl
from jax.experimental.pallas import tpu as pltpu

BN_EPS = 1e-5


def _round_up(x, m):
    return ((x + m - 1) // m) * m


def _largest_divisor(n, candidates):
    for c in candidates:
        if c <= n and n % c == 0:
            return c
    return n


# ---------------------------------------------------------------------------
# Pallas kernels
# ---------------------------------------------------------------------------
def _mm_bn_kernel(*refs, relu, has_res, has_ds, multi_k):
    """Tiled matmul + folded-BN scale/bias epilogue.

    Optional epilogue terms:
      has_res : precomputed residual tile added before ReLU.
      has_ds  : fused downsample -- residual = dot(res_a, res_w)*rs + rc
                computed inside the epilogue (no extra pallas_call / HBM trip).
    multi_k selects the f32 VMEM-scratch accumulation path; otherwise the
    result is written directly (no scratch, no pl.when phases).
    """
    it = iter(refs)
    a_ref, b_ref, s_ref, c_ref = next(it), next(it), next(it), next(it)
    r_ref = next(it) if has_res else None
    if has_ds:
        ra_ref, rw_ref, rs_ref, rc_ref = next(it), next(it), next(it), next(it)
    else:
        ra_ref = rw_ref = rs_ref = rc_ref = None
    o_ref = next(it)
    acc_ref = next(it) if multi_k else None

    def _epilogue(acc):
        y = acc * s_ref[...] + c_ref[...]
        if has_res:
            y = y + r_ref[...].astype(jnp.float32)
        if has_ds:
            ds = jnp.dot(ra_ref[...], rw_ref[...],
                         preferred_element_type=jnp.float32)
            y = y + (ds * rs_ref[...] + rc_ref[...])
        if relu:
            y = jnp.maximum(y, 0.0)
        o_ref[...] = y.astype(o_ref.dtype)

    if multi_k:
        k = pl.program_id(2)

        @pl.when(k == 0)
        def _():
            acc_ref[...] = jnp.zeros_like(acc_ref)

        acc_ref[...] += jnp.dot(a_ref[...], b_ref[...],
                                preferred_element_type=jnp.float32)

        @pl.when(k == pl.num_programs(2) - 1)
        def _():
            _epilogue(acc_ref[...])
    else:
        _epilogue(jnp.dot(a_ref[...], b_ref[...],
                          preferred_element_type=jnp.float32))


def _maxpool_kernel(p00_ref, p01_ref, p10_ref, p11_ref, o_ref):
    """3x3 / stride-2 window max from four parity planes.

    Window tap (ki, kj) of the stride-2 pool is a contiguous slice (offset
    0 or 1) of parity plane (ki&1, kj&1), so only the strided output is ever
    computed or written.  Layout stays NHWC: (Wout, C) lane/sublane dense.
    """
    planes = ((p00_ref[...], p01_ref[...]), (p10_ref[...], p11_ref[...]))
    ho, wo = o_ref.shape[1], o_ref.shape[2]
    m = None
    for ki in range(3):
        for kj in range(3):
            di, dj = ki >> 1, kj >> 1
            t = planes[ki & 1][kj & 1][:, di:di + ho, dj:dj + wo, :]
            m = t if m is None else jnp.maximum(m, t)
    o_ref[...] = m


def _head_kernel(x_ref, w_ref, b_ref, o_ref, *, inv_hw):
    """Global average pool + linear (bf16 MXU) + single-exp sigmoid."""
    x = x_ref[...].astype(jnp.float32)                       # (Nb, HW, C)
    m = (jnp.sum(x, axis=1) * inv_hw).astype(jnp.bfloat16)   # avg pool
    y = jnp.dot(m, w_ref[...], preferred_element_type=jnp.float32) + b_ref[...]
    z = jnp.exp(-jnp.abs(y))                                  # one EUP exp
    inv = pl.reciprocal(1.0 + z, approx=True)
    o_ref[...] = jnp.where(y >= 0.0, inv, z * inv)


# ---------------------------------------------------------------------------
# Pallas wrappers
# ---------------------------------------------------------------------------
def fused_matmul(a, b, scale, bias, *, residual=None, res_a=None, res_w=None,
                 res_scale=None, res_bias=None, relu=False,
                 out_dtype=jnp.bfloat16):
    """(M,K)@(K,N) * scale[N] + bias[N] (+residual | +fused-downsample) (+ReLU).

    K, N must already be multiples of 128 (weights/activations pre-padded).
    `res_a/res_w/res_scale/res_bias` compute the downsample branch inside the
    kernel epilogue: residual = (res_a @ res_w) * res_scale + res_bias.
    """
    M, K = a.shape
    Kb, N = b.shape
    assert K == Kb and K % 128 == 0 and N % 128 == 0
    has_res = residual is not None
    has_ds = res_a is not None

    # bf16 sublane packing: round M to 16 for lane-dense, unmasked stores.
    Mp = _round_up(M, 16)
    tm = min(Mp, 256)                      # cap 256 -> >=2 parallel M-steps on
    if Mp % tm:                            # the stem conv for v7x's second TC.
        Mp = _round_up(Mp, tm)
    if Mp != M:
        pad = ((0, Mp - M), (0, 0))
        a = jnp.pad(a, pad)
        if has_res:
            residual = jnp.pad(residual, pad)
        if has_ds:
            res_a = jnp.pad(res_a, pad)

    # Full-width 256 tiles for the v6e/v7x MXU; never 384/512 (also keeps
    # per-step DMA granularity modest under v5e's smaller scoped VMEM).
    tn = _largest_divisor(N, (256, 128))
    tk = _largest_divisor(K, (256, 128))
    kk = K // tk
    multi_k = kk > 1
    grid = (Mp // tm, N // tn, kk)

    in_specs = [
        pl.BlockSpec((tm, tk), lambda i, j, k: (i, k)),
        pl.BlockSpec((tk, tn), lambda i, j, k: (k, j)),
        pl.BlockSpec((1, tn), lambda i, j, k: (0, j)),
        pl.BlockSpec((1, tn), lambda i, j, k: (0, j)),
    ]
    args = [a.astype(jnp.bfloat16), b, scale, bias]
    if has_res:
        in_specs.append(pl.BlockSpec((tm, tn), lambda i, j, k: (i, j)))
        args.append(residual.astype(jnp.bfloat16))
    flops = 2 * Mp * K * N
    if has_ds:
        Kr = res_a.shape[1]
        assert Kr % 128 == 0
        in_specs += [
            pl.BlockSpec((tm, Kr), lambda i, j, k: (i, 0)),
            pl.BlockSpec((Kr, tn), lambda i, j, k: (0, j)),
            pl.BlockSpec((1, tn), lambda i, j, k: (0, j)),
            pl.BlockSpec((1, tn), lambda i, j, k: (0, j)),
        ]
        args += [res_a.astype(jnp.bfloat16), res_w, res_scale, res_bias]
        flops += 2 * Mp * Kr * N

    scratch = [pltpu.VMEM((tm, tn), jnp.float32)] if multi_k else []

    out = pl.pallas_call(
        functools.partial(_mm_bn_kernel, relu=relu, has_res=has_res,
                          has_ds=has_ds, multi_k=multi_k),
        out_shape=jax.ShapeDtypeStruct((Mp, N), out_dtype),
        grid=grid,
        in_specs=in_specs,
        out_specs=pl.BlockSpec((tm, tn), lambda i, j, k: (i, j)),
        scratch_shapes=scratch,
        compiler_params=pltpu.CompilerParams(
            dimension_semantics=("parallel", "parallel", "arbitrary")),
        cost_estimate=pl.CostEstimate(
            flops=flops, transcendentals=0,
            bytes_accessed=2 * (Mp * K + K * N + Mp * N)),
    )(*args)
    if Mp != M:
        out = out[:M]
    return out


def conv1x1_bn(x, w, scale, bias, relu=False):
    """1x1 conv + folded BN (+ReLU).  No im2col: a = x.reshape(M, Cpad)."""
    N, H, W, C = x.shape
    a = x.reshape(N * H * W, C)
    out = fused_matmul(a, w, scale, bias, relu=relu)
    return out.reshape(N, H, W, w.shape[1])


def conv_kxk_bn(x, w, scale, bias, kh, kw, stride, padding, cin_real,
                relu=False):
    """KxK conv + folded BN via bf16 im2col feeding the fused tiled matmul."""
    # TODO(synk): gather the KH*KW taps inside the kernel (padded NHWC block /
    # parity planes) instead of materializing the im2col tensor in HBM.
    N, H, W, C = x.shape
    if C != cin_real:
        x = x[..., :cin_real]                      # drop channel padding
    Hout = (H + 2 * padding - kh) // stride + 1
    Wout = (W + 2 * padding - kw) // stride + 1
    xp = jnp.pad(x, ((0, 0), (padding, padding), (padding, padding), (0, 0)))
    pats = [xp[:, ki:ki + Hout * stride:stride, kj:kj + Wout * stride:stride, :]
            for ki in range(kh) for kj in range(kw)]
    a = jnp.concatenate(pats, axis=-1).reshape(N * Hout * Wout,
                                               kh * kw * cin_real)
    a = jnp.pad(a, ((0, 0), (0, w.shape[0] - a.shape[1])))
    out = fused_matmul(a, w, scale, bias, relu=relu)
    return out.reshape(N, Hout, Wout, w.shape[1])


def maxpool_3x3_s2_p1(x):
    """3x3 / stride 2 / pad 1 max-pool (NHWC, channels lane-dense).

    Parity decomposition: tap (ki,kj) of the stride-2 window is a contiguous
    (offset 0/1) slice of parity plane (ki&1, kj&1), so the kernel computes
    only the strided output -- no full-resolution intermediate, no transposes,
    no wrapper [::2, ::2] gather.  At this size everything fits one VMEM block.
    """
    N, H, W, C = x.shape
    Hout = (H - 1) // 2 + 1
    Wout = (W - 1) // 2 + 1
    xp = jnp.pad(x, ((0, 0), (1, 2), (1, 2), (0, 0)), constant_values=-1e30)
    planes = [xp[:, a::2, b::2, :][:, :Hout + 1, :Wout + 1, :]
              for a in (0, 1) for b in (0, 1)]
    in_spec = [pl.BlockSpec((N, Hout + 1, Wout + 1, C),
                            lambda i: (0, 0, 0, 0)) for _ in range(4)]
    return pl.pallas_call(
        _maxpool_kernel,
        out_shape=jax.ShapeDtypeStruct((N, Hout, Wout, C), x.dtype),
        grid=(1,),
        in_specs=in_spec,
        out_specs=pl.BlockSpec((N, Hout, Wout, C), lambda i: (0, 0, 0, 0)),
    )(*planes)


def head_avgpool_fc_sigmoid(x, w_fc, b_fc, num_classes):
    """Global average pool + linear + sigmoid in one kernel."""
    N, H, W, C = x.shape
    xf = x.reshape(N, H * W, C)
    Nb = _round_up(max(N, 8), 8)
    if Nb != N:
        xf = jnp.pad(xf, ((0, Nb - N), (0, 0), (0, 0)))
    ncp = w_fc.shape[1]
    out = pl.pallas_call(
        functools.partial(_head_kernel, inv_hw=1.0 / (H * W)),
        out_shape=jax.ShapeDtypeStruct((Nb, ncp), jnp.float32),
        grid=(1,),
        in_specs=[pl.BlockSpec((Nb, H * W, C), lambda i: (0, 0, 0)),
                  pl.BlockSpec((C, ncp), lambda i: (0, 0)),
                  pl.BlockSpec((1, ncp), lambda i: (0, 0))],
        out_specs=pl.BlockSpec((Nb, ncp), lambda i: (0, 0)),
    )(xf, w_fc, b_fc)
    return out[:N, :num_classes]


# ---------------------------------------------------------------------------
# Parameter construction (deterministic, mirrors the PyTorch __init__ shapes);
# weights stored pre-packed (K x N, bf16, zero-padded to lane multiples) with
# BatchNorm folded into per-channel scale/bias.
# ---------------------------------------------------------------------------
def _fold_bn(conv_bias, gamma, beta, mean, var):
    scale = gamma / jnp.sqrt(var + BN_EPS)
    bias = (conv_bias - mean) * scale + beta
    return scale, bias


def _init_bn(cout):
    return (jnp.ones((cout,), jnp.float32), jnp.zeros((cout,), jnp.float32),
            jnp.zeros((cout,), jnp.float32), jnp.ones((cout,), jnp.float32))


def _init_conv_flat(key, kh, kw, cin, cout, use_bias=True):
    k1, k2 = jax.random.split(key)
    w = jax.random.normal(k1, (kh, kw, cin, cout), jnp.float32) * 0.05
    b = (jax.random.normal(k2, (cout,), jnp.float32) * 0.01
         if use_bias else jnp.zeros((cout,), jnp.float32))
    return w.reshape(kh * kw * cin, cout), b


def _pack_weight(w_flat, scale, bias, k_pad, n_pad):
    K, Cout = w_flat.shape
    wp = jnp.zeros((k_pad, n_pad), jnp.float32).at[:K, :Cout].set(w_flat)
    sp = jnp.zeros((1, n_pad), jnp.float32).at[0, :Cout].set(scale)
    bp = jnp.zeros((1, n_pad), jnp.float32).at[0, :Cout].set(bias)
    return wp.astype(jnp.bfloat16), sp, bp


def _make_conv_params(key, kh, kw, cin, cout, k_pad, use_bias=True):
    w_flat, b = _init_conv_flat(key, kh, kw, cin, cout, use_bias)
    scale, bias = _fold_bn(b, *_init_bn(cout))
    return _pack_weight(w_flat, scale, bias, k_pad, _round_up(cout, 128))


def init_block(key, in_c_real, in_c_pad, inter, has_downsample, stride):
    ks = jax.random.split(key, 4)
    p = {"stride": stride, "inter": inter}
    p["w1"], p["s1"], p["b1"] = _make_conv_params(
        ks[0], 1, 1, in_c_real, inter, k_pad=in_c_pad)
    p["w2"], p["s2"], p["b2"] = _make_conv_params(
        ks[1], 3, 3, inter, inter, k_pad=_round_up(9 * inter, 128))
    p["w3"], p["s3"], p["b3"] = _make_conv_params(
        ks[2], 1, 1, inter, inter * 4, k_pad=_round_up(inter, 128))
    if has_downsample:
        p["wd"], p["sd"], p["bd"] = _make_conv_params(
            ks[3], 1, 1, in_c_real, inter * 4, k_pad=in_c_pad, use_bias=False)
    return p


def init_resnet(key, layers, image_channels, num_classes):
    keys = jax.random.split(key, 8)
    params = {}
    params["conv1_w"], params["conv1_s"], params["conv1_b"] = _make_conv_params(
        keys[0], 7, 7, image_channels, 16,
        k_pad=_round_up(49 * image_channels, 128), use_bias=False)

    in_real, in_pad = 16, 128
    stages = []
    for stage_idx, (num_blocks, inter, stride) in enumerate(
            zip(layers, (16, 32, 64), (1, 2, 2))):
        blocks = []
        bkeys = jax.random.split(keys[1 + stage_idx], num_blocks)
        ds = (stride != 1) or (in_real != inter * 4)
        blocks.append(init_block(bkeys[0], in_real, in_pad, inter, ds, stride))
        in_real, in_pad = inter * 4, _round_up(inter * 4, 128)
        for j in range(1, num_blocks):
            blocks.append(init_block(bkeys[j], in_real, in_pad, inter, False, 1))
        stages.append(blocks)
    params["stages"] = stages

    kfw, kfb = jax.random.split(keys[5])
    fc_w = jax.random.normal(kfw, (in_real, num_classes), jnp.float32) * 0.05
    fc_b = jax.random.normal(kfb, (num_classes,), jnp.float32) * 0.01
    ncp = _round_up(num_classes, 128)
    params["fc_w"] = (jnp.zeros((in_pad, ncp), jnp.float32)
                      .at[:in_real, :num_classes].set(fc_w)
                      ).astype(jnp.bfloat16)
    params["fc_b"] = (jnp.zeros((1, ncp), jnp.float32)
                      .at[0, :num_classes].set(fc_b))
    params["num_classes"] = num_classes
    return params


# ---------------------------------------------------------------------------
# Forward pass
# ---------------------------------------------------------------------------
def apply_block(x, p):
    stride = p["stride"]
    n, h, w, c = x.shape
    y = conv1x1_bn(x, p["w1"], p["s1"], p["b1"])                       # no ReLU
    y = conv_kxk_bn(y, p["w2"], p["s2"], p["b2"], kh=3, kw=3,
                    stride=stride, padding=1, cin_real=p["inter"])     # no ReLU
    nn_, ho, wo, _ = y.shape
    a = y.reshape(nn_ * ho * wo, y.shape[-1])
    if "wd" in p:
        # Downsample conv + BN + residual add + ReLU fused into conv3's kernel.
        # TODO(synk): fold the stride-2 row selection into the matmul A
        # index_map (Element blocks) instead of this wrapper slice.
        xs = x[:, ::stride, ::stride, :] if stride != 1 else x
        res_a = xs.reshape(nn_ * ho * wo, c)
        out = fused_matmul(a, p["w3"], p["s3"], p["b3"],
                           res_a=res_a, res_w=p["wd"],
                           res_scale=p["sd"], res_bias=p["bd"], relu=True)
    else:
        res = x.reshape(nn_ * ho * wo, c)
        out = fused_matmul(a, p["w3"], p["s3"], p["b3"],
                           residual=res, relu=True)
    return out.reshape(nn_, ho, wo, p["w3"].shape[1])


def resnet_forward(params, x_nchw):
    # PyTorch NCHW input -> NHWC bf16 for the kernels
    x = jnp.transpose(x_nchw, (0, 2, 3, 1)).astype(jnp.bfloat16)
    x = conv_kxk_bn(x, params["conv1_w"], params["conv1_s"], params["conv1_b"],
                    kh=7, kw=7, stride=2, padding=3, cin_real=x.shape[-1],
                    relu=True)
    x = maxpool_3x3_s2_p1(x)
    for stage in params["stages"]:
        for blk in stage:
            x = apply_block(x, blk)
    return head_avgpool_fc_sigmoid(x, params["fc_w"], params["fc_b"],
                                   params["num_classes"])


# ---------------------------------------------------------------------------
if __name__ == "__main__":
    key = jax.random.PRNGKey(0)
    k_in, k_param = jax.random.split(key)

    batch, image_channels, spatial, num_classes = 2, 3, 32, 10
    layers = [1, 1, 1]

    x = jax.random.normal(k_in, (batch, image_channels, spatial, spatial),
                          jnp.float32)
    params = init_resnet(k_param, layers, image_channels, num_classes)

    fwd = jax.jit(lambda inp: resnet_forward(params, inp))
    out = jax.block_until_ready(fwd(x))

    assert out.shape == (batch, num_classes)
    assert bool(jnp.all(jnp.isfinite(out)))
    print("KERNEL_OK")
</pallas_src>

<mosaic_0001>
module attributes {stable_mosaic.version = 11 : i64} {
  func.func @_mm_bn_kernel(%arg0: i32, %arg1: i32, %arg2: i32, %arg3: memref<256x256xbf16, #tpu.memory_space<vmem>>, %arg4: memref<256x128xbf16, #tpu.memory_space<vmem>>, %arg5: memref<1x128xf32, #tpu.memory_space<vmem>>, %arg6: memref<1x128xf32, #tpu.memory_space<vmem>>, %arg7: memref<256x128xbf16, #tpu.memory_space<vmem>>) attributes {dimension_semantics = [#tpu.dimension_semantics<parallel>, #tpu.dimension_semantics<parallel>, #tpu.dimension_semantics<arbitrary>], iteration_bounds = array<i64: 2, 1, 1>, scalar_prefetch = 0 : i64, scratch_operands = 0 : i64, tpu.core_type = #tpu.core_type<tc>, window_params = [{transform_indices = @transform_0, window_bounds = array<i64: 256, 256>}, {transform_indices = @transform_1, window_bounds = array<i64: 256, 128>}, {transform_indices = @transform_2, window_bounds = array<i64: 1, 128>}, {transform_indices = @transform_3, window_bounds = array<i64: 1, 128>}, {transform_indices = @transform_4, window_bounds = array<i64: 256, 128>}]} {
    %c0 = arith.constant 0 : index
    %c0_0 = arith.constant 0 : index
    %0 = vector.load %arg3[%c0, %c0_0] : memref<256x256xbf16, #tpu.memory_space<vmem>>, vector<256x256xbf16>
    %c0_1 = arith.constant 0 : index
    %c0_2 = arith.constant 0 : index
    %1 = vector.load %arg4[%c0_1, %c0_2] : memref<256x128xbf16, #tpu.memory_space<vmem>>, vector<256x128xbf16>
    %cst = arith.constant dense<0.000000e+00> : vector<256x128xf32>
    %2 = tpu.matmul %0, %1, %cst {dimension_numbers = #tpu.dot_dimension_numbers<[1], [0], [0], [1], [0, 0, 1, 1], [], []>} : vector<256x256xbf16>, vector<256x128xbf16>, vector<256x128xf32> -> vector<256x128xf32>
    %c0_3 = arith.constant 0 : index
    %c0_4 = arith.constant 0 : index
    %3 = vector.load %arg5[%c0_3, %c0_4] : memref<1x128xf32, #tpu.memory_space<vmem>>, vector<1x128xf32>
    %4 = vector.broadcast %3 : vector<1x128xf32> to vector<256x128xf32>
    %5 = arith.mulf %2, %4 : vector<256x128xf32>
    %c0_5 = arith.constant 0 : index
    %c0_6 = arith.constant 0 : index
    %6 = vector.load %arg6[%c0_5, %c0_6] : memref<1x128xf32, #tpu.memory_space<vmem>>, vector<1x128xf32>
    %7 = vector.broadcast %6 : vector<1x128xf32> to vector<256x128xf32>
    %8 = arith.addf %5, %7 : vector<256x128xf32>
    %cst_7 = arith.constant 0.000000e+00 : f32
    %9 = vector.broadcast %cst_7 : f32 to vector<256x128xf32>
    %10 = arith.maximumf %8, %9 : vector<256x128xf32>
    %11 = arith.truncf %10 : vector<256x128xf32> to vector<256x128xbf16>
    %c0_8 = arith.constant 0 : index
    %c0_9 = arith.constant 0 : index
    %12 = vector.load %arg7[%c0_8, %c0_9] : memref<256x128xbf16, #tpu.memory_space<vmem>>, vector<256x128xbf16>
    tpu.vector_store %arg7[%c0_8, %c0_9], %11 {strides = array<i32>} : memref<256x128xbf16, #tpu.memory_space<vmem>>, vector<256x128xbf16>,
    return
  }
  func.func @transform_0(%arg0: i32, %arg1: i32, %arg2: i32) -> (i32, i32) {
    %c0_i32 = arith.constant 0 : i32
    return %arg0, %arg2 : i32, i32
  }
  func.func @transform_1(%arg0: i32, %arg1: i32, %arg2: i32) -> (i32, i32) {
    %c0_i32 = arith.constant 0 : i32
    return %arg2, %arg1 : i32, i32
  }
  func.func @transform_2(%arg0: i32, %arg1: i32, %arg2: i32) -> (i32, i32) {
    %c0_i32 = arith.constant 0 : i32
    %c0_i32_0 = arith.constant 0 : i32
    return %c0_i32, %arg1 : i32, i32
  }
  func.func @transform_3(%arg0: i32, %arg1: i32, %arg2: i32) -> (i32, i32) {
    %c0_i32 = arith.constant 0 : i32
    %c0_i32_0 = arith.constant 0 : i32
    return %c0_i32, %arg1 : i32, i32
  }
  func.func @transform_4(%arg0: i32, %arg1: i32, %arg2: i32) -> (i32, i32) {
    %c0_i32 = arith.constant 0 : i32
    return %arg0, %arg1 : i32, i32
  }
}

module attributes {stable_mosaic.version = 11 : i64} {
  func.func @_maxpool_kernel(%arg0: i32, %arg1: memref<2x9x9x128xbf16, #tpu.memory_space<vmem>>, %arg2: memref<2x9x9x128xbf16, #tpu.memory_space<vmem>>, %arg3: memref<2x9x9x128xbf16, #tpu.memory_space<vmem>>, %arg4: memref<2x9x9x128xbf16, #tpu.memory_space<vmem>>, %arg5: memref<2x8x8x128xbf16, #tpu.memory_space<vmem>>) attributes {dimension_semantics = [#tpu.dimension_semantics<arbitrary>], iteration_bounds = array<i64: 1>, scalar_prefetch = 0 : i64, scratch_operands = 0 : i64, tpu.core_type = #tpu.core_type<tc>, window_params = [{pipeline_mode = #tpu.pipeline_mode<synchronous>, transform_indices = @transform_0, window_bounds = array<i64: 2, 9, 9, 128>}, {pipeline_mode = #tpu.pipeline_mode<synchronous>, transform_indices = @transform_1, window_bounds = array<i64: 2, 9, 9, 128>}, {pipeline_mode = #tpu.pipeline_mode<synchronous>, transform_indices = @transform_2, window_bounds = array<i64: 2, 9, 9, 128>}, {pipeline_mode = #tpu.pipeline_mode<synchronous>, transform_indices = @transform_3, window_bounds = array<i64: 2, 9, 9, 128>}, {pipeline_mode = #tpu.pipeline_mode<synchronous>, transform_indices = @transform_4, window_bounds = array<i64: 2, 8, 8, 128>}]} {
    %c0 = arith.constant 0 : index
    %c0_0 = arith.constant 0 : index
    %c0_1 = arith.constant 0 : index
    %c0_2 = arith.constant 0 : index
    %0 = vector.load %arg1[%c0, %c0_0, %c0_1, %c0_2] : memref<2x9x9x128xbf16, #tpu.memory_space<vmem>>, vector<2x9x9x128xbf16>
    %c0_3 = arith.constant 0 : index
    %c0_4 = arith.constant 0 : index
    %c0_5 = arith.constant 0 : index
    %c0_6 = arith.constant 0 : index
    %1 = vector.load %arg2[%c0_3, %c0_4, %c0_5, %c0_6] : memref<2x9x9x128xbf16, #tpu.memory_space<vmem>>, vector<2x9x9x128xbf16>
    %c0_7 = arith.constant 0 : index
    %c0_8 = arith.constant 0 : index
    %c0_9 = arith.constant 0 : index
    %c0_10 = arith.constant 0 : index
    %2 = vector.load %arg3[%c0_7, %c0_8, %c0_9, %c0_10] : memref<2x9x9x128xbf16, #tpu.memory_space<vmem>>, vector<2x9x9x128xbf16>
    %c0_11 = arith.constant 0 : index
    %c0_12 = arith.constant 0 : index
    %c0_13 = arith.constant 0 : index
    %c0_14 = arith.constant 0 : index
    %3 = vector.load %arg4[%c0_11, %c0_12, %c0_13, %c0_14] : memref<2x9x9x128xbf16, #tpu.memory_space<vmem>>, vector<2x9x9x128xbf16>
    %4 = vector.extract_strided_slice %0 {offsets = [0, 0, 0, 0], sizes = [2, 8, 8, 128], strides = [1, 1, 1, 1]} : vector<2x9x9x128xbf16> to vector<2x8x8x128xbf16>
    %5 = vector.extract_strided_slice %1 {offsets = [0, 0, 0, 0], sizes = [2, 8, 8, 128], strides = [1, 1, 1, 1]} : vector<2x9x9x128xbf16> to vector<2x8x8x128xbf16>
    %6 = arith.maximumf %4, %5 : vector<2x8x8x128xbf16>
    %7 = vector.extract_strided_slice %0 {offsets = [0, 0, 1, 0], sizes = [2, 8, 8, 128], strides = [1, 1, 1, 1]} : vector<2x9x9x128xbf16> to vector<2x8x8x128xbf16>
    %8 = arith.maximumf %6, %7 : vector<2x8x8x128xbf16>
    %9 = vector.extract_strided_slice %2 {offsets = [0, 0, 0, 0], sizes = [2, 8, 8, 128], strides = [1, 1, 1, 1]} : vector<2x9x9x128xbf16> to vector<2x8x8x128xbf16>
    %10 = arith.maximumf %8, %9 : vector<2x8x8x128xbf16>
    %11 = vector.extract_strided_slice %3 {offsets = [0, 0, 0, 0], sizes = [2, 8, 8, 128], strides = [1, 1, 1, 1]} : vector<2x9x9x128xbf16> to vector<2x8x8x128xbf16>
    %12 = arith.maximumf %10, %11 : vector<2x8x8x128xbf16>
    %13 = vector.extract_strided_slice %2 {offsets = [0, 0, 1, 0], sizes = [2, 8, 8, 128], strides = [1, 1, 1, 1]} : vector<2x9x9x128xbf16> to vector<2x8x8x128xbf16>
    %14 = arith.maximumf %12, %13 : vector<2x8x8x128xbf16>
    %15 = vector.extract_strided_slice %0 {offsets = [0, 1, 0, 0], sizes = [2, 8, 8, 128], strides = [1, 1, 1, 1]} : vector<2x9x9x128xbf16> to vector<2x8x8x128xbf16>
    %16 = arith.maximumf %14, %15 : vector<2x8x8x128xbf16>
    %17 = vector.extract_strided_slice %1 {offsets = [0, 1, 0, 0], sizes = [2, 8, 8, 128], strides = [1, 1, 1, 1]} : vector<2x9x9x128xbf16> to vector<2x8x8x128xbf16>
    %18 = arith.maximumf %16, %17 : vector<2x8x8x128xbf16>
    %19 = vector.extract_strided_slice %0 {offsets = [0, 1, 1, 0], sizes = [2, 8, 8, 128], strides = [1, 1, 1, 1]} : vector<2x9x9x128xbf16> to vector<2x8x8x128xbf16>
    %20 = arith.maximumf %18, %19 : vector<2x8x8x128xbf16>
    %c0_15 = arith.constant 0 : index
    %c0_16 = arith.constant 0 : index
    %c0_17 = arith.constant 0 : index
    %c0_18 = arith.constant 0 : index
    %21 = vector.load %arg5[%c0_15, %c0_16, %c0_17, %c0_18] : memref<2x8x8x128xbf16, #tpu.memory_space<vmem>>, vector<2x8x8x128xbf16>
    tpu.vector_store %arg5[%c0_15, %c0_16, %c0_17, %c0_18], %20 {strides = array<i32>} : memref<2x8x8x128xbf16, #tpu.memory_space<vmem>>, vector<2x8x8x128xbf16>,
    return
  }
  func.func @transform_0(%arg0: i32) -> (i32, i32, i32, i32) {
    %c0_i32 = arith.constant 0 : i32
    %c0_i32_0 = arith.constant 0 : i32
    %c0_i32_1 = arith.constant 0 : i32
    %c0_i32_2 = arith.constant 0 : i32
    %c0_i32_3 = arith.constant 0 : i32
    return %c0_i32, %c0_i32_0, %c0_i32_1, %c0_i32_2 : i32, i32, i32, i32
  }
  func.func @transform_1(%arg0: i32) -> (i32, i32, i32, i32) {
    %c0_i32 = arith.constant 0 : i32
    %c0_i32_0 = arith.constant 0 : i32
    %c0_i32_1 = arith.constant 0 : i32
    %c0_i32_2 = arith.constant 0 : i32
    %c0_i32_3 = arith.constant 0 : i32
    return %c0_i32, %c0_i32_0, %c0_i32_1, %c0_i32_2 : i32, i32, i32, i32
  }
  func.func @transform_2(%arg0: i32) -> (i32, i32, i32, i32) {
    %c0_i32 = arith.constant 0 : i32
    %c0_i32_0 = arith.constant 0 : i32
    %c0_i32_1 = arith.constant 0 : i32
    %c0_i32_2 = arith.constant 0 : i32
    %c0_i32_3 = arith.constant 0 : i32
    return %c0_i32, %c0_i32_0, %c0_i32_1, %c0_i32_2 : i32, i32, i32, i32
  }
  func.func @transform_3(%arg0: i32) -> (i32, i32, i32, i32) {
    %c0_i32 = arith.constant 0 : i32
    %c0_i32_0 = arith.constant 0 : i32
    %c0_i32_1 = arith.constant 0 : i32
    %c0_i32_2 = arith.constant 0 : i32
    %c0_i32_3 = arith.constant 0 : i32
    return %c0_i32, %c0_i32_0, %c0_i32_1, %c0_i32_2 : i32, i32, i32, i32
  }
  func.func @transform_4(%arg0: i32) -> (i32, i32, i32, i32) {
    %c0_i32 = arith.constant 0 : i32
    %c0_i32_0 = arith.constant 0 : i32
    %c0_i32_1 = arith.constant 0 : i32
    %c0_i32_2 = arith.constant 0 : i32
    %c0_i32_3 = arith.constant 0 : i32
    return %c0_i32, %c0_i32_0, %c0_i32_1, %c0_i32_2 : i32, i32, i32, i32
  }
}

module attributes {stable_mosaic.version = 11 : i64} {
  func.func @_mm_bn_kernel(%arg0: i32, %arg1: i32, %arg2: i32, %arg3: memref<128x128xbf16, #tpu.memory_space<vmem>>, %arg4: memref<128x128xbf16, #tpu.memory_space<vmem>>, %arg5: memref<1x128xf32, #tpu.memory_space<vmem>>, %arg6: memref<1x128xf32, #tpu.memory_space<vmem>>, %arg7: memref<128x128xbf16, #tpu.memory_space<vmem>>) attributes {dimension_semantics = [#tpu.dimension_semantics<parallel>, #tpu.dimension_semantics<parallel>, #tpu.dimension_semantics<arbitrary>], iteration_bounds = array<i64: 1, 1, 1>, scalar_prefetch = 0 : i64, scratch_operands = 0 : i64, tpu.core_type = #tpu.core_type<tc>, window_params = [{transform_indices = @transform_0, window_bounds = array<i64: 128, 128>}, {transform_indices = @transform_1, window_bounds = array<i64: 128, 128>}, {transform_indices = @transform_2, window_bounds = array<i64: 1, 128>}, {transform_indices = @transform_3, window_bounds = array<i64: 1, 128>}, {transform_indices = @transform_4, window_bounds = array<i64: 128, 128>}]} {
    %c0 = arith.constant 0 : index
    %c0_0 = arith.constant 0 : index
    %0 = vector.load %arg3[%c0, %c0_0] : memref<128x128xbf16, #tpu.memory_space<vmem>>, vector<128x128xbf16>
    %c0_1 = arith.constant 0 : index
    %c0_2 = arith.constant 0 : index
    %1 = vector.load %arg4[%c0_1, %c0_2] : memref<128x128xbf16, #tpu.memory_space<vmem>>, vector<128x128xbf16>
    %cst = arith.constant dense<0.000000e+00> : vector<128x128xf32>
    %2 = tpu.matmul %0, %1, %cst {dimension_numbers = #tpu.dot_dimension_numbers<[1], [0], [0], [1], [0, 0, 1, 1], [], []>} : vector<128x128xbf16>, vector<128x128xbf16>, vector<128x128xf32> -> vector<128x128xf32>
    %c0_3 = arith.constant 0 : index
    %c0_4 = arith.constant 0 : index
    %3 = vector.load %arg5[%c0_3, %c0_4] : memref<1x128xf32, #tpu.memory_space<vmem>>, vector<1x128xf32>
    %4 = vector.broadcast %3 : vector<1x128xf32> to vector<128x128xf32>
    %5 = arith.mulf %2, %4 : vector<128x128xf32>
    %c0_5 = arith.constant 0 : index
    %c0_6 = arith.constant 0 : index
    %6 = vector.load %arg6[%c0_5, %c0_6] : memref<1x128xf32, #tpu.memory_space<vmem>>, vector<1x128xf32>
    %7 = vector.broadcast %6 : vector<1x128xf32> to vector<128x128xf32>
    %8 = arith.addf %5, %7 : vector<128x128xf32>
    %9 = arith.truncf %8 : vector<128x128xf32> to vector<128x128xbf16>
    %c0_7 = arith.constant 0 : index
    %c0_8 = arith.constant 0 : index
    %10 = vector.load %arg7[%c0_7, %c0_8] : memref<128x128xbf16, #tpu.memory_space<vmem>>, vector<128x128xbf16>
    tpu.vector_store %arg7[%c0_7, %c0_8], %9 {strides = array<i32>} : memref<128x128xbf16, #tpu.memory_space<vmem>>, vector<128x128xbf16>,
    return
  }
  func.func @transform_0(%arg0: i32, %arg1: i32, %arg2: i32) -> (i32, i32) {
    %c0_i32 = arith.constant 0 : i32
    return %arg0, %arg2 : i32, i32
  }
  func.func @transform_1(%arg0: i32, %arg1: i32, %arg2: i32) -> (i32, i32) {
    %c0_i32 = arith.constant 0 : i32
    return %arg2, %arg1 : i32, i32
  }
  func.func @transform_2(%arg0: i32, %arg1: i32, %arg2: i32) -> (i32, i32) {
    %c0_i32 = arith.constant 0 : i32
    %c0_i32_0 = arith.constant 0 : i32
    return %c0_i32, %arg1 : i32, i32
  }
  func.func @transform_3(%arg0: i32, %arg1: i32, %arg2: i32) -> (i32, i32) {
    %c0_i32 = arith.constant 0 : i32
    %c0_i32_0 = arith.constant 0 : i32
    return %c0_i32, %arg1 : i32, i32
  }
  func.func @transform_4(%arg0: i32, %arg1: i32, %arg2: i32) -> (i32, i32) {
    %c0_i32 = arith.constant 0 : i32
    return %arg0, %arg1 : i32, i32
  }
}

module attributes {stable_mosaic.version = 11 : i64} {
  func.func @_mm_bn_kernel(%arg0: i32, %arg1: i32, %arg2: i32, %arg3: memref<128x128xbf16, #tpu.memory_space<vmem>>, %arg4: memref<128x128xbf16, #tpu.memory_space<vmem>>, %arg5: memref<1x128xf32, #tpu.memory_space<vmem>>, %arg6: memref<1x128xf32, #tpu.memory_space<vmem>>, %arg7: memref<128x128xbf16, #tpu.memory_space<vmem>>, %arg8: memref<128x128xbf16, #tpu.memory_space<vmem>>, %arg9: memref<1x128xf32, #tpu.memory_space<vmem>>, %arg10: memref<1x128xf32, #tpu.memory_space<vmem>>, %arg11: memref<128x128xbf16, #tpu.memory_space<vmem>>) attributes {dimension_semantics = [#tpu.dimension_semantics<parallel>, #tpu.dimension_semantics<parallel>, #tpu.dimension_semantics<arbitrary>], iteration_bounds = array<i64: 1, 1, 1>, scalar_prefetch = 0 : i64, scratch_operands = 0 : i64, tpu.core_type = #tpu.core_type<tc>, window_params = [{transform_indices = @transform_0, window_bounds = array<i64: 128, 128>}, {transform_indices = @transform_1, window_bounds = array<i64: 128, 128>}, {transform_indices = @transform_2, window_bounds = array<i64: 1, 128>}, {transform_indices = @transform_3, window_bounds = array<i64: 1, 128>}, {transform_indices = @transform_4, window_bounds = array<i64: 128, 128>}, {transform_indices = @transform_5, window_bounds = array<i64: 128, 128>}, {transform_indices = @transform_6, window_bounds = array<i64: 1, 128>}, {transform_indices = @transform_7, window_bounds = array<i64: 1, 128>}, {transform_indices = @transform_8, window_bounds = array<i64: 128, 128>}]} {
    %c0 = arith.constant 0 : index
    %c0_0 = arith.constant 0 : index
    %0 = vector.load %arg3[%c0, %c0_0] : memref<128x128xbf16, #tpu.memory_space<vmem>>, vector<128x128xbf16>
    %c0_1 = arith.constant 0 : index
    %c0_2 = arith.constant 0 : index
    %1 = vector.load %arg4[%c0_1, %c0_2] : memref<128x128xbf16, #tpu.memory_space<vmem>>, vector<128x128xbf16>
    %cst = arith.constant dense<0.000000e+00> : vector<128x128xf32>
    %2 = tpu.matmul %0, %1, %cst {dimension_numbers = #tpu.dot_dimension_numbers<[1], [0], [0], [1], [0, 0, 1, 1], [], []>} : vector<128x128xbf16>, vector<128x128xbf16>, vector<128x128xf32> -> vector<128x128xf32>
    %c0_3 = arith.constant 0 : index
    %c0_4 = arith.constant 0 : index
    %3 = vector.load %arg5[%c0_3, %c0_4] : memref<1x128xf32, #tpu.memory_space<vmem>>, vector<1x128xf32>
    %4 = vector.broadcast %3 : vector<1x128xf32> to vector<128x128xf32>
    %5 = arith.mulf %2, %4 : vector<128x128xf32>
    %c0_5 = arith.constant 0 : index
    %c0_6 = arith.constant 0 : index
    %6 = vector.load %arg6[%c0_5, %c0_6] : memref<1x128xf32, #tpu.memory_space<vmem>>, vector<1x128xf32>
    %7 = vector.broadcast %6 : vector<1x128xf32> to vector<128x128xf32>
    %8 = arith.addf %5, %7 : vector<128x128xf32>
    %c0_7 = arith.constant 0 : index
    %c0_8 = arith.constant 0 : index
    %9 = vector.load %arg7[%c0_7, %c0_8] : memref<128x128xbf16, #tpu.memory_space<vmem>>, vector<128x128xbf16>
    %c0_9 = arith.constant 0 : index
    %c0_10 = arith.constant 0 : index
    %10 = vector.load %arg8[%c0_9, %c0_10] : memref<128x128xbf16, #tpu.memory_space<vmem>>, vector<128x128xbf16>
    %cst_11 = arith.constant dense<0.000000e+00> : vector<128x128xf32>
    %11 = tpu.matmul %9, %10, %cst_11 {dimension_numbers = #tpu.dot_dimension_numbers<[1], [0], [0], [1], [0, 0, 1, 1], [], []>} : vector<128x128xbf16>, vector<128x128xbf16>, vector<128x128xf32> -> vector<128x128xf32>
    %c0_12 = arith.constant 0 : index
    %c0_13 = arith.constant 0 : index
    %12 = vector.load %arg9[%c0_12, %c0_13] : memref<1x128xf32, #tpu.memory_space<vmem>>, vector<1x128xf32>
    %13 = vector.broadcast %12 : vector<1x128xf32> to vector<128x128xf32>
    %14 = arith.mulf %11, %13 : vector<128x128xf32>
    %c0_14 = arith.constant 0 : index
    %c0_15 = arith.constant 0 : index
    %15 = vector.load %arg10[%c0_14, %c0_15] : memref<1x128xf32, #tpu.memory_space<vmem>>, vector<1x128xf32>
    %16 = vector.broadcast %15 : vector<1x128xf32> to vector<128x128xf32>
    %17 = arith.addf %14, %16 : vector<128x128xf32>
    %18 = arith.addf %8, %17 : vector<128x128xf32>
    %cst_16 = arith.constant 0.000000e+00 : f32
    %19 = vector.broadcast %cst_16 : f32 to vector<128x128xf32>
    %20 = arith.maximumf %18, %19 : vector<128x128xf32>
    %21 = arith.truncf %20 : vector<128x128xf32> to vector<128x128xbf16>
    %c0_17 = arith.constant 0 : index
    %c0_18 = arith.constant 0 : index
    %22 = vector.load %arg11[%c0_17, %c0_18] : memref<128x128xbf16, #tpu.memory_space<vmem>>, vector<128x128xbf16>
    tpu.vector_store %arg11[%c0_17, %c0_18], %21 {strides = array<i32>} : memref<128x128xbf16, #tpu.memory_space<vmem>>, vector<128x128xbf16>,
    return
  }
  func.func @transform_0(%arg0: i32, %arg1: i32, %arg2: i32) -> (i32, i32) {
    %c0_i32 = arith.constant 0 : i32
    return %arg0, %arg2 : i32, i32
  }
  func.func @transform_1(%arg0: i32, %arg1: i32, %arg2: i32) -> (i32, i32) {
    %c0_i32 = arith.constant 0 : i32
    return %arg2, %arg1 : i32, i32
  }
  func.func @transform_2(%arg0: i32, %arg1: i32, %arg2: i32) -> (i32, i32) {
    %c0_i32 = arith.constant 0 : i32
    %c0_i32_0 = arith.constant 0 : i32
    return %c0_i32, %arg1 : i32, i32
  }
  func.func @transform_3(%arg0: i32, %arg1: i32, %arg2: i32) -> (i32, i32) {
    %c0_i32 = arith.constant 0 : i32
    %c0_i32_0 = arith.constant 0 : i32
    return %c0_i32, %arg1 : i32, i32
  }
  func.func @transform_4(%arg0: i32, %arg1: i32, %arg2: i32) -> (i32, i32) {
    %c0_i32 = arith.constant 0 : i32
    %c0_i32_0 = arith.constant 0 : i32
    return %arg0, %c0_i32 : i32, i32
  }
  func.func @transform_5(%arg0: i32, %arg1: i32, %arg2: i32) -> (i32, i32) {
    %c0_i32 = arith.constant 0 : i32
    %c0_i32_0 = arith.constant 0 : i32
    return %c0_i32, %arg1 : i32, i32
  }
  func.func @transform_6(%arg0: i32, %arg1: i32, %arg2: i32) -> (i32, i32) {
    %c0_i32 = arith.constant 0 : i32
    %c0_i32_0 = arith.constant 0 : i32
    return %c0_i32, %arg1 : i32, i32
  }
  func.func @transform_7(%arg0: i32, %arg1: i32, %arg2: i32) -> (i32, i32) {
    %c0_i32 = arith.constant 0 : i32
    %c0_i32_0 = arith.constant 0 : i32
    return %c0_i32, %arg1 : i32, i32
  }
  func.func @transform_8(%arg0: i32, %arg1: i32, %arg2: i32) -> (i32, i32) {
    %c0_i32 = arith.constant 0 : i32
    return %arg0, %arg1 : i32, i32
  }
}

module attributes {stable_mosaic.version = 11 : i64} {
  func.func @_mm_bn_kernel(%arg0: i32, %arg1: i32, %arg2: i32, %arg3: memref<128x256xbf16, #tpu.memory_space<vmem>>, %arg4: memref<256x128xbf16, #tpu.memory_space<vmem>>, %arg5: memref<1x128xf32, #tpu.memory_space<vmem>>, %arg6: memref<1x128xf32, #tpu.memory_space<vmem>>, %arg7: memref<128x128xbf16, #tpu.memory_space<vmem>>) attributes {dimension_semantics = [#tpu.dimension_semantics<parallel>, #tpu.dimension_semantics<parallel>, #tpu.dimension_semantics<arbitrary>], iteration_bounds = array<i64: 1, 1, 1>, scalar_prefetch = 0 : i64, scratch_operands = 0 : i64, tpu.core_type = #tpu.core_type<tc>, window_params = [{transform_indices = @transform_0, window_bounds = array<i64: 128, 256>}, {transform_indices = @transform_1, window_bounds = array<i64: 256, 128>}, {transform_indices = @transform_2, window_bounds = array<i64: 1, 128>}, {transform_indices = @transform_3, window_bounds = array<i64: 1, 128>}, {transform_indices = @transform_4, window_bounds = array<i64: 128, 128>}]} {
    %c0 = arith.constant 0 : index
    %c0_0 = arith.constant 0 : index
    %0 = vector.load %arg3[%c0, %c0_0] : memref<128x256xbf16, #tpu.memory_space<vmem>>, vector<128x256xbf16>
    %c0_1 = arith.constant 0 : index
    %c0_2 = arith.constant 0 : index
    %1 = vector.load %arg4[%c0_1, %c0_2] : memref<256x128xbf16, #tpu.memory_space<vmem>>, vector<256x128xbf16>
    %cst = arith.constant dense<0.000000e+00> : vector<128x128xf32>
    %2 = tpu.matmul %0, %1, %cst {dimension_numbers = #tpu.dot_dimension_numbers<[1], [0], [0], [1], [0, 0, 1, 1], [], []>} : vector<128x256xbf16>, vector<256x128xbf16>, vector<128x128xf32> -> vector<128x128xf32>
    %c0_3 = arith.constant 0 : index
    %c0_4 = arith.constant 0 : index
    %3 = vector.load %arg5[%c0_3, %c0_4] : memref<1x128xf32, #tpu.memory_space<vmem>>, vector<1x128xf32>
    %4 = vector.broadcast %3 : vector<1x128xf32> to vector<128x128xf32>
    %5 = arith.mulf %2, %4 : vector<128x128xf32>
    %c0_5 = arith.constant 0 : index
    %c0_6 = arith.constant 0 : index
    %6 = vector.load %arg6[%c0_5, %c0_6] : memref<1x128xf32, #tpu.memory_space<vmem>>, vector<1x128xf32>
    %7 = vector.broadcast %6 : vector<1x128xf32> to vector<128x128xf32>
    %8 = arith.addf %5, %7 : vector<128x128xf32>
    %9 = arith.truncf %8 : vector<128x128xf32> to vector<128x128xbf16>
    %c0_7 = arith.constant 0 : index
    %c0_8 = arith.constant 0 : index
    %10 = vector.load %arg7[%c0_7, %c0_8] : memref<128x128xbf16, #tpu.memory_space<vmem>>, vector<128x128xbf16>
    tpu.vector_store %arg7[%c0_7, %c0_8], %9 {strides = array<i32>} : memref<128x128xbf16, #tpu.memory_space<vmem>>, vector<128x128xbf16>,
    return
  }
  func.func @transform_0(%arg0: i32, %arg1: i32, %arg2: i32) -> (i32, i32) {
    %c0_i32 = arith.constant 0 : i32
    return %arg0, %arg2 : i32, i32
  }
  func.func @transform_1(%arg0: i32, %arg1: i32, %arg2: i32) -> (i32, i32) {
    %c0_i32 = arith.constant 0 : i32
    return %arg2, %arg1 : i32, i32
  }
  func.func @transform_2(%arg0: i32, %arg1: i32, %arg2: i32) -> (i32, i32) {
    %c0_i32 = arith.constant 0 : i32
    %c0_i32_0 = arith.constant 0 : i32
    return %c0_i32, %arg1 : i32, i32
  }
  func.func @transform_3(%arg0: i32, %arg1: i32, %arg2: i32) -> (i32, i32) {
    %c0_i32 = arith.constant 0 : i32
    %c0_i32_0 = arith.constant 0 : i32
    return %c0_i32, %arg1 : i32, i32
  }
  func.func @transform_4(%arg0: i32, %arg1: i32, %arg2: i32) -> (i32, i32) {
    %c0_i32 = arith.constant 0 : i32
    return %arg0, %arg1 : i32, i32
  }
}

module attributes {stable_mosaic.version = 11 : i64} {
  func.func @_mm_bn_kernel(%arg0: i32, %arg1: i32, %arg2: i32, %arg3: memref<32x128xbf16, #tpu.memory_space<vmem>>, %arg4: memref<128x128xbf16, #tpu.memory_space<vmem>>, %arg5: memref<1x128xf32, #tpu.memory_space<vmem>>, %arg6: memref<1x128xf32, #tpu.memory_space<vmem>>, %arg7: memref<32x128xbf16, #tpu.memory_space<vmem>>) attributes {dimension_semantics = [#tpu.dimension_semantics<parallel>, #tpu.dimension_semantics<parallel>, #tpu.dimension_semantics<arbitrary>], iteration_bounds = array<i64: 1, 1, 1>, scalar_prefetch = 0 : i64, scratch_operands = 0 : i64, tpu.core_type = #tpu.core_type<tc>, window_params = [{transform_indices = @transform_0, window_bounds = array<i64: 32, 128>}, {transform_indices = @transform_1, window_bounds = array<i64: 128, 128>}, {transform_indices = @transform_2, window_bounds = array<i64: 1, 128>}, {transform_indices = @transform_3, window_bounds = array<i64: 1, 128>}, {transform_indices = @transform_4, window_bounds = array<i64: 32, 128>}]} {
    %c0 = arith.constant 0 : index
    %c0_0 = arith.constant 0 : index
    %0 = vector.load %arg3[%c0, %c0_0] : memref<32x128xbf16, #tpu.memory_space<vmem>>, vector<32x128xbf16>
    %c0_1 = arith.constant 0 : index
    %c0_2 = arith.constant 0 : index
    %1 = vector.load %arg4[%c0_1, %c0_2] : memref<128x128xbf16, #tpu.memory_space<vmem>>, vector<128x128xbf16>
    %cst = arith.constant dense<0.000000e+00> : vector<32x128xf32>
    %2 = tpu.matmul %0, %1, %cst {dimension_numbers = #tpu.dot_dimension_numbers<[1], [0], [0], [1], [0, 0, 1, 1], [], []>} : vector<32x128xbf16>, vector<128x128xbf16>, vector<32x128xf32> -> vector<32x128xf32>
    %c0_3 = arith.constant 0 : index
    %c0_4 = arith.constant 0 : index
    %3 = vector.load %arg5[%c0_3, %c0_4] : memref<1x128xf32, #tpu.memory_space<vmem>>, vector<1x128xf32>
    %4 = vector.broadcast %3 : vector<1x128xf32> to vector<32x128xf32>
    %5 = arith.mulf %2, %4 : vector<32x128xf32>
    %c0_5 = arith.constant 0 : index
    %c0_6 = arith.constant 0 : index
    %6 = vector.load %arg6[%c0_5, %c0_6] : memref<1x128xf32, #tpu.memory_space<vmem>>, vector<1x128xf32>
    %7 = vector.broadcast %6 : vector<1x128xf32> to vector<32x128xf32>
    %8 = arith.addf %5, %7 : vector<32x128xf32>
    %9 = arith.truncf %8 : vector<32x128xf32> to vector<32x128xbf16>
    %c0_7 = arith.constant 0 : index
    %c0_8 = arith.constant 0 : index
    %10 = vector.load %arg7[%c0_7, %c0_8] : memref<32x128xbf16, #tpu.memory_space<vmem>>, vector<32x128xbf16>
    tpu.vector_store %arg7[%c0_7, %c0_8], %9 {strides = array<i32>} : memref<32x128xbf16, #tpu.memory_space<vmem>>, vector<32x128xbf16>,
    return
  }
  func.func @transform_0(%arg0: i32, %arg1: i32, %arg2: i32) -> (i32, i32) {
    %c0_i32 = arith.constant 0 : i32
    return %arg0, %arg2 : i32, i32
  }
  func.func @transform_1(%arg0: i32, %arg1: i32, %arg2: i32) -> (i32, i32) {
    %c0_i32 = arith.constant 0 : i32
    return %arg2, %arg1 : i32, i32
  }
  func.func @transform_2(%arg0: i32, %arg1: i32, %arg2: i32) -> (i32, i32) {
    %c0_i32 = arith.constant 0 : i32
    %c0_i32_0 = arith.constant 0 : i32
    return %c0_i32, %arg1 : i32, i32
  }
  func.func @transform_3(%arg0: i32, %arg1: i32, %arg2: i32) -> (i32, i32) {
    %c0_i32 = arith.constant 0 : i32
    %c0_i32_0 = arith.constant 0 : i32
    return %c0_i32, %arg1 : i32, i32
  }
  func.func @transform_4(%arg0: i32, %arg1: i32, %arg2: i32) -> (i32, i32) {
    %c0_i32 = arith.constant 0 : i32
    return %arg0, %arg1 : i32, i32
  }
}

module attributes {stable_mosaic.version = 11 : i64} {
  func.func @_mm_bn_kernel(%arg0: i32, %arg1: i32, %arg2: i32, %arg3: memref<32x128xbf16, #tpu.memory_space<vmem>>, %arg4: memref<128x128xbf16, #tpu.memory_space<vmem>>, %arg5: memref<1x128xf32, #tpu.memory_space<vmem>>, %arg6: memref<1x128xf32, #tpu.memory_space<vmem>>, %arg7: memref<32x128xbf16, #tpu.memory_space<vmem>>, %arg8: memref<32x128xf32, #tpu.memory_space<vmem>>) attributes {dimension_semantics = [#tpu.dimension_semantics<parallel>, #tpu.dimension_semantics<parallel>, #tpu.dimension_semantics<arbitrary>], iteration_bounds = array<i64: 1, 1, 3>, scalar_prefetch = 0 : i64, scratch_operands = 1 : i64, tpu.core_type = #tpu.core_type<tc>, window_params = [{transform_indices = @transform_0, window_bounds = array<i64: 32, 128>}, {transform_indices = @transform_1, window_bounds = array<i64: 128, 128>}, {transform_indices = @transform_2, window_bounds = array<i64: 1, 128>}, {transform_indices = @transform_3, window_bounds = array<i64: 1, 128>}, {transform_indices = @transform_4, window_bounds = array<i64: 32, 128>}]} {
    %c0_i32 = arith.constant 0 : i32
    %0 = arith.cmpi eq, %arg2, %c0_i32 : i32
    %1 = arith.extui %0 : i1 to i32
    %c0_i32_0 = arith.constant 0 : i32
    %2 = arith.cmpi ne, %1, %c0_i32_0 : i32
    scf.if %2 {
      %cst_9 = arith.constant 0.000000e+00 : f32
      %12 = vector.broadcast %cst_9 : f32 to vector<32x128xf32>
      %c0_10 = arith.constant 0 : index
      %c0_11 = arith.constant 0 : index
      %13 = vector.load %arg8[%c0_10, %c0_11] : memref<32x128xf32, #tpu.memory_space<vmem>>, vector<32x128xf32>
      tpu.vector_store %arg8[%c0_10, %c0_11], %12 {strides = array<i32>} : memref<32x128xf32, #tpu.memory_space<vmem>>, vector<32x128xf32>,
    } else {
    }
    %c0 = arith.constant 0 : index
    %c0_1 = arith.constant 0 : index
    %3 = vector.load %arg8[%c0, %c0_1] : memref<32x128xf32, #tpu.memory_space<vmem>>, vector<32x128xf32>
    %c0_2 = arith.constant 0 : index
    %c0_3 = arith.constant 0 : index
    %4 = vector.load %arg3[%c0_2, %c0_3] : memref<32x128xbf16, #tpu.memory_space<vmem>>, vector<32x128xbf16>
    %c0_4 = arith.constant 0 : index
    %c0_5 = arith.constant 0 : index
    %5 = vector.load %arg4[%c0_4, %c0_5] : memref<128x128xbf16, #tpu.memory_space<vmem>>, vector<128x128xbf16>
    %cst = arith.constant dense<0.000000e+00> : vector<32x128xf32>
    %6 = tpu.matmul %4, %5, %cst {dimension_numbers = #tpu.dot_dimension_numbers<[1], [0], [0], [1], [0, 0, 1, 1], [], []>} : vector<32x128xbf16>, vector<128x128xbf16>, vector<32x128xf32> -> vector<32x128xf32>
    %7 = arith.addf %3, %6 : vector<32x128xf32>
    %c0_6 = arith.constant 0 : index
    %c0_7 = arith.constant 0 : index
    %8 = vector.load %arg8[%c0_6, %c0_7] : memref<32x128xf32, #tpu.memory_space<vmem>>, vector<32x128xf32>
    tpu.vector_store %arg8[%c0_6, %c0_7], %7 {strides = array<i32>} : memref<32x128xf32, #tpu.memory_space<vmem>>, vector<32x128xf32>,
    %c2_i32 = arith.constant 2 : i32
    %9 = arith.cmpi eq, %arg2, %c2_i32 : i32
    %10 = arith.extui %9 : i1 to i32
    %c0_i32_8 = arith.constant 0 : i32
    %11 = arith.cmpi ne, %10, %c0_i32_8 : i32
    scf.if %11 {
      %c0_9 = arith.constant 0 : index
      %c0_10 = arith.constant 0 : index
      %12 = vector.load %arg8[%c0_9, %c0_10] : memref<32x128xf32, #tpu.memory_space<vmem>>, vector<32x128xf32>
      %c0_11 = arith.constant 0 : index
      %c0_12 = arith.constant 0 : index
      %13 = vector.load %arg5[%c0_11, %c0_12] : memref<1x128xf32, #tpu.memory_space<vmem>>, vector<1x128xf32>
      %14 = vector.broadcast %13 : vector<1x128xf32> to vector<32x128xf32>
      %15 = arith.mulf %12, %14 : vector<32x128xf32>
      %c0_13 = arith.constant 0 : index
      %c0_14 = arith.constant 0 : index
      %16 = vector.load %arg6[%c0_13, %c0_14] : memref<1x128xf32, #tpu.memory_space<vmem>>, vector<1x128xf32>
      %17 = vector.broadcast %16 : vector<1x128xf32> to vector<32x128xf32>
      %18 = arith.addf %15, %17 : vector<32x128xf32>
      %19 = arith.truncf %18 : vector<32x128xf32> to vector<32x128xbf16>
      %c0_15 = arith.constant 0 : index
      %c0_16 = arith.constant 0 : index
      %20 = vector.load %arg7[%c0_15, %c0_16] : memref<32x128xbf16, #tpu.memory_space<vmem>>, vector<32x128xbf16>
      tpu.vector_store %arg7[%c0_15, %c0_16], %19 {strides = array<i32>} : memref<32x128xbf16, #tpu.memory_space<vmem>>, vector<32x128xbf16>,
    } else {
    }
    return
  }
  func.func @transform_0(%arg0: i32, %arg1: i32, %arg2: i32) -> (i32, i32) {
    %c0_i32 = arith.constant 0 : i32
    return %arg0, %arg2 : i32, i32
  }
  func.func @transform_1(%arg0: i32, %arg1: i32, %arg2: i32) -> (i32, i32) {
    %c0_i32 = arith.constant 0 : i32
    return %arg2, %arg1 : i32, i32
  }
  func.func @transform_2(%arg0: i32, %arg1: i32, %arg2: i32) -> (i32, i32) {
    %c0_i32 = arith.constant 0 : i32
    %c0_i32_0 = arith.constant 0 : i32
    return %c0_i32, %arg1 : i32, i32
  }
  func.func @transform_3(%arg0: i32, %arg1: i32, %arg2: i32) -> (i32, i32) {
    %c0_i32 = arith.constant 0 : i32
    %c0_i32_0 = arith.constant 0 : i32
    return %c0_i32, %arg1 : i32, i32
  }
  func.func @transform_4(%arg0: i32, %arg1: i32, %arg2: i32) -> (i32, i32) {
    %c0_i32 = arith.constant 0 : i32
    return %arg0, %arg1 : i32, i32
  }
}

module attributes {stable_mosaic.version = 11 : i64} {
  func.func @_mm_bn_kernel(%arg0: i32, %arg1: i32, %arg2: i32, %arg3: memref<32x128xbf16, #tpu.memory_space<vmem>>, %arg4: memref<128x128xbf16, #tpu.memory_space<vmem>>, %arg5: memref<1x128xf32, #tpu.memory_space<vmem>>, %arg6: memref<1x128xf32, #tpu.memory_space<vmem>>, %arg7: memref<32x128xbf16, #tpu.memory_space<vmem>>, %arg8: memref<128x128xbf16, #tpu.memory_space<vmem>>, %arg9: memref<1x128xf32, #tpu.memory_space<vmem>>, %arg10: memref<1x128xf32, #tpu.memory_space<vmem>>, %arg11: memref<32x128xbf16, #tpu.memory_space<vmem>>) attributes {dimension_semantics = [#tpu.dimension_semantics<parallel>, #tpu.dimension_semantics<parallel>, #tpu.dimension_semantics<arbitrary>], iteration_bounds = array<i64: 1, 1, 1>, scalar_prefetch = 0 : i64, scratch_operands = 0 : i64, tpu.core_type = #tpu.core_type<tc>, window_params = [{transform_indices = @transform_0, window_bounds = array<i64: 32, 128>}, {transform_indices = @transform_1, window_bounds = array<i64: 128, 128>}, {transform_indices = @transform_2, window_bounds = array<i64: 1, 128>}, {transform_indices = @transform_3, window_bounds = array<i64: 1, 128>}, {transform_indices = @transform_4, window_bounds = array<i64: 32, 128>}, {transform_indices = @transform_5, window_bounds = array<i64: 128, 128>}, {transform_indices = @transform_6, window_bounds = array<i64: 1, 128>}, {transform_indices = @transform_7, window_bounds = array<i64: 1, 128>}, {transform_indices = @transform_8, window_bounds = array<i64: 32, 128>}]} {
    %c0 = arith.constant 0 : index
    %c0_0 = arith.constant 0 : index
    %0 = vector.load %arg3[%c0, %c0_0] : memref<32x128xbf16, #tpu.memory_space<vmem>>, vector<32x128xbf16>
    %c0_1 = arith.constant 0 : index
    %c0_2 = arith.constant 0 : index
    %1 = vector.load %arg4[%c0_1, %c0_2] : memref<128x128xbf16, #tpu.memory_space<vmem>>, vector<128x128xbf16>
    %cst = arith.constant dense<0.000000e+00> : vector<32x128xf32>
    %2 = tpu.matmul %0, %1, %cst {dimension_numbers = #tpu.dot_dimension_numbers<[1], [0], [0], [1], [0, 0, 1, 1], [], []>} : vector<32x128xbf16>, vector<128x128xbf16>, vector<32x128xf32> -> vector<32x128xf32>
    %c0_3 = arith.constant 0 : index
    %c0_4 = arith.constant 0 : index
    %3 = vector.load %arg5[%c0_3, %c0_4] : memref<1x128xf32, #tpu.memory_space<vmem>>, vector<1x128xf32>
    %4 = vector.broadcast %3 : vector<1x128xf32> to vector<32x128xf32>
    %5 = arith.mulf %2, %4 : vector<32x128xf32>
    %c0_5 = arith.constant 0 : index
    %c0_6 = arith.constant 0 : index
    %6 = vector.load %arg6[%c0_5, %c0_6] : memref<1x128xf32, #tpu.memory_space<vmem>>, vector<1x128xf32>
    %7 = vector.broadcast %6 : vector<1x128xf32> to vector<32x128xf32>
    %8 = arith.addf %5, %7 : vector<32x128xf32>
    %c0_7 = arith.constant 0 : index
    %c0_8 = arith.constant 0 : index
    %9 = vector.load %arg7[%c0_7, %c0_8] : memref<32x128xbf16, #tpu.memory_space<vmem>>, vector<32x128xbf16>
    %c0_9 = arith.constant 0 : index
    %c0_10 = arith.constant 0 : index
    %10 = vector.load %arg8[%c0_9, %c0_10] : memref<128x128xbf16, #tpu.memory_space<vmem>>, vector<128x128xbf16>
    %cst_11 = arith.constant dense<0.000000e+00> : vector<32x128xf32>
    %11 = tpu.matmul %9, %10, %cst_11 {dimension_numbers = #tpu.dot_dimension_numbers<[1], [0], [0], [1], [0, 0, 1, 1], [], []>} : vector<32x128xbf16>, vector<128x128xbf16>, vector<32x128xf32> -> vector<32x128xf32>
    %c0_12 = arith.constant 0 : index
    %c0_13 = arith.constant 0 : index
    %12 = vector.load %arg9[%c0_12, %c0_13] : memref<1x128xf32, #tpu.memory_space<vmem>>, vector<1x128xf32>
    %13 = vector.broadcast %12 : vector<1x128xf32> to vector<32x128xf32>
    %14 = arith.mulf %11, %13 : vector<32x128xf32>
    %c0_14 = arith.constant 0 : index
    %c0_15 = arith.constant 0 : index
    %15 = vector.load %arg10[%c0_14, %c0_15] : memref<1x128xf32, #tpu.memory_space<vmem>>, vector<1x128xf32>
    %16 = vector.broadcast %15 : vector<1x128xf32> to vector<32x128xf32>
    %17 = arith.addf %14, %16 : vector<32x128xf32>
    %18 = arith.addf %8, %17 : vector<32x128xf32>
    %cst_16 = arith.constant 0.000000e+00 : f32
    %19 = vector.broadcast %cst_16 : f32 to vector<32x128xf32>
    %20 = arith.maximumf %18, %19 : vector<32x128xf32>
    %21 = arith.truncf %20 : vector<32x128xf32> to vector<32x128xbf16>
    %c0_17 = arith.constant 0 : index
    %c0_18 = arith.constant 0 : index
    %22 = vector.load %arg11[%c0_17, %c0_18] : memref<32x128xbf16, #tpu.memory_space<vmem>>, vector<32x128xbf16>
    tpu.vector_store %arg11[%c0_17, %c0_18], %21 {strides = array<i32>} : memref<32x128xbf16, #tpu.memory_space<vmem>>, vector<32x128xbf16>,
    return
  }
  func.func @transform_0(%arg0: i32, %arg1: i32, %arg2: i32) -> (i32, i32) {
    %c0_i32 = arith.constant 0 : i32
    return %arg0, %arg2 : i32, i32
  }
  func.func @transform_1(%arg0: i32, %arg1: i32, %arg2: i32) -> (i32, i32) {
    %c0_i32 = arith.constant 0 : i32
    return %arg2, %arg1 : i32, i32
  }
  func.func @transform_2(%arg0: i32, %arg1: i32, %arg2: i32) -> (i32, i32) {
    %c0_i32 = arith.constant 0 : i32
    %c0_i32_0 = arith.constant 0 : i32
    return %c0_i32, %arg1 : i32, i32
  }
  func.func @transform_3(%arg0: i32, %arg1: i32, %arg2: i32) -> (i32, i32) {
    %c0_i32 = arith.constant 0 : i32
    %c0_i32_0 = arith.constant 0 : i32
    return %c0_i32, %arg1 : i32, i32
  }
  func.func @transform_4(%arg0: i32, %arg1: i32, %arg2: i32) -> (i32, i32) {
    %c0_i32 = arith.constant 0 : i32
    %c0_i32_0 = arith.constant 0 : i32
    return %arg0, %c0_i32 : i32, i32
  }
  func.func @transform_5(%arg0: i32, %arg1: i32, %arg2: i32) -> (i32, i32) {
    %c0_i32 = arith.constant 0 : i32
    %c0_i32_0 = arith.constant 0 : i32
    return %c0_i32, %arg1 : i32, i32
  }
  func.func @transform_6(%arg0: i32, %arg1: i32, %arg2: i32) -> (i32, i32) {
    %c0_i32 = arith.constant 0 : i32
    %c0_i32_0 = arith.constant 0 : i32
    return %c0_i32, %arg1 : i32, i32
  }
  func.func @transform_7(%arg0: i32, %arg1: i32, %arg2: i32) -> (i32, i32) {
    %c0_i32 = arith.constant 0 : i32
    %c0_i32_0 = arith.constant 0 : i32
    return %c0_i32, %arg1 : i32, i32
  }
  func.func @transform_8(%arg0: i32, %arg1: i32, %arg2: i32) -> (i32, i32) {
    %c0_i32 = arith.constant 0 : i32
    return %arg0, %arg1 : i32, i32
  }
}

module attributes {stable_mosaic.version = 11 : i64} {
  func.func @_mm_bn_kernel(%arg0: i32, %arg1: i32, %arg2: i32, %arg3: memref<16x128xbf16, #tpu.memory_space<vmem>>, %arg4: memref<128x128xbf16, #tpu.memory_space<vmem>>, %arg5: memref<1x128xf32, #tpu.memory_space<vmem>>, %arg6: memref<1x128xf32, #tpu.memory_space<vmem>>, %arg7: memref<16x128xbf16, #tpu.memory_space<vmem>>, %arg8: memref<16x128xf32, #tpu.memory_space<vmem>>) attributes {dimension_semantics = [#tpu.dimension_semantics<parallel>, #tpu.dimension_semantics<parallel>, #tpu.dimension_semantics<arbitrary>], iteration_bounds = array<i64: 1, 1, 5>, scalar_prefetch = 0 : i64, scratch_operands = 1 : i64, tpu.core_type = #tpu.core_type<tc>, window_params = [{transform_indices = @transform_0, window_bounds = array<i64: 16, 128>}, {transform_indices = @transform_1, window_bounds = array<i64: 128, 128>}, {transform_indices = @transform_2, window_bounds = array<i64: 1, 128>}, {transform_indices = @transform_3, window_bounds = array<i64: 1, 128>}, {transform_indices = @transform_4, window_bounds = array<i64: 16, 128>}]} {
    %c0_i32 = arith.constant 0 : i32
    %0 = arith.cmpi eq, %arg2, %c0_i32 : i32
    %1 = arith.extui %0 : i1 to i32
    %c0_i32_0 = arith.constant 0 : i32
    %2 = arith.cmpi ne, %1, %c0_i32_0 : i32
    scf.if %2 {
      %cst_9 = arith.constant 0.000000e+00 : f32
      %12 = vector.broadcast %cst_9 : f32 to vector<16x128xf32>
      %c0_10 = arith.constant 0 : index
      %c0_11 = arith.constant 0 : index
      %13 = vector.load %arg8[%c0_10, %c0_11] : memref<16x128xf32, #tpu.memory_space<vmem>>, vector<16x128xf32>
      tpu.vector_store %arg8[%c0_10, %c0_11], %12 {strides = array<i32>} : memref<16x128xf32, #tpu.memory_space<vmem>>, vector<16x128xf32>,
    } else {
    }
    %c0 = arith.constant 0 : index
    %c0_1 = arith.constant 0 : index
    %3 = vector.load %arg8[%c0, %c0_1] : memref<16x128xf32, #tpu.memory_space<vmem>>, vector<16x128xf32>
    %c0_2 = arith.constant 0 : index
    %c0_3 = arith.constant 0 : index
    %4 = vector.load %arg3[%c0_2, %c0_3] : memref<16x128xbf16, #tpu.memory_space<vmem>>, vector<16x128xbf16>
    %c0_4 = arith.constant 0 : index
    %c0_5 = arith.constant 0 : index
    %5 = vector.load %arg4[%c0_4, %c0_5] : memref<128x128xbf16, #tpu.memory_space<vmem>>, vector<128x128xbf16>
    %cst = arith.constant dense<0.000000e+00> : vector<16x128xf32>
    %6 = tpu.matmul %4, %5, %cst {dimension_numbers = #tpu.dot_dimension_numbers<[1], [0], [0], [1], [0, 0, 1, 1], [], []>} : vector<16x128xbf16>, vector<128x128xbf16>, vector<16x128xf32> -> vector<16x128xf32>
    %7 = arith.addf %3, %6 : vector<16x128xf32>
    %c0_6 = arith.constant 0 : index
    %c0_7 = arith.constant 0 : index
    %8 = vector.load %arg8[%c0_6, %c0_7] : memref<16x128xf32, #tpu.memory_space<vmem>>, vector<16x128xf32>
    tpu.vector_store %arg8[%c0_6, %c0_7], %7 {strides = array<i32>} : memref<16x128xf32, #tpu.memory_space<vmem>>, vector<16x128xf32>,
    %c4_i32 = arith.constant 4 : i32
    %9 = arith.cmpi eq, %arg2, %c4_i32 : i32
    %10 = arith.extui %9 : i1 to i32
    %c0_i32_8 = arith.constant 0 : i32
    %11 = arith.cmpi ne, %10, %c0_i32_8 : i32
    scf.if %11 {
      %c0_9 = arith.constant 0 : index
      %c0_10 = arith.constant 0 : index
      %12 = vector.load %arg8[%c0_9, %c0_10] : memref<16x128xf32, #tpu.memory_space<vmem>>, vector<16x128xf32>
      %c0_11 = arith.constant 0 : index
      %c0_12 = arith.constant 0 : index
      %13 = vector.load %arg5[%c0_11, %c0_12] : memref<1x128xf32, #tpu.memory_space<vmem>>, vector<1x128xf32>
      %14 = vector.broadcast %13 : vector<1x128xf32> to vector<16x128xf32>
      %15 = arith.mulf %12, %14 : vector<16x128xf32>
      %c0_13 = arith.constant 0 : index
      %c0_14 = arith.constant 0 : index
      %16 = vector.load %arg6[%c0_13, %c0_14] : memref<1x128xf32, #tpu.memory_space<vmem>>, vector<1x128xf32>
      %17 = vector.broadcast %16 : vector<1x128xf32> to vector<16x128xf32>
      %18 = arith.addf %15, %17 : vector<16x128xf32>
      %19 = arith.truncf %18 : vector<16x128xf32> to vector<16x128xbf16>
      %c0_15 = arith.constant 0 : index
      %c0_16 = arith.constant 0 : index
      %20 = vector.load %arg7[%c0_15, %c0_16] : memref<16x128xbf16, #tpu.memory_space<vmem>>, vector<16x128xbf16>
      tpu.vector_store %arg7[%c0_15, %c0_16], %19 {strides = array<i32>} : memref<16x128xbf16, #tpu.memory_space<vmem>>, vector<16x128xbf16>,
    } else {
    }
    return
  }
  func.func @transform_0(%arg0: i32, %arg1: i32, %arg2: i32) -> (i32, i32) {
    %c0_i32 = arith.constant 0 : i32
    return %arg0, %arg2 : i32, i32
  }
  func.func @transform_1(%arg0: i32, %arg1: i32, %arg2: i32) -> (i32, i32) {
    %c0_i32 = arith.constant 0 : i32
    return %arg2, %arg1 : i32, i32
  }
  func.func @transform_2(%arg0: i32, %arg1: i32, %arg2: i32) -> (i32, i32) {
    %c0_i32 = arith.constant 0 : i32
    %c0_i32_0 = arith.constant 0 : i32
    return %c0_i32, %arg1 : i32, i32
  }
  func.func @transform_3(%arg0: i32, %arg1: i32, %arg2: i32) -> (i32, i32) {
    %c0_i32 = arith.constant 0 : i32
    %c0_i32_0 = arith.constant 0 : i32
    return %c0_i32, %arg1 : i32, i32
  }
  func.func @transform_4(%arg0: i32, %arg1: i32, %arg2: i32) -> (i32, i32) {
    %c0_i32 = arith.constant 0 : i32
    return %arg0, %arg1 : i32, i32
  }
}

module attributes {stable_mosaic.version = 11 : i64} {
  func.func @_mm_bn_kernel(%arg0: i32, %arg1: i32, %arg2: i32, %arg3: memref<16x128xbf16, #tpu.memory_space<vmem>>, %arg4: memref<128x256xbf16, #tpu.memory_space<vmem>>, %arg5: memref<1x256xf32, #tpu.memory_space<vmem>>, %arg6: memref<1x256xf32, #tpu.memory_space<vmem>>, %arg7: memref<16x128xbf16, #tpu.memory_space<vmem>>, %arg8: memref<128x256xbf16, #tpu.memory_space<vmem>>, %arg9: memref<1x256xf32, #tpu.memory_space<vmem>>, %arg10: memref<1x256xf32, #tpu.memory_space<vmem>>, %arg11: memref<16x256xbf16, #tpu.memory_space<vmem>>) attributes {dimension_semantics = [#tpu.dimension_semantics<parallel>, #tpu.dimension_semantics<parallel>, #tpu.dimension_semantics<arbitrary>], iteration_bounds = array<i64: 1, 1, 1>, scalar_prefetch = 0 : i64, scratch_operands = 0 : i64, tpu.core_type = #tpu.core_type<tc>, window_params = [{transform_indices = @transform_0, window_bounds = array<i64: 16, 128>}, {transform_indices = @transform_1, window_bounds = array<i64: 128, 256>}, {transform_indices = @transform_2, window_bounds = array<i64: 1, 256>}, {transform_indices = @transform_3, window_bounds = array<i64: 1, 256>}, {transform_indices = @transform_4, window_bounds = array<i64: 16, 128>}, {transform_indices = @transform_5, window_bounds = array<i64: 128, 256>}, {transform_indices = @transform_6, window_bounds = array<i64: 1, 256>}, {transform_indices = @transform_7, window_bounds = array<i64: 1, 256>}, {transform_indices = @transform_8, window_bounds = array<i64: 16, 256>}]} {
    %c0 = arith.constant 0 : index
    %c0_0 = arith.constant 0 : index
    %0 = vector.load %arg3[%c0, %c0_0] : memref<16x128xbf16, #tpu.memory_space<vmem>>, vector<16x128xbf16>
    %c0_1 = arith.constant 0 : index
    %c0_2 = arith.constant 0 : index
    %1 = vector.load %arg4[%c0_1, %c0_2] : memref<128x256xbf16, #tpu.memory_space<vmem>>, vector<128x256xbf16>
    %cst = arith.constant dense<0.000000e+00> : vector<16x256xf32>
    %2 = tpu.matmul %0, %1, %cst {dimension_numbers = #tpu.dot_dimension_numbers<[1], [0], [0], [1], [0, 0, 1, 1], [], []>} : vector<16x128xbf16>, vector<128x256xbf16>, vector<16x256xf32> -> vector<16x256xf32>
    %c0_3 = arith.constant 0 : index
    %c0_4 = arith.constant 0 : index
    %3 = vector.load %arg5[%c0_3, %c0_4] : memref<1x256xf32, #tpu.memory_space<vmem>>, vector<1x256xf32>
    %4 = vector.broadcast %3 : vector<1x256xf32> to vector<16x256xf32>
    %5 = arith.mulf %2, %4 : vector<16x256xf32>
    %c0_5 = arith.constant 0 : index
    %c0_6 = arith.constant 0 : index
    %6 = vector.load %arg6[%c0_5, %c0_6] : memref<1x256xf32, #tpu.memory_space<vmem>>, vector<1x256xf32>
    %7 = vector.broadcast %6 : vector<1x256xf32> to vector<16x256xf32>
    %8 = arith.addf %5, %7 : vector<16x256xf32>
    %c0_7 = arith.constant 0 : index
    %c0_8 = arith.constant 0 : index
    %9 = vector.load %arg7[%c0_7, %c0_8] : memref<16x128xbf16, #tpu.memory_space<vmem>>, vector<16x128xbf16>
    %c0_9 = arith.constant 0 : index
    %c0_10 = arith.constant 0 : index
    %10 = vector.load %arg8[%c0_9, %c0_10] : memref<128x256xbf16, #tpu.memory_space<vmem>>, vector<128x256xbf16>
    %cst_11 = arith.constant dense<0.000000e+00> : vector<16x256xf32>
    %11 = tpu.matmul %9, %10, %cst_11 {dimension_numbers = #tpu.dot_dimension_numbers<[1], [0], [0], [1], [0, 0, 1, 1], [], []>} : vector<16x128xbf16>, vector<128x256xbf16>, vector<16x256xf32> -> vector<16x256xf32>
    %c0_12 = arith.constant 0 : index
    %c0_13 = arith.constant 0 : index
    %12 = vector.load %arg9[%c0_12, %c0_13] : memref<1x256xf32, #tpu.memory_space<vmem>>, vector<1x256xf32>
    %13 = vector.broadcast %12 : vector<1x256xf32> to vector<16x256xf32>
    %14 = arith.mulf %11, %13 : vector<16x256xf32>
    %c0_14 = arith.constant 0 : index
    %c0_15 = arith.constant 0 : index
    %15 = vector.load %arg10[%c0_14, %c0_15] : memref<1x256xf32, #tpu.memory_space<vmem>>, vector<1x256xf32>
    %16 = vector.broadcast %15 : vector<1x256xf32> to vector<16x256xf32>
    %17 = arith.addf %14, %16 : vector<16x256xf32>
    %18 = arith.addf %8, %17 : vector<16x256xf32>
    %cst_16 = arith.constant 0.000000e+00 : f32
    %19 = vector.broadcast %cst_16 : f32 to vector<16x256xf32>
    %20 = arith.maximumf %18, %19 : vector<16x256xf32>
    %21 = arith.truncf %20 : vector<16x256xf32> to vector<16x256xbf16>
    %c0_17 = arith.constant 0 : index
    %c0_18 = arith.constant 0 : index
    %22 = vector.load %arg11[%c0_17, %c0_18] : memref<16x256xbf16, #tpu.memory_space<vmem>>, vector<16x256xbf16>
    tpu.vector_store %arg11[%c0_17, %c0_18], %21 {strides = array<i32>} : memref<16x256xbf16, #tpu.memory_space<vmem>>, vector<16x256xbf16>,
    return
  }
  func.func @transform_0(%arg0: i32, %arg1: i32, %arg2: i32) -> (i32, i32) {
    %c0_i32 = arith.constant 0 : i32
    return %arg0, %arg2 : i32, i32
  }
  func.func @transform_1(%arg0: i32, %arg1: i32, %arg2: i32) -> (i32, i32) {
    %c0_i32 = arith.constant 0 : i32
    return %arg2, %arg1 : i32, i32
  }
  func.func @transform_2(%arg0: i32, %arg1: i32, %arg2: i32) -> (i32, i32) {
    %c0_i32 = arith.constant 0 : i32
    %c0_i32_0 = arith.constant 0 : i32
    return %c0_i32, %arg1 : i32, i32
  }
  func.func @transform_3(%arg0: i32, %arg1: i32, %arg2: i32) -> (i32, i32) {
    %c0_i32 = arith.constant 0 : i32
    %c0_i32_0 = arith.constant 0 : i32
    return %c0_i32, %arg1 : i32, i32
  }
  func.func @transform_4(%arg0: i32, %arg1: i32, %arg2: i32) -> (i32, i32) {
    %c0_i32 = arith.constant 0 : i32
    %c0_i32_0 = arith.constant 0 : i32
    return %arg0, %c0_i32 : i32, i32
  }
  func.func @transform_5(%arg0: i32, %arg1: i32, %arg2: i32) -> (i32, i32) {
    %c0_i32 = arith.constant 0 : i32
    %c0_i32_0 = arith.constant 0 : i32
    return %c0_i32, %arg1 : i32, i32
  }
  func.func @transform_6(%arg0: i32, %arg1: i32, %arg2: i32) -> (i32, i32) {
    %c0_i32 = arith.constant 0 : i32
    %c0_i32_0 = arith.constant 0 : i32
    return %c0_i32, %arg1 : i32, i32
  }
  func.func @transform_7(%arg0: i32, %arg1: i32, %arg2: i32) -> (i32, i32) {
    %c0_i32 = arith.constant 0 : i32
    %c0_i32_0 = arith.constant 0 : i32
    return %c0_i32, %arg1 : i32, i32
  }
  func.func @transform_8(%arg0: i32, %arg1: i32, %arg2: i32) -> (i32, i32) {
    %c0_i32 = arith.constant 0 : i32
    return %arg0, %arg1 : i32, i32
  }
}

module attributes {stable_mosaic.version = 11 : i64} {
  func.func @_head_kernel(%arg0: i32, %arg1: memref<8x4x256xbf16, #tpu.memory_space<vmem>>, %arg2: memref<256x128xbf16, #tpu.memory_space<vmem>>, %arg3: memref<1x128xf32, #tpu.memory_space<vmem>>, %arg4: memref<8x128xf32, #tpu.memory_space<vmem>>) attributes {dimension_semantics = [#tpu.dimension_semantics<arbitrary>], iteration_bounds = array<i64: 1>, scalar_prefetch = 0 : i64, scratch_operands = 0 : i64, tpu.core_type = #tpu.core_type<tc>, window_params = [{pipeline_mode = #tpu.pipeline_mode<synchronous>, transform_indices = @transform_0, window_bounds = array<i64: 8, 4, 256>}, {pipeline_mode = #tpu.pipeline_mode<synchronous>, transform_indices = @transform_1, window_bounds = array<i64: 256, 128>}, {pipeline_mode = #tpu.pipeline_mode<synchronous>, transform_indices = @transform_2, window_bounds = array<i64: 1, 128>}, {pipeline_mode = #tpu.pipeline_mode<synchronous>, transform_indices = @transform_3, window_bounds = array<i64: 8, 128>}]} {
    %c0 = arith.constant 0 : index
    %c0_0 = arith.constant 0 : index
    %c0_1 = arith.constant 0 : index
    %0 = vector.load %arg1[%c0, %c0_0, %c0_1] : memref<8x4x256xbf16, #tpu.memory_space<vmem>>, vector<8x4x256xbf16>
    %1 = arith.extf %0 : vector<8x4x256xbf16> to vector<8x4x256xf32>
    %cst = arith.constant dense<0.000000e+00> : vector<8x256xf32>
    %2 = vector.multi_reduction <add>, %1, %cst [1] : vector<8x4x256xf32> to vector<8x256xf32>
    %cst_2 = arith.constant 2.500000e-01 : f32
    %3 = vector.broadcast %cst_2 : f32 to vector<8x256xf32>
    %4 = arith.mulf %2, %3 : vector<8x256xf32>
    %5 = arith.truncf %4 : vector<8x256xf32> to vector<8x256xbf16>
    %c0_3 = arith.constant 0 : index
    %c0_4 = arith.constant 0 : index
    %6 = vector.load %arg2[%c0_3, %c0_4] : memref<256x128xbf16, #tpu.memory_space<vmem>>, vector<256x128xbf16>
    %cst_5 = arith.constant dense<0.000000e+00> : vector<8x128xf32>
    %7 = tpu.matmul %5, %6, %cst_5 {dimension_numbers = #tpu.dot_dimension_numbers<[1], [0], [0], [1], [0, 0, 1, 1], [], []>} : vector<8x256xbf16>, vector<256x128xbf16>, vector<8x128xf32> -> vector<8x128xf32>
    %c0_6 = arith.constant 0 : index
    %c0_7 = arith.constant 0 : index
    %8 = vector.load %arg3[%c0_6, %c0_7] : memref<1x128xf32, #tpu.memory_space<vmem>>, vector<1x128xf32>
    %9 = vector.broadcast %8 : vector<1x128xf32> to vector<8x128xf32>
    %10 = arith.addf %7, %9 : vector<8x128xf32>
    %11 = math.absf %10 : vector<8x128xf32>
    %cst_8 = arith.constant 0.000000e+00 : f32
    %12 = vector.broadcast %cst_8 : f32 to vector<8x128xf32>
    %13 = arith.subf %12, %11 : vector<8x128xf32>
    %14 = math.exp %13 : vector<8x128xf32>
    %cst_9 = arith.constant 1.000000e+00 : f32
    %15 = vector.broadcast %cst_9 : f32 to vector<8x128xf32>
    %16 = arith.addf %15, %14 : vector<8x128xf32>
    %17 = tpu.reciprocal %16 {approx = true} : vector<8x128xf32> -> vector<8x128xf32>
    %cst_10 = arith.constant 0.000000e+00 : f32
    %18 = vector.broadcast %cst_10 : f32 to vector<8x128xf32>
    %19 = arith.cmpf oge, %10, %18 : vector<8x128xf32>
    %20 = arith.mulf %14, %17 : vector<8x128xf32>
    %21 = arith.select %19, %17, %20 : vector<8x128xi1>, vector<8x128xf32>
    %c0_11 = arith.constant 0 : index
    %c0_12 = arith.constant 0 : index
    %22 = vector.load %arg4[%c0_11, %c0_12] : memref<8x128xf32, #tpu.memory_space<vmem>>, vector<8x128xf32>
    tpu.vector_store %arg4[%c0_11, %c0_12], %21 {strides = array<i32>} : memref<8x128xf32, #tpu.memory_space<vmem>>, vector<8x128xf32>,
    return
  }
  func.func @transform_0(%arg0: i32) -> (i32, i32, i32) {
    %c0_i32 = arith.constant 0 : i32
    %c0_i32_0 = arith.constant 0 : i32
    %c0_i32_1 = arith.constant 0 : i32
    %c0_i32_2 = arith.constant 0 : i32
    return %c0_i32, %c0_i32_0, %c0_i32_1 : i32, i32, i32
  }
  func.func @transform_1(%arg0: i32) -> (i32, i32) {
    %c0_i32 = arith.constant 0 : i32
    %c0_i32_0 = arith.constant 0 : i32
    %c0_i32_1 = arith.constant 0 : i32
    return %c0_i32, %c0_i32_0 : i32, i32
  }
  func.func @transform_2(%arg0: i32) -> (i32, i32) {
    %c0_i32 = arith.constant 0 : i32
    %c0_i32_0 = arith.constant 0 : i32
    %c0_i32_1 = arith.constant 0 : i32
    return %c0_i32, %c0_i32_0 : i32, i32
  }
  func.func @transform_3(%arg0: i32) -> (i32, i32) {
    %c0_i32 = arith.constant 0 : i32
    %c0_i32_0 = arith.constant 0 : i32
    %c0_i32_1 = arith.constant 0 : i32
    return %c0_i32, %c0_i32_0 : i32, i32
  }
}

</mosaic_0001>

<bundles_post_ra>
// kernel: _lambda_.12
= control target key start
LH: loop header
LB: loop body
LE: loop exit
PB: predicated region body
PF: predicated region fallthrough
CT: control target
= control target key end

     0   :  { %s1676_s15 = smov 0   ;;  %s1678_s16 = smov 0   ;;  %s1887_s0 = inlined_call_operand.vmem [shape: bf16[512,256], index: 0, kind: input, shape index: {}]   ;;  %s1888_s1 = inlined_call_operand.vmem [shape: bf16[256,128], index: 1, kind: input, shape index: {}]   ;;  %s1889_s2 = inlined_call_operand.vmem [shape: f32[1,128], index: 2, kind: input, shape index: {}]   ;;  %s1890_s3 = inlined_call_operand.vmem [shape: f32[1,128], index: 3, kind: input, shape index: {}]   ;;  %s1891_s4 = inlined_call_operand.vmem [shape: bf16[512,128], index: 4, kind: output, shape index: {}]  }
   0x1   :  { %s1680_s17 = smov 0  }
   0x2 LB: > { %s33_s18 = sadd.s32 1, %s1645_s16  ;;  %p1193_p0 = scmp.ge.s32.totalorder %s1649_s17, 1  ;;  %s1649_s17 = sphi %s1680_s17, %s14_s17   ;;  %s1645_s16 = sphi %s1678_s16, %s1893_s16   ;;  %s1641_s15 = sphi %s1676_s15, %s1892_s15  }
   0x3   : > { %p35_p1 = scmp.ge.s32.totalorder %s33_s18, 2  ;;  %p224_p2 = scmp.lt.s32.totalorder %s1649_s17, 3 }
   0x5   : > { %s1895_s18 = smov (%p35_p1, %s33_s18), 0  ;;  %p225_p3 = pnand %p1193_p0, %p224_p2 }
   0x6   : > { %s1194_s21 = sshll.u32 (!%p225_p3), %s1641_s15, 5 }
   0x7   : > { %228 = sbr.rel (%p225_p3) target bundleno = 311 (0x137), region = 36  ;;  %p274_p4 = scmp.lt.s32.totalorder (!%p225_p3), %s1194_s21, 63 }
   0xc   : > { %v1563_v0 = vld [vmem:[%s1888_s1 + $0x78] sm:$0xff]   ;;  %v1565_v2 = vld [vmem:[%s1888_s1 + $0x70] sm:$0xff]   ;;  %v1567_v4 = vld [vmem:[%s1888_s1 + $0x68] sm:$0xff]   ;;  %s1897_s21 = smov (!%p274_p4, %s1194_s21), 63 }
   0xd   : > { %v1564_v1 = vld [vmem:[%s1888_s1 + $0x38] sm:$0xff]   ;;  %1411 = vmatprep.subr.bf16.mxu0 %v1563_v0  ;;  %1523 = vmatprep.subr.bf16.mxu1 %v1563_v0  ;;  %v1566_v3 = vld [vmem:[%s1888_s1 + $0x30] sm:$0xff]   ;;  %v1568_v5 = vld [vmem:[%s1888_s1 + $0x28] sm:$0xff]   ;;  %s1283_s10 = sshll.u32 %s1897_s21, 3  ;;  %s1198_s12 = sshll.u32 %s1897_s21, 2 }
   0xe   : > { %1412 = vmatpush3.bf16.msra.mxu0 %v1564_v1  ;;  %1531 = vmatpush3.bf16.msra.mxu1 %v1564_v1  ;;  %v1569_v6 = vld [vmem:[%s1888_s1 + $0x60] sm:$0xff]   ;;  %v1571_v8 = vld [vmem:[%s1888_s1 + $0x58] sm:$0xff]   ;;  %s1727_s15 = scalar_lea.vmem %s1887_s0, %s1283_s10  ;;  %v1573_v10 = vld [vmem:[%s1888_s1 + $0x50] sm:$0xff]  }
   0xf   : > { %1413 = vmatprep.subr.bf16.mxu0 %v1565_v2  ;;  %1524 = vmatprep.subr.bf16.mxu1 %v1565_v2  ;;  %v1570_v7 = vld [vmem:[%s1888_s1 + $0x20] sm:$0xff]   ;;  %v1572_v9 = vld [vmem:[%s1888_s1 + $0x18] sm:$0xff]   ;;  %v1574_v13 = vld [vmem:[%s1888_s1 + $0x10] sm:$0xff]  }
  0x10   : > { %v1581_v11 = vld [vmem:[%s1727_s15 + $0x4] ss:$8 sps:$4 sm:$0xff]   ;;  %v1579_v18 = vld [vmem:[%s1727_s15] ss:$8 sps:$4 sm:$0xff]   ;;  %v1585_v20 = vld [vmem:[%s1727_s15 + $0x14] ss:$8 sps:$4 sm:$0xff]  }
  0x11   : > { %v1584_v12 = vld [vmem:[%s1727_s15 + $0x84] ss:$8 sps:$4 sm:$0xff]   ;;  %661 = vmatprep.mubr.bf16.mxu0 %v1581_v11  ;;  %v1582_v19 = vld [vmem:[%s1727_s15 + $0x80] ss:$8 sps:$4 sm:$0xff]   ;;  %v1587_v21 = vld [vmem:[%s1727_s15 + $0x94] ss:$8 sps:$4 sm:$0xff]  }
  0x12   : > { %1414 = vmatpush3.bf16.msra.mxu0 %v1566_v3  ;;  %1532 = vmatpush3.bf16.msra.mxu1 %v1566_v3  ;;  %v1575_v14 = vld [vmem:[%s1888_s1 + $0x48] sm:$0xff]   ;;  %v1577_v16 = vld [vmem:[%s1888_s1 + $0x40] sm:$0xff]   ;;  %v1589_v22 = vld [vmem:[%s1727_s15 + $0x10] ss:$8 sps:$4 sm:$0xff]  }
  0x13   : > { %1415 = vmatprep.subr.bf16.mxu0 %v1567_v4  ;;  %1525 = vmatprep.subr.bf16.mxu1 %v1567_v4  ;;  %v1576_v15 = vld [vmem:[%s1888_s1 + $0x8] sm:$0xff]   ;;  %v1578_v17 = vld [vmem:[%s1888_s1] sm:$0xff]   ;;  %v1590_v23 = vld [vmem:[%s1727_s15 + $0x90] ss:$8 sps:$4 sm:$0xff]  }
  0x14   : > { %725 = vmatprep.mubr.bf16.mxu1 %v1584_v12  ;;  %v1591_v24 = vld [vmem:[%s1727_s15 + $0x24] ss:$8 sps:$4 sm:$0xff]   ;;  %v1595_v26 = vld [vmem:[%s1727_s15 + $0x20] ss:$8 sps:$4 sm:$0xff]   ;;  %v1597_v28 = vld [vmem:[%s1727_s15 + $0x34] ss:$8 sps:$4 sm:$0xff]  }
  0x15   : > { %v1593_v25 = vld [vmem:[%s1727_s15 + $0xa4] ss:$8 sps:$4 sm:$0xff]   ;;  %v1596_v27 = vld [vmem:[%s1727_s15 + $0xa0] ss:$8 sps:$4 sm:$0xff]   ;;  %v1599_v29 = vld [vmem:[%s1727_s15 + $0xb4] ss:$8 sps:$4 sm:$0xff]  }
  0x16   : > { %1416 = vmatpush3.bf16.msra.mxu0 %v1568_v5  ;;  %1533 = vmatpush3.bf16.msra.mxu1 %v1568_v5  ;;  %v1601_v30 = vld [vmem:[%s1727_s15 + $0x30] ss:$8 sps:$4 sm:$0xff]   ;;  %v1603_v32 = vld [vmem:[%s1727_s15 + $0x44] ss:$8 sps:$4 sm:$0xff]   ;;  %v1607_v34 = vld [vmem:[%s1727_s15 + $0x40] ss:$8 sps:$4 sm:$0xff]  }
  0x17   : > { %1417 = vmatprep.subr.bf16.mxu0 %v1569_v6  ;;  %1526 = vmatprep.subr.bf16.mxu1 %v1569_v6  ;;  %v1602_v31 = vld [vmem:[%s1727_s15 + $0xb0] ss:$8 sps:$4 sm:$0xff]   ;;  %v1605_v33 = vld [vmem:[%s1727_s15 + $0xc4] ss:$8 sps:$4 sm:$0xff]   ;;  %v1608_v35 = vld [vmem:[%s1727_s15 + $0xc0] ss:$8 sps:$4 sm:$0xff]  }
  0x18   : > { %v1609_v36 = vld [vmem:[%s1727_s15 + $0x54] ss:$8 sps:$4 sm:$0xff]   ;;  %v1613_v38 = vld [vmem:[%s1727_s15 + $0x50] ss:$8 sps:$4 sm:$0xff]   ;;  %v1615_v40 = vld [vmem:[%s1727_s15 + $0x64] ss:$8 sps:$4 sm:$0xff]  }
  0x19   : > { %v1611_v37 = vld [vmem:[%s1727_s15 + $0xd4] ss:$8 sps:$4 sm:$0xff]   ;;  %v1614_v39 = vld [vmem:[%s1727_s15 + $0xd0] ss:$8 sps:$4 sm:$0xff]   ;;  %v1617_v41 = vld [vmem:[%s1727_s15 + $0xe4] ss:$8 sps:$4 sm:$0xff]  }
  0x1a   : > { %1418 = vmatpush3.bf16.msra.mxu0 %v1570_v7  ;;  %1534 = vmatpush3.bf16.msra.mxu1 %v1570_v7  ;;  %v1619_v42 = vld [vmem:[%s1727_s15 + $0x60] ss:$8 sps:$4 sm:$0xff]   ;;  %v1621_v44 = vld [vmem:[%s1727_s15 + $0x74] ss:$8 sps:$4 sm:$0xff]   ;;  %v1625_v46 = vld [vmem:[%s1727_s15 + $0x70] ss:$8 sps:$4 sm:$0xff]  }
  0x1b   : > { %1419 = vmatprep.subr.bf16.mxu0 %v1571_v8  ;;  %1527 = vmatprep.subr.bf16.mxu1 %v1571_v8  ;;  %v1620_v43 = vld [vmem:[%s1727_s15 + $0xe0] ss:$8 sps:$4 sm:$0xff]   ;;  %v1623_v45 = vld [vmem:[%s1727_s15 + $0xf4] ss:$8 sps:$4 sm:$0xff]   ;;  %v1626_v47 = vld [vmem:[%s1727_s15 + $0xf0] ss:$8 sps:$4 sm:$0xff]   ;;  %s1804_s15 = scalar_lea.vmem %s1891_s4, %s1198_s12 }
  0x1c   : > { %v1785_v51 = vld [vmem:[%s1889_s2] ss:$0 sm:$0xff] }
  0x1d   : > { %v1792_v59 = vld [vmem:[%s1890_s3] ss:$0 sm:$0xff] }
  0x1e   : > { %1420 = vmatpush3.bf16.msra.mxu0 %v1572_v9  ;;  %1535 = vmatpush3.bf16.msra.mxu1 %v1572_v9 }
  0x1f   : > { %1421 = vmatprep.subr.bf16.mxu0 %v1573_v10  ;;  %1528 = vmatprep.subr.bf16.mxu1 %v1573_v10 }
  0x22   : > { %1422 = vmatpush3.bf16.msra.mxu0 %v1574_v13  ;;  %1536 = vmatpush3.bf16.msra.mxu1 %v1574_v13 }
  0x23   : > { %1423 = vmatprep.subr.bf16.mxu0 %v1575_v14  ;;  %1529 = vmatprep.subr.bf16.mxu1 %v1575_v14 }
  0x26   : > { %1424 = vmatpush3.bf16.msra.mxu0 %v1576_v15  ;;  %1537 = vmatpush3.bf16.msra.mxu1 %v1576_v15 }
  0x27   : > { %1425 = vmatprep.subr.bf16.mxu0 %v1577_v16  ;;  %1530 = vmatprep.subr.bf16.mxu1 %v1577_v16 }
  0x2a   : > { %1426 = vmatpush3.bf16.msra.mxu0 %v1578_v17  ;;  %1538 = vmatpush3.bf16.msra.mxu1 %v1578_v17 }
  0x2d   : > { %662 = vmatmul.mubr.bf16.vlgmr.msra.gmra.mxu0 %v1579_v18  ;;  %726 = vmatmul.mubr.bf16.vlgmr.msra.gmra.mxu1 %v1582_v19 }
  0x2e   : > { %669 = vmatprep.mubr.bf16.mxu0 %v1585_v20  ;;  %733 = vmatprep.mubr.bf16.mxu1 %v1587_v21 }
  0x35   : > { %670 = vmatmul.mubr.bf16.gmra.mxu0 %v1589_v22  ;;  %734 = vmatmul.mubr.bf16.gmra.mxu1 %v1590_v23 }
  0x36   : > { %677 = vmatprep.mubr.bf16.mxu0 %v1591_v24  ;;  %741 = vmatprep.mubr.bf16.mxu1 %v1593_v25 }
  0x3d   : > { %678 = vmatmul.mubr.bf16.gmra.mxu0 %v1595_v26  ;;  %742 = vmatmul.mubr.bf16.gmra.mxu1 %v1596_v27 }
  0x3e   : > { %685 = vmatprep.mubr.bf16.mxu0 %v1597_v28  ;;  %749 = vmatprep.mubr.bf16.mxu1 %v1599_v29 }
  0x45   : > { %686 = vmatmul.mubr.bf16.gmra.mxu0 %v1601_v30  ;;  %750 = vmatmul.mubr.bf16.gmra.mxu1 %v1602_v31 }
  0x46   : > { %693 = vmatprep.mubr.bf16.mxu0 %v1603_v32  ;;  %757 = vmatprep.mubr.bf16.mxu1 %v1605_v33 }
  0x4d   : > { %694 = vmatmul.mubr.bf16.gmra.mxu0 %v1607_v34  ;;  %758 = vmatmul.mubr.bf16.gmra.mxu1 %v1608_v35 }
  0x4e   : > { %701 = vmatprep.mubr.bf16.mxu0 %v1609_v36  ;;  %765 = vmatprep.mubr.bf16.mxu1 %v1611_v37 }
  0x55   : > { %702 = vmatmul.mubr.bf16.gmra.mxu0 %v1613_v38  ;;  %766 = vmatmul.mubr.bf16.gmra.mxu1 %v1614_v39 }
  0x56   : > { %709 = vmatprep.mubr.bf16.mxu0 %v1615_v40  ;;  %773 = vmatprep.mubr.bf16.mxu1 %v1617_v41 }
  0x5d   : > { %710 = vmatmul.mubr.bf16.gmra.mxu0 %v1619_v42  ;;  %774 = vmatmul.mubr.bf16.gmra.mxu1 %v1620_v43 }
  0x5e   : > { %717 = vmatprep.mubr.bf16.mxu0 %v1621_v44  ;;  %781 = vmatprep.mubr.bf16.mxu1 %v1623_v45 }
  0x65   : > { %718 = vmatmul.mubr.bf16.gmra.mxu0 %v1625_v46  ;;  %782 = vmatmul.mubr.bf16.gmra.mxu1 %v1626_v47 }
  0xed   : > { %v1427_v48 = vpop.f32.mrf.mxu0  ;;  %v1475_v49 = vpop.f32.mrf.mxu1 }
  0xef   : > { %v1428_v50 = vpop.f32.mrf.mxu0  ;;  %v1476_v52 = vpop.f32.mrf.mxu1 }
  0xf0   : > { %v1429_v53 = vadd.f32 %v1428_v50, %v1427_v48  ;;  %v1477_v54 = vadd.f32 %v1476_v52, %v1475_v49 }
  0xf1   : > { %v1430_v55 = vpop.f32.mrf.mxu0  ;;  %v1478_v56 = vpop.f32.mrf.mxu1 }
  0xf2   : > { %v797_v57 = vmul.f32 %v1429_v53, %v1785_v51  ;;  %v813_v58 = vmul.f32 %v1477_v54, %v1785_v51 }
  0xf3   : > { %v1431_v60 = vpop.f32.mrf.mxu0  ;;  %v1479_v61 = vpop.f32.mrf.mxu1 }
  0xf4   : > { %v1432_v62 = vadd.f32 %v1431_v60, %v1430_v55  ;;  %v1480_v63 = vadd.f32 %v1479_v61, %v1478_v56  ;;  %v836_v2 = vadd.f32 %v1792_v59, %v797_v57  ;;  %v852_v3 = vadd.f32 %v1792_v59, %v813_v58 }
  0xf5   : > { %v1433_v0 = vpop.f32.mrf.mxu0  ;;  %v1481_v1 = vpop.f32.mrf.mxu1 }
  0xf6   : > { %v798_v4 = vmul.f32 %v1432_v62, %v1785_v51  ;;  %v814_v5 = vmul.f32 %v1480_v63, %v1785_v51  ;;  %v868_v14 = vmax.f32 %v836_v2, 0.0  ;;  %v884_v15 = vmax.f32 %v852_v3, 0.0 }
  0xf7   : > { %v1434_v6 = vpop.f32.mrf.mxu0  ;;  %v1482_v7 = vpop.f32.mrf.mxu1 }
  0xf8   : > { %v837_v8 = vadd.f32 %v1792_v59, %v798_v4  ;;  %v853_v9 = vadd.f32 %v1792_v59, %v814_v5  ;;  %v1435_v10 = vadd.f32 %v1434_v6, %v1433_v0  ;;  %v1483_v11 = vadd.f32 %v1482_v7, %v1481_v1 }
  0xf9   : > { %v1436_v12 = vpop.f32.mrf.mxu0  ;;  %v1484_v13 = vpop.f32.mrf.mxu1 }
  0xfa   : > { %v869_v16 = vmax.f32 %v837_v8, 0.0  ;;  %v885_v17 = vmax.f32 %v853_v9, 0.0  ;;  %v799_v18 = vmul.f32 %v1435_v10, %v1785_v51  ;;  %v815_v19 = vmul.f32 %v1483_v11, %v1785_v51 }
  0xfb   : > { %v1437_v20 = vpop.f32.mrf.mxu0  ;;  %v1485_v21 = vpop.f32.mrf.mxu1 }
  0xfc   : > { %v1319_v22 = vpack.c.bf16 %v869_v16, %v868_v14  ;;  %v1359_v23 = vpack.c.bf16 %v885_v17, %v884_v15  ;;  %v1438_v24 = vadd.f32 %v1437_v20, %v1436_v12  ;;  %v1486_v25 = vadd.f32 %v1485_v21, %v1484_v13 }
  0xfd   : > { %v1439_v26 = vpop.f32.mrf.mxu0  ;;  %v1487_v27 = vpop.f32.mrf.mxu1  ;;  %v838_v28 = vadd.f32 %v1792_v59, %v799_v18  ;;  %v854_v29 = vadd.f32 %v1792_v59, %v815_v19 }
  0xfe   : > { %1320 = vst [vmem:[%s1804_s15] sm:$0xff] %v1319_v22   ;;  %1403 = vst [vmem:[%s1804_s15 + $0x40] sm:$0xff] %v1359_v23   ;;  %v800_v30 = vmul.f32 %v1438_v24, %v1785_v51  ;;  %v816_v31 = vmul.f32 %v1486_v25, %v1785_v51 }
  0xff   : > { %v1440_v32 = vpop.f32.mrf.mxu0  ;;  %v1488_v33 = vpop.f32.mrf.mxu1  ;;  %v870_v42 = vmax.f32 %v838_v28, 0.0  ;;  %v886_v43 = vmax.f32 %v854_v29, 0.0 }
 0x100   : > { %v1441_v34 = vadd.f32 %v1440_v32, %v1439_v26  ;;  %v1489_v35 = vadd.f32 %v1488_v33, %v1487_v27  ;;  %v839_v36 = vadd.f32 %v1792_v59, %v800_v30  ;;  %v855_v37 = vadd.f32 %v1792_v59, %v816_v31 }
 0x101   : > { %v1442_v38 = vpop.f32.mrf.mxu0  ;;  %v1490_v39 = vpop.f32.mrf.mxu1 }
 0x102   : > { %v801_v40 = vmul.f32 %v1441_v34, %v1785_v51  ;;  %v817_v41 = vmul.f32 %v1489_v35, %v1785_v51  ;;  %v871_v44 = vmax.f32 %v839_v36, 0.0  ;;  %v887_v45 = vmax.f32 %v855_v37, 0.0 }
 0x103   : > { %v1443_v46 = vpop.f32.mrf.mxu0  ;;  %v1491_v47 = vpop.f32.mrf.mxu1 }
 0x104   : > { %v1444_v48 = vadd.f32 %v1443_v46, %v1442_v38  ;;  %v1492_v49 = vadd.f32 %v1491_v47, %v1490_v39  ;;  %v1324_v50 = vpack.c.bf16 %v871_v44, %v870_v42  ;;  %v1364_v52 = vpack.c.bf16 %v887_v45, %v886_v43 }
 0x105   : > { %v1445_v53 = vpop.f32.mrf.mxu0  ;;  %v1493_v54 = vpop.f32.mrf.mxu1  ;;  %v840_v55 = vadd.f32 %v1792_v59, %v801_v40  ;;  %v856_v56 = vadd.f32 %v1792_v59, %v817_v41 }
 0x106   : > { %v802_v57 = vmul.f32 %v1444_v48, %v1785_v51  ;;  %v818_v58 = vmul.f32 %v1492_v49, %v1785_v51  ;;  %1396 = vst [vmem:[%s1804_s15 + $0x8] sm:$0xff] %v1324_v50   ;;  %1404 = vst [vmem:[%s1804_s15 + $0x48] sm:$0xff] %v1364_v52  }
 0x107   : > { %v1446_v60 = vpop.f32.mrf.mxu0  ;;  %v1494_v61 = vpop.f32.mrf.mxu1  ;;  %v872_v4 = vmax.f32 %v840_v55, 0.0  ;;  %v888_v5 = vmax.f32 %v856_v56, 0.0 }
 0x108   : > { %v841_v62 = vadd.f32 %v1792_v59, %v802_v57  ;;  %v857_v63 = vadd.f32 %v1792_v59, %v818_v58  ;;  %v1447_v0 = vadd.f32 %v1446_v60, %v1445_v53  ;;  %v1495_v1 = vadd.f32 %v1494_v61, %v1493_v54 }
 0x109   : > { %v1448_v2 = vpop.f32.mrf.mxu0  ;;  %v1496_v3 = vpop.f32.mrf.mxu1 }
 0x10a   : > { %v873_v6 = vmax.f32 %v841_v62, 0.0  ;;  %v889_v7 = vmax.f32 %v857_v63, 0.0  ;;  %v803_v8 = vmul.f32 %v1447_v0, %v1785_v51  ;;  %v819_v9 = vmul.f32 %v1495_v1, %v1785_v51 }
 0x10b   : > { %v1449_v10 = vpop.f32.mrf.mxu0  ;;  %v1497_v11 = vpop.f32.mrf.mxu1 }
 0x10c   : > { %v1329_v12 = vpack.c.bf16 %v873_v6, %v872_v4  ;;  %v1369_v13 = vpack.c.bf16 %v889_v7, %v888_v5  ;;  %v1450_v14 = vadd.f32 %v1449_v10, %v1448_v2  ;;  %v1498_v15 = vadd.f32 %v1497_v11, %v1496_v3 }
 0x10d   : > { %v1451_v16 = vpop.f32.mrf.mxu0  ;;  %v1499_v17 = vpop.f32.mrf.mxu1  ;;  %v842_v18 = vadd.f32 %v1792_v59, %v803_v8  ;;  %v858_v19 = vadd.f32 %v1792_v59, %v819_v9 }
 0x10e   : > { %1397 = vst [vmem:[%s1804_s15 + $0x10] sm:$0xff] %v1329_v12   ;;  %1405 = vst [vmem:[%s1804_s15 + $0x50] sm:$0xff] %v1369_v13   ;;  %v804_v20 = vmul.f32 %v1450_v14, %v1785_v51  ;;  %v820_v21 = vmul.f32 %v1498_v15, %v1785_v51 }
 0x10f   : > { %v1452_v22 = vpop.f32.mrf.mxu0  ;;  %v1500_v23 = vpop.f32.mrf.mxu1  ;;  %v874_v32 = vmax.f32 %v842_v18, 0.0  ;;  %v890_v33 = vmax.f32 %v858_v19, 0.0 }
 0x110   : > { %v1453_v24 = vadd.f32 %v1452_v22, %v1451_v16  ;;  %v1501_v25 = vadd.f32 %v1500_v23, %v1499_v17  ;;  %v843_v26 = vadd.f32 %v1792_v59, %v804_v20  ;;  %v859_v27 = vadd.f32 %v1792_v59, %v820_v21 }
 0x111   : > { %v1454_v28 = vpop.f32.mrf.mxu0  ;;  %v1502_v29 = vpop.f32.mrf.mxu1 }
 0x112   : > { %v805_v30 = vmul.f32 %v1453_v24, %v1785_v51  ;;  %v821_v31 = vmul.f32 %v1501_v25, %v1785_v51  ;;  %v875_v34 = vmax.f32 %v843_v26, 0.0  ;;  %v891_v35 = vmax.f32 %v859_v27, 0.0 }
 0x113   : > { %v1455_v36 = vpop.f32.mrf.mxu0  ;;  %v1503_v37 = vpop.f32.mrf.mxu1 }
 0x114   : > { %v1456_v38 = vadd.f32 %v1455_v36, %v1454_v28  ;;  %v1504_v39 = vadd.f32 %v1503_v37, %v1502_v29  ;;  %v1334_v40 = vpack.c.bf16 %v875_v34, %v874_v32  ;;  %v1374_v41 = vpack.c.bf16 %v891_v35, %v890_v33 }
 0x115   : > { %v1457_v42 = vpop.f32.mrf.mxu0  ;;  %v1505_v43 = vpop.f32.mrf.mxu1  ;;  %v844_v44 = vadd.f32 %v1792_v59, %v805_v30  ;;  %v860_v45 = vadd.f32 %v1792_v59, %v821_v31 }
 0x116   : > { %v806_v46 = vmul.f32 %v1456_v38, %v1785_v51  ;;  %v822_v47 = vmul.f32 %v1504_v39, %v1785_v51  ;;  %1398 = vst [vmem:[%s1804_s15 + $0x18] sm:$0xff] %v1334_v40   ;;  %1406 = vst [vmem:[%s1804_s15 + $0x58] sm:$0xff] %v1374_v41  }
 0x117   : > { %v1458_v48 = vpop.f32.mrf.mxu0  ;;  %v1506_v49 = vpop.f32.mrf.mxu1  ;;  %v876_v57 = vmax.f32 %v844_v44, 0.0  ;;  %v892_v58 = vmax.f32 %v860_v45, 0.0 }
 0x118   : > { %v845_v50 = vadd.f32 %v1792_v59, %v806_v46  ;;  %v861_v52 = vadd.f32 %v1792_v59, %v822_v47  ;;  %v1459_v53 = vadd.f32 %v1458_v48, %v1457_v42  ;;  %v1507_v54 = vadd.f32 %v1506_v49, %v1505_v43 }
 0x119   : > { %v1460_v55 = vpop.f32.mrf.mxu0  ;;  %v1508_v56 = vpop.f32.mrf.mxu1 }
 0x11a   : > { %v877_v60 = vmax.f32 %v845_v50, 0.0  ;;  %v893_v61 = vmax.f32 %v861_v52, 0.0  ;;  %v807_v62 = vmul.f32 %v1459_v53, %v1785_v51  ;;  %v823_v63 = vmul.f32 %v1507_v54, %v1785_v51 }
 0x11b   : > { %v1461_v0 = vpop.f32.mrf.mxu0  ;;  %v1509_v1 = vpop.f32.mrf.mxu1 }
 0x11c   : > { %v1339_v2 = vpack.c.bf16 %v877_v60, %v876_v57  ;;  %v1379_v3 = vpack.c.bf16 %v893_v61, %v892_v58  ;;  %v1462_v4 = vadd.f32 %v1461_v0, %v1460_v55  ;;  %v1510_v5 = vadd.f32 %v1509_v1, %v1508_v56 }
 0x11d   : > { %v1463_v6 = vpop.f32.mrf.mxu0  ;;  %v1511_v7 = vpop.f32.mrf.mxu1  ;;  %v846_v8 = vadd.f32 %v1792_v59, %v807_v62  ;;  %v862_v9 = vadd.f32 %v1792_v59, %v823_v63 }
 0x11e   : > { %1399 = vst [vmem:[%s1804_s15 + $0x20] sm:$0xff] %v1339_v2   ;;  %1407 = vst [vmem:[%s1804_s15 + $0x60] sm:$0xff] %v1379_v3   ;;  %v808_v10 = vmul.f32 %v1462_v4, %v1785_v51  ;;  %v824_v11 = vmul.f32 %v1510_v5, %v1785_v51 }
 0x11f   : > { %v1464_v12 = vpop.f32.mrf.mxu0  ;;  %v1512_v13 = vpop.f32.mrf.mxu1  ;;  %v878_v22 = vmax.f32 %v846_v8, 0.0  ;;  %v894_v23 = vmax.f32 %v862_v9, 0.0 }
 0x120   : > { %v1465_v14 = vadd.f32 %v1464_v12, %v1463_v6  ;;  %v1513_v15 = vadd.f32 %v1512_v13, %v1511_v7  ;;  %v847_v16 = vadd.f32 %v1792_v59, %v808_v10  ;;  %v863_v17 = vadd.f32 %v1792_v59, %v824_v11 }
 0x121   : > { %v1466_v18 = vpop.f32.mrf.mxu0  ;;  %v1514_v19 = vpop.f32.mrf.mxu1 }
 0x122   : > { %v809_v20 = vmul.f32 %v1465_v14, %v1785_v51  ;;  %v825_v21 = vmul.f32 %v1513_v15, %v1785_v51  ;;  %v879_v24 = vmax.f32 %v847_v16, 0.0  ;;  %v895_v25 = vmax.f32 %v863_v17, 0.0 }
 0x123   : > { %v1467_v26 = vpop.f32.mrf.mxu0  ;;  %v1515_v27 = vpop.f32.mrf.mxu1 }
 0x124   : > { %v1468_v28 = vadd.f32 %v1467_v26, %v1466_v18  ;;  %v1516_v29 = vadd.f32 %v1515_v27, %v1514_v19  ;;  %v1344_v30 = vpack.c.bf16 %v879_v24, %v878_v22  ;;  %v1384_v31 = vpack.c.bf16 %v895_v25, %v894_v23 }
 0x125   : > { %v1469_v32 = vpop.f32.mrf.mxu0  ;;  %v1517_v33 = vpop.f32.mrf.mxu1  ;;  %v848_v34 = vadd.f32 %v1792_v59, %v809_v20  ;;  %v864_v35 = vadd.f32 %v1792_v59, %v825_v21 }
 0x126   : > { %v810_v36 = vmul.f32 %v1468_v28, %v1785_v51  ;;  %v826_v37 = vmul.f32 %v1516_v29, %v1785_v51  ;;  %1400 = vst [vmem:[%s1804_s15 + $0x28] sm:$0xff] %v1344_v30   ;;  %1408 = vst [vmem:[%s1804_s15 + $0x68] sm:$0xff] %v1384_v31  }
 0x127   : > { %v1470_v38 = vpop.f32.mrf.mxu0  ;;  %v1518_v39 = vpop.f32.mrf.mxu1  ;;  %v880_v46 = vmax.f32 %v848_v34, 0.0  ;;  %v896_v47 = vmax.f32 %v864_v35, 0.0 }
 0x128   : > { %v849_v40 = vadd.f32 %v1792_v59, %v810_v36  ;;  %v865_v41 = vadd.f32 %v1792_v59, %v826_v37  ;;  %v1471_v42 = vadd.f32 %v1470_v38, %v1469_v32  ;;  %v1519_v43 = vadd.f32 %v1518_v39, %v1517_v33 }
 0x129   : > { %v1472_v44 = vpop.f32.mrf.mxu0  ;;  %v1520_v45 = vpop.f32.mrf.mxu1 }
 0x12a   : > { %v881_v48 = vmax.f32 %v849_v40, 0.0  ;;  %v897_v49 = vmax.f32 %v865_v41, 0.0  ;;  %v811_v50 = vmul.f32 %v1471_v42, %v1785_v51  ;;  %v827_v52 = vmul.f32 %v1519_v43, %v1785_v51 }
 0x12b   : > { %v1473_v53 = vpop.f32.mrf.mxu0  ;;  %v1521_v54 = vpop.f32.mrf.mxu1 }
 0x12c   : > { %v1349_v55 = vpack.c.bf16 %v881_v48, %v880_v46  ;;  %v1389_v56 = vpack.c.bf16 %v897_v49, %v896_v47  ;;  %v1474_v57 = vadd.f32 %v1473_v53, %v1472_v44  ;;  %v1522_v58 = vadd.f32 %v1521_v54, %v1520_v45 }
 0x12d   : > { %v850_v60 = vadd.f32 %v1792_v59, %v811_v50  ;;  %v866_v61 = vadd.f32 %v1792_v59, %v827_v52 }
 0x12e   : > { %1401 = vst [vmem:[%s1804_s15 + $0x30] sm:$0xff] %v1349_v55   ;;  %1409 = vst [vmem:[%s1804_s15 + $0x70] sm:$0xff] %v1389_v56   ;;  %v812_v62 = vmul.f32 %v1474_v57, %v1785_v51  ;;  %v828_v63 = vmul.f32 %v1522_v58, %v1785_v51 }
 0x12f   : > { %v882_v2 = vmax.f32 %v850_v60, 0.0  ;;  %v898_v3 = vmax.f32 %v866_v61, 0.0 }
 0x130   : > { %v851_v0 = vadd.f32 %v1792_v59, %v812_v62  ;;  %v867_v1 = vadd.f32 %v1792_v59, %v828_v63 }
 0x132   : > { %v883_v4 = vmax.f32 %v851_v0, 0.0  ;;  %v899_v5 = vmax.f32 %v867_v1, 0.0 }
 0x134   : > { %v1354_v6 = vpack.c.bf16 %v883_v4, %v882_v2  ;;  %v1394_v7 = vpack.c.bf16 %v899_v5, %v898_v3 }
 0x136   : > { %1402 = vst [vmem:[%s1804_s15 + $0x38] sm:$0xff] %v1354_v6   ;;  %1410 = vst [vmem:[%s1804_s15 + $0x78] sm:$0xff] %v1394_v7  }
 0x137 PF: > { %s14_s17 = sadd.s32 1, %s1649_s17   ;;  %s1892_s15 = smov %s1645_s16 }
 0x138   : > { %p11_p5 = scmp.ge.s32.totalorder %s14_s17, 4   ;;  %s1893_s16 = smov %s1895_s18 }
 0x13a   :  { %13 = sbr.rel (!%p11_p5) target bundleno = 2 (0x2), region = 75 }

// kernel: _lambda_.14
= control target key start
LH: loop header
LB: loop body
LE: loop exit
PB: predicated region body
PF: predicated region fallthrough
CT: control target
= control target key end

     0   :  { %s653_s1 = inlined_call_operand.vmem [shape: bf16[128,128], index: 1, kind: input, shape index: {}]   ;;  %s654_s0 = inlined_call_operand.vmem [shape: bf16[128,128], index: 0, kind: input, shape index: {}]   ;;  %s655_s2 = inlined_call_operand.vmem [shape: f32[1,128], index: 2, kind: input, shape index: {}]   ;;  %s656_s3 = inlined_call_operand.vmem [shape: f32[1,128], index: 3, kind: input, shape index: {}]   ;;  %s657_s4 = inlined_call_operand.vmem [shape: bf16[128,128], index: 4, kind: output, shape index: {}]  }
   0x1   :  { %v534_v0 = vld [vmem:[%s653_s1 + $0x38] sm:$0xff]   ;;  %v535_v1 = vld [vmem:[%s653_s1 + $0x30] sm:$0xff]   ;;  %v536_v2 = vld [vmem:[%s653_s1 + $0x28] sm:$0xff]  }
   0x2   :  { %486 = vmatprep.subr.bf16.mxu0 %v534_v0  ;;  %518 = vmatprep.subr.bf16.mxu1 %v534_v0  ;;  %v537_v3 = vld [vmem:[%s653_s1 + $0x20] sm:$0xff]   ;;  %v538_v6 = vld [vmem:[%s653_s1 + $0x18] sm:$0xff]   ;;  %v539_v7 = vld [vmem:[%s653_s1 + $0x10] sm:$0xff]  }
   0x3   :  { %487 = vmatpush3.bf16.msra.mxu0 %v534_v0  ;;  %526 = vmatpush3.bf16.msra.mxu1 %v534_v0  ;;  %v542_v4 = vld [vmem:[%s654_s0] sm:$0xff]   ;;  %v540_v8 = vld [vmem:[%s653_s1 + $0x8] sm:$0xff]   ;;  %v546_v12 = vld [vmem:[%s654_s0 + $0x10] sm:$0xff]  }
   0x4   :  { %488 = vmatprep.subr.bf16.mxu0 %v535_v1  ;;  %519 = vmatprep.subr.bf16.mxu1 %v535_v1  ;;  %v543_v5 = vld [vmem:[%s654_s0 + $0x20] sm:$0xff]   ;;  %v544_v10 = vld [vmem:[%s654_s0 + $0x8] sm:$0xff]   ;;  %v547_v13 = vld [vmem:[%s654_s0 + $0x30] sm:$0xff]  }
   0x5   :  { %502 = vmatprep.mubr.bf16.mxu0 %v542_v4  ;;  %510 = vmatprep.mubr.bf16.mxu1 %v543_v5  ;;  %v541_v9 = vld [vmem:[%s653_s1] sm:$0xff]   ;;  %v545_v11 = vld [vmem:[%s654_s0 + $0x28] sm:$0xff]   ;;  %v548_v14 = vld [vmem:[%s654_s0 + $0x18] sm:$0xff]  }
   0x6   :  { %v549_v15 = vld [vmem:[%s654_s0 + $0x38] sm:$0xff]   ;;  %v389_v16 = vld [vmem:[%s655_s2] ss:$0 sm:$0xff] }
   0x7   :  { %489 = vmatpush3.bf16.msra.mxu0 %v535_v1  ;;  %527 = vmatpush3.bf16.msra.mxu1 %v535_v1  ;;  %v390_v23 = vld [vmem:[%s656_s3] ss:$0 sm:$0xff] }
   0x8   :  { %490 = vmatprep.subr.bf16.mxu0 %v536_v2  ;;  %520 = vmatprep.subr.bf16.mxu1 %v536_v2 }
   0xb   :  { %491 = vmatpush3.bf16.msra.mxu0 %v536_v2  ;;  %528 = vmatpush3.bf16.msra.mxu1 %v536_v2 }
   0xc   :  { %492 = vmatprep.subr.bf16.mxu0 %v537_v3  ;;  %521 = vmatprep.subr.bf16.mxu1 %v537_v3 }
   0xf   :  { %493 = vmatpush3.bf16.msra.mxu0 %v537_v3  ;;  %529 = vmatpush3.bf16.msra.mxu1 %v537_v3 }
  0x10   :  { %494 = vmatprep.subr.bf16.mxu0 %v538_v6  ;;  %522 = vmatprep.subr.bf16.mxu1 %v538_v6 }
  0x13   :  { %495 = vmatpush3.bf16.msra.mxu0 %v538_v6  ;;  %530 = vmatpush3.bf16.msra.mxu1 %v538_v6 }
  0x14   :  { %496 = vmatprep.subr.bf16.mxu0 %v539_v7  ;;  %523 = vmatprep.subr.bf16.mxu1 %v539_v7 }
  0x17   :  { %497 = vmatpush3.bf16.msra.mxu0 %v539_v7  ;;  %531 = vmatpush3.bf16.msra.mxu1 %v539_v7 }
  0x18   :  { %498 = vmatprep.subr.bf16.mxu0 %v540_v8  ;;  %524 = vmatprep.subr.bf16.mxu1 %v540_v8 }
  0x1b   :  { %499 = vmatpush3.bf16.msra.mxu0 %v540_v8  ;;  %532 = vmatpush3.bf16.msra.mxu1 %v540_v8 }
  0x1c   :  { %500 = vmatprep.subr.bf16.mxu0 %v541_v9  ;;  %525 = vmatprep.subr.bf16.mxu1 %v541_v9 }
  0x1f   :  { %501 = vmatpush3.bf16.msra.mxu0 %v541_v9  ;;  %533 = vmatpush3.bf16.msra.mxu1 %v541_v9 }
  0x22   :  { %503 = vmatmul.mubr.bf16.vlgmr.msra.gmra.mxu0 %v544_v10  ;;  %511 = vmatmul.mubr.bf16.vlgmr.msra.gmra.mxu1 %v545_v11 }
  0x23   :  { %506 = vmatprep.mubr.bf16.mxu0 %v546_v12  ;;  %514 = vmatprep.mubr.bf16.mxu1 %v547_v13 }
  0x2a   :  { %507 = vmatmul.mubr.bf16.gmra.mxu0 %v548_v14  ;;  %515 = vmatmul.mubr.bf16.gmra.mxu1 %v549_v15 }
  0xe2   :  { %v504_v17 = vpop.f32.mrf.mxu0  ;;  %v512_v18 = vpop.f32.mrf.mxu1 }
  0xe3   :  { %v252_v19 = vmul.f32 %v504_v17, %v389_v16  ;;  %v260_v20 = vmul.f32 %v512_v18, %v389_v16 }
  0xe4   :  { %v180_v21 = vpop.f32.mrf.mxu0  ;;  %v212_v22 = vpop.f32.mrf.mxu1 }
  0xe5   :  { %v250_v24 = vmul.f32 %v389_v16, %v180_v21  ;;  %v258_v25 = vmul.f32 %v389_v16, %v212_v22  ;;  %v275_v30 = vadd.f32 %v390_v23, %v252_v19  ;;  %v283_v31 = vadd.f32 %v390_v23, %v260_v20 }
  0xe6   :  { %v505_v26 = vpop.f32.mrf.mxu0  ;;  %v513_v27 = vpop.f32.mrf.mxu1 }
  0xe7   :  { %v253_v28 = vmul.f32 %v505_v26, %v389_v16  ;;  %v261_v29 = vmul.f32 %v513_v27, %v389_v16  ;;  %v273_v38 = vadd.f32 %v390_v23, %v250_v24  ;;  %v281_v39 = vadd.f32 %v390_v23, %v258_v25 }
  0xe8   :  { %v183_v32 = vpop.f32.mrf.mxu0  ;;  %v215_v33 = vpop.f32.mrf.mxu1 }
  0xe9   :  { %v276_v34 = vadd.f32 %v390_v23, %v253_v28  ;;  %v284_v35 = vadd.f32 %v390_v23, %v261_v29  ;;  %v251_v36 = vmul.f32 %v389_v16, %v183_v32  ;;  %v259_v37 = vmul.f32 %v389_v16, %v215_v33 }
  0xea   :  { %v508_v40 = vpop.f32.mrf.mxu0  ;;  %v516_v41 = vpop.f32.mrf.mxu1 }
  0xeb   :  { %v431_v42 = vpack.c.bf16 %v276_v34, %v275_v30  ;;  %v451_v43 = vpack.c.bf16 %v284_v35, %v283_v31  ;;  %v274_v44 = vadd.f32 %v390_v23, %v251_v36  ;;  %v282_v45 = vadd.f32 %v390_v23, %v259_v37 }
  0xec   :  { %v256_v46 = vmul.f32 %v508_v40, %v389_v16  ;;  %v264_v47 = vmul.f32 %v516_v41, %v389_v16  ;;  %v196_v48 = vpop.f32.mrf.mxu0  ;;  %v228_v49 = vpop.f32.mrf.mxu1 }
  0xed   :  { %463 = vst [vmem:[%s657_s4 + $0x8] sm:$0xff] %v431_v42   ;;  %467 = vst [vmem:[%s657_s4 + $0x28] sm:$0xff] %v451_v43   ;;  %v426_v50 = vpack.c.bf16 %v274_v44, %v273_v38  ;;  %v446_v51 = vpack.c.bf16 %v282_v45, %v281_v39  ;;  %v254_v52 = vmul.f32 %v389_v16, %v196_v48 }
  0xee   :  { %v262_v53 = vmul.f32 %v389_v16, %v228_v49  ;;  %v509_v54 = vpop.f32.mrf.mxu0  ;;  %v517_v55 = vpop.f32.mrf.mxu1  ;;  %v279_v58 = vadd.f32 %v390_v23, %v256_v46  ;;  %v287_v59 = vadd.f32 %v390_v23, %v264_v47 }
  0xef   :  { %427 = vst [vmem:[%s657_s4] sm:$0xff] %v426_v50   ;;  %466 = vst [vmem:[%s657_s4 + $0x20] sm:$0xff] %v446_v51   ;;  %v257_v56 = vmul.f32 %v509_v54, %v389_v16  ;;  %v265_v57 = vmul.f32 %v517_v55, %v389_v16  ;;  %v277_v2 = vadd.f32 %v390_v23, %v254_v52 }
  0xf0   :  { %v199_v60 = vpop.f32.mrf.mxu0  ;;  %v231_v61 = vpop.f32.mrf.mxu1  ;;  %v285_v3 = vadd.f32 %v390_v23, %v262_v53 }
  0xf1   :  { %v280_v62 = vadd.f32 %v390_v23, %v257_v56  ;;  %v288_v63 = vadd.f32 %v390_v23, %v265_v57  ;;  %v255_v0 = vmul.f32 %v389_v16, %v199_v60  ;;  %v263_v1 = vmul.f32 %v389_v16, %v231_v61 }
  0xf3   :  { %v441_v4 = vpack.c.bf16 %v280_v62, %v279_v58  ;;  %v461_v5 = vpack.c.bf16 %v288_v63, %v287_v59  ;;  %v278_v6 = vadd.f32 %v390_v23, %v255_v0  ;;  %v286_v7 = vadd.f32 %v390_v23, %v263_v1 }
  0xf5   :  { %465 = vst [vmem:[%s657_s4 + $0x18] sm:$0xff] %v441_v4   ;;  %469 = vst [vmem:[%s657_s4 + $0x38] sm:$0xff] %v461_v5   ;;  %v436_v8 = vpack.c.bf16 %v278_v6, %v277_v2  ;;  %v456_v9 = vpack.c.bf16 %v286_v7, %v285_v3 }
  0xf7   :  { %464 = vst [vmem:[%s657_s4 + $0x10] sm:$0xff] %v436_v8   ;;  %468 = vst [vmem:[%s657_s4 + $0x30] sm:$0xff] %v456_v9  }

// kernel: _lambda_.13
= control target key start
LH: loop header
LB: loop body
LE: loop exit
PB: predicated region body
PF: predicated region fallthrough
CT: control target
= control target key end

     0   :  { %vm135_vm0 = vsmask.f32 3328  ;;  %vm136_vm1 = vsmask.f32 7440  ;;  %s1804_s1 = inlined_call_operand.vmem [shape: bf16[2,9,9,128], index: 1, kind: input, shape index: {}]   ;;  %s1805_s0 = inlined_call_operand.vmem [shape: bf16[2,9,9,128], index: 0, kind: input, shape index: {}]   ;;  %s1806_s2 = inlined_call_operand.vmem [shape: bf16[2,9,9,128], index: 2, kind: input, shape index: {}]   ;;  %s1807_s3 = inlined_call_operand.vmem [shape: bf16[2,9,9,128], index: 3, kind: input, shape index: {}]   ;;  %s1808_s4 = inlined_call_operand.vmem [shape: bf16[2,8,8,128], index: 4, kind: output, shape index: {}]  }
   0x1   :  { %v863_v0 = vld [vmem:[%s1804_s1] sm:$0xf]  ;;  %v868_v1 = vld [vmem:[%s1804_s1 + $0x8] sm:$0xf]  ;;  %v873_v2 = vld [vmem:[%s1804_s1 + $0x10] sm:$0xf] }
   0x2   :  { %1859 = vst [vmem:[#allocation2_spill] sm:$0xff] %v868_v1  ;;  %1860 = vst [vmem:[#allocation3_spill] sm:$0xff] %v873_v2  ;;  %v878_v3 = vld [vmem:[%s1804_s1 + $0x18] sm:$0xf]  ;;  %v883_v4 = vld [vmem:[%s1805_s0] sm:$0xf] }
   0x3   :  { %1861 = vst [vmem:[#allocation4_spill] sm:$0xff] %v878_v3  ;;  %v888_v5 = vld [vmem:[%s1805_s0 + $0x8] sm:$0xf]  ;;  %v893_v6 = vld [vmem:[%s1805_s0 + $0x10] sm:$0xf]  ;;  %v139_v50 = vshrl.u32 %v883_v4, 16  ;;  %vm1079_vm2 = vmor %vm135_vm0, %vm136_vm1 }
   0x4   :  { %1862 = vst [vmem:[#allocation5_spill] sm:$0xff] %v888_v5  ;;  %1863 = vst [vmem:[#allocation6_spill] sm:$0xff] %v893_v6  ;;  %v898_v7 = vld [vmem:[%s1805_s0 + $0x18] sm:$0xf]  ;;  %v903_v8 = vld [vmem:[%s1804_s1 + $0x20] sm:$0xf] }
   0x5   :  { %1864 = vst [vmem:[#allocation7_spill] sm:$0xff] %v898_v7  ;;  %1865 = vst [vmem:[#allocation8_spill] sm:$0xff] %v903_v8  ;;  %v908_v9 = vld [vmem:[%s1804_s1 + $0x28] sm:$0xf]  ;;  %v913_v10 = vld [vmem:[%s1804_s1 + $0x30] sm:$0xf] }
   0x6   :  { %1866 = vst [vmem:[#allocation9_spill] sm:$0xff] %v908_v9  ;;  %1867 = vst [vmem:[#allocation10_spill] sm:$0xff] %v913_v10  ;;  %v918_v11 = vld [vmem:[%s1805_s0 + $0x20] sm:$0xf]  ;;  %v923_v12 = vld [vmem:[%s1805_s0 + $0x28] sm:$0xf] }
   0x7   :  { %1868 = vst [vmem:[#allocation11_spill] sm:$0xff] %v918_v11  ;;  %1869 = vst [vmem:[#allocation12_spill] sm:$0xff] %v923_v12  ;;  %v928_v13 = vld [vmem:[%s1805_s0 + $0x30] sm:$0xf]  ;;  %v933_v14 = vld [vmem:[%s1805_s0 + $0x38] sm:$0xf] }
   0x8   :  { %1870 = vst [vmem:[#allocation13_spill] sm:$0xff] %v928_v13  ;;  %1871 = vst [vmem:[#allocation14_spill] sm:$0xff] %v933_v14  ;;  %v938_v15 = vld [vmem:[%s1804_s1 + $0x38] sm:$0xf]  ;;  %v943_v16 = vld [vmem:[%s1804_s1 + $0x48] sm:$0xf] }
   0x9   :  { %1872 = vst [vmem:[#allocation15_spill] sm:$0xff] %v938_v15  ;;  %v948_v17 = vld [vmem:[%s1804_s1 + $0x50] sm:$0xf]  ;;  %v18_v18 = vld [vmem:[%s1805_s0 + $0x4] sm:$0x1]  ;;  %v142_v51 = vshll.u32 %v883_v4, 16 }
   0xa   :  { %1873 = vst [vmem:[#allocation16_spill] sm:$0xff] %v948_v17  ;;  %v956_v19 = vld [vmem:[%s1805_s0 + $0x48] sm:$0xf]  ;;  %v961_v20 = vld [vmem:[%s1805_s0 + $0x50] sm:$0xf]  ;;  %v148_v52 = vshll.u32 %v18_v18, 16 }
   0xb   :  { %1874 = vst [vmem:[#allocation17_spill] sm:$0xff] %v961_v20  ;;  %v966_v21 = vld [vmem:[%s1804_s1 + $0x58] sm:$0xf]  ;;  %v971_v22 = vld [vmem:[%s1804_s1 + $0x60] sm:$0xf]  ;;  %v153_v53 = vshrl.u32 %v888_v5, 16 }
   0xc   :  { %1875 = vst [vmem:[#allocation18_spill] sm:$0xff] %v966_v21  ;;  %1876 = vst [vmem:[#allocation19_spill] sm:$0xff] %v971_v22  ;;  %v976_v23 = vld [vmem:[%s1804_s1 + $0x68] sm:$0xf]  ;;  %v20_v24 = vld [vmem:[%s1805_s0 + $0xc] sm:$0x1] }
   0xd   :  { %1877 = vst [vmem:[#allocation20_spill] sm:$0xff] %v976_v23  ;;  %v984_v25 = vld [vmem:[%s1804_s1 + $0x70] sm:$0xf]  ;;  %v989_v26 = vld [vmem:[%s1804_s1 + $0x78] sm:$0xf]  ;;  %v156_v55 = vshll.u32 %v888_v5, 16 }
   0xe   :  { %1878 = vst [vmem:[#allocation21_spill] sm:$0xff] %v984_v25  ;;  %1879 = vst [vmem:[#allocation22_spill] sm:$0xff] %v989_v26  ;;  %v994_v27 = vld [vmem:[%s1804_s1 + $0x80] sm:$0xf]  ;;  %v1007_v32 = vld [vmem:[%s1805_s0 + $0x58] sm:$0xf] }
   0xf   :  { %1880 = vst [vmem:[#allocation23_spill] sm:$0xff] %v994_v27  ;;  %1881 = vst [vmem:[#allocation24_spill] sm:$0xff] %v1007_v32  ;;  %v1012_v33 = vld [vmem:[%s1805_s0 + $0x60] sm:$0xf]  ;;  %v1017_v34 = vld [vmem:[%s1805_s0 + $0x68] sm:$0xf] }
  0x10   :  { %1882 = vst [vmem:[#allocation25_spill] sm:$0xff] %v1012_v33  ;;  %1883 = vst [vmem:[#allocation26_spill] sm:$0xff] %v1017_v34  ;;  %v1030_v39 = vld [vmem:[%s1805_s0 + $0x70] sm:$0xf]  ;;  %v1035_v40 = vld [vmem:[%s1805_s0 + $0x78] sm:$0xf] }
  0x11   :  { %1884 = vst [vmem:[#allocation27_spill] sm:$0xff] %v1030_v39  ;;  %1885 = vst [vmem:[#allocation28_spill] sm:$0xff] %v1035_v40  ;;  %v1040_v41 = vld [vmem:[%s1805_s0 + $0x80] sm:$0xf]  ;;  %v22_v54 = vld [vmem:[%s1805_s0 + $0x14] sm:$0x1] }
  0x12   :  { %1886 = vst [vmem:[#allocation29_spill] sm:$0xff] %v1040_v41  ;;  %v162_v56 = vshll.u32 %v20_v24, 16  ;;  %v167_v57 = vshrl.u32 %v893_v6, 16  ;;  %v170_v58 = vshll.u32 %v893_v6, 16  ;;  %v24_v59 = vld [vmem:[%s1805_s0 + $0x1c] sm:$0x1] }
  0x13   :  { %v141_v60 = vrot.slane %v139_v50, 4  ;;  %v144_v61 = vrot.slane %v142_v51, 5  ;;  %v1070_v62 = vrot.slane %v148_v52, 5  ;;  %v155_v63 = vrot.slane %v153_v53, 4  ;;  %v26_v43 = vld [vmem:[%s1805_s0 + $0x24] sm:$0x1] }
  0x14   :  { %v158_v18 = vrot.slane %v156_v55, 5  ;;  %v164_v49 = vrot.slane %v162_v56, 5  ;;  %v169_v48 = vrot.slane %v167_v57, 4  ;;  %v172_v47 = vrot.slane %v170_v58, 5 }
  0x15   :  { %v145_v46 = vor.u32 %v144_v61, %v141_v60  ;;  %v176_v45 = vshll.u32 %v22_v54, 16  ;;  %v181_v24 = vshrl.u32 %v898_v7, 16  ;;  %v184_v44 = vshll.u32 %v898_v7, 16  ;;  %v28_v60 = vld [vmem:[%s1805_s0 + $0x2c] sm:$0x1] }
  0x16   :  { %v159_v51 = vor.u32 %v158_v18, %v155_v63  ;;  %v173_v52 = vor.u32 %v172_v47, %v169_v48  ;;  %v190_v53 = vshll.u32 %v24_v59, 16  ;;  %v195_v55 = vshrl.u32 %v918_v11, 16 }
  0x17   :  { %v1084_v54 = vrot.slane %v145_v46, 4  ;;  %v178_v56 = vrot.slane %v176_v45, 5  ;;  %v183_v57 = vrot.slane %v181_v24, 4  ;;  %v186_v58 = vrot.slane %v184_v44, 5  ;;  %v30_v44 = vld [vmem:[%s1805_s0 + $0x34] sm:$0x1] }
  0x18   :  { %v160_v61 = vrot.slane %v159_v51, 4  ;;  %v174_v42 = vrot.slane %v173_v52, 4  ;;  %v192_v38 = vrot.slane %v190_v53, 5  ;;  %v197_v37 = vrot.slane %v195_v55, 4  ;;  %v32_v55 = vld [vmem:[%s1805_s0 + $0x3c] sm:$0x1] }
  0x19   :  { %v187_v48 = vor.u32 %v186_v58, %v183_v57  ;;  %v198_v46 = vshll.u32 %v918_v11, 16  ;;  %v204_v59 = vshll.u32 %v26_v43, 16  ;;  %v209_v18 = vshrl.u32 %v923_v12, 16 }
  0x1a   :  { %v1099_v45 = vsel %vm1079_vm2, %v160_v61, %v164_v49  ;;  %v1103_v63 = vsel %vm1079_vm2, %v174_v42, %v178_v56  ;;  %v212_v24 = vshll.u32 %v923_v12, 16  ;;  %v218_v43 = vshll.u32 %v28_v60, 16 }
  0x1b   :  { %1889 = vst [vmem:[#allocation30_spill] sm:$0xff] %v1099_v45  ;;  %1890 = vst [vmem:[#allocation31_spill] sm:$0xff] %v1103_v63  ;;  %v188_v51 = vrot.slane %v187_v48, 4  ;;  %v200_v52 = vrot.slane %v198_v46, 5  ;;  %v206_v53 = vrot.slane %v204_v59, 5  ;;  %v211_v57 = vrot.slane %v209_v18, 4 }
  0x1c   :  { %v214_v58 = vrot.slane %v212_v24, 5  ;;  %v223_v49 = vshrl.u32 %v928_v13, 16  ;;  %v226_v61 = vshll.u32 %v928_v13, 16  ;;  %v220_v36 = vrot.slane %v218_v43, 5  ;;  %v36_v18 = vld [vmem:[%s1805_s0 + $0x4c] sm:$0x1] }
  0x1d   :  { %v1114_v42 = vsel %vm1079_vm2, %v188_v51, %v192_v38  ;;  %v201_v56 = vor.u32 %v200_v52, %v197_v37  ;;  %v232_v48 = vshll.u32 %v30_v44, 16  ;;  %v237_v35 = vshrl.u32 %v933_v14, 16  ;;  %v38_v44 = vld [vmem:[%s1805_s0 + $0x54] sm:$0x1] }
  0x1e   :  { %1891 = vst [vmem:[#allocation32_spill] sm:$0xff] %v1114_v42  ;;  %v215_v46 = vor.u32 %v214_v58, %v211_v57  ;;  %v225_v59 = vrot.slane %v223_v49, 4  ;;  %v228_v60 = vrot.slane %v226_v61, 5  ;;  %v240_v30 = vshll.u32 %v933_v14, 16 }
  0x1f   :  { %v202_v24 = vrot.slane %v201_v56, 4  ;;  %v234_v31 = vrot.slane %v232_v48, 5  ;;  %v246_v29 = vshll.u32 %v32_v55, 16  ;;  %v239_v51 = vrot.slane %v237_v35, 4  ;;  %v40_v56 = vld [vmem:[%s1805_s0 + $0x5c] sm:$0x1] }
  0x20   :  { %v216_v47 = vrot.slane %v215_v46, 4  ;;  %v229_v38 = vor.u32 %v228_v60, %v225_v59  ;;  %v251_v37 = vshrl.u32 %v956_v19, 16  ;;  %v242_v43 = vrot.slane %v240_v30, 5  ;;  %v42_v60 = vld [vmem:[%s1805_s0 + $0x64] sm:$0x1] }
  0x21   :  { %v1127_v52 = vsel %vm1079_vm2, %v202_v24, %v206_v53  ;;  %v248_v57 = vrot.slane %v246_v29, 5  ;;  %v254_v58 = vshll.u32 %v956_v19, 16  ;;  %v260_v61 = vshll.u32 %v36_v18, 16 }
  0x22   :  { %1892 = vst [vmem:[#allocation33_spill] sm:$0xff] %v1127_v52  ;;  %v1132_v55 = vsel %vm1079_vm2, %v216_v47, %v220_v36  ;;  %v230_v49 = vrot.slane %v229_v38, 4  ;;  %v253_v35 = vrot.slane %v251_v37, 4  ;;  %v243_v48 = vor.u32 %v242_v43, %v239_v51 }
  0x23   :  { %1893 = vst [vmem:[#allocation34_spill] sm:$0xff] %v1132_v55  ;;  %v256_v46 = vrot.slane %v254_v58, 5  ;;  %v265_v53 = vshrl.u32 %v961_v20, 16  ;;  %v268_v30 = vshll.u32 %v961_v20, 16  ;;  %v1143_v59 = vrot.slane %v260_v61, 5 }
  0x24   :  { %v1141_v29 = vsel %vm1079_vm2, %v230_v49, %v234_v31  ;;  %v274_v36 = vshll.u32 %v38_v44, 16  ;;  %v279_v47 = vshrl.u32 %v1007_v32, 16  ;;  %v244_v18 = vrot.slane %v243_v48, 4 }
  0x25   :  { %1894 = vst [vmem:[#allocation35_spill] sm:$0xff] %v1141_v29  ;;  %v257_v24 = vor.u32 %v256_v46, %v253_v35  ;;  %v267_v38 = vrot.slane %v265_v53, 4  ;;  %v270_v51 = vrot.slane %v268_v30, 5  ;;  %v282_v58 = vshll.u32 %v1007_v32, 16  ;;  %v44_v35 = vld [vmem:[%s1805_s0 + $0x6c] sm:$0x1] }
  0x26   :  { %v276_v37 = vrot.slane %v274_v36, 5  ;;  %v281_v43 = vrot.slane %v279_v47, 4  ;;  %v288_v28 = vshll.u32 %v40_v56, 16  ;;  %v1152_v31 = vsel %vm1079_vm2, %v244_v18, %v248_v57  ;;  %v46_v18 = vld [vmem:[%s1805_s0 + $0x74] sm:$0x1] }
  0x27   :  { %1895 = vst [vmem:[#allocation36_spill] sm:$0xff] %v1152_v31  ;;  %v1154_v44 = vrot.slane %v257_v24, 4  ;;  %v271_v49 = vor.u32 %v270_v51, %v267_v38  ;;  %v293_v61 = vshrl.u32 %v1012_v33, 16  ;;  %v284_v48 = vrot.slane %v282_v58, 5 }
  0x28   :  { %v290_v46 = vrot.slane %v288_v28, 5  ;;  %v296_v53 = vshll.u32 %v1012_v33, 16  ;;  %v302_v30 = vshll.u32 %v42_v60, 16  ;;  %v307_v47 = vshrl.u32 %v1017_v34, 16 }
  0x29   :  { %v272_v56 = vrot.slane %v271_v49, 4  ;;  %v295_v36 = vrot.slane %v293_v61, 4  ;;  %v285_v24 = vor.u32 %v284_v48, %v281_v43  ;;  %v310_v28 = vshll.u32 %v1017_v34, 16  ;;  %v48_v61 = vld [vmem:[%s1805_s0 + $0x7c] sm:$0x1] }
  0x2a   :  { %v298_v38 = vrot.slane %v296_v53, 5  ;;  %v304_v51 = vrot.slane %v302_v30, 5  ;;  %v309_v58 = vrot.slane %v307_v47, 4  ;;  %v316_v27 = vshll.u32 %v44_v35, 16 }
  0x2b   :  { %v1172_v60 = vsel %vm1079_vm2, %v272_v56, %v276_v37  ;;  %v321_v49 = vshrl.u32 %v1030_v39, 16  ;;  %v286_v57 = vrot.slane %v285_v24, 4  ;;  %v312_v25 = vrot.slane %v310_v28, 5  ;;  %v50_v37 = vld [vmem:[%s1805_s0 + $0x84] sm:$0x1] }
  0x2c   :  { %1896 = vst [vmem:[#allocation37_spill] sm:$0xff] %v1172_v60  ;;  %v299_v26 = vor.u32 %v298_v38, %v295_v36  ;;  %v324_v43 = vshll.u32 %v1030_v39, 16  ;;  %v318_v48 = vrot.slane %v316_v27, 5  ;;  %v330_v30 = vshll.u32 %v46_v18, 16 }
  0x2d   :  { %v323_v53 = vrot.slane %v321_v49, 4  ;;  %v335_v34 = vshrl.u32 %v1035_v40, 16  ;;  %v1185_v35 = vsel %vm1079_vm2, %v286_v57, %v290_v46  ;;  %v313_v47 = vor.u32 %v312_v25, %v309_v58 }
  0x2e   :  { %1897 = vst [vmem:[#allocation38_spill] sm:$0xff] %v1185_v35  ;;  %v300_v56 = vrot.slane %v299_v26, 4  ;;  %v326_v24 = vrot.slane %v324_v43, 5  ;;  %v332_v36 = vrot.slane %v330_v30, 5  ;;  %v338_v28 = vshll.u32 %v1035_v40, 16 }
  0x2f   :  { %v337_v38 = vrot.slane %v335_v34, 4  ;;  %v344_v27 = vshll.u32 %v48_v61, 16  ;;  %v314_v49 = vrot.slane %v313_v47, 4  ;;  %v349_v23 = vshrl.u32 %v1040_v41, 16  ;;  %v1244_v47 = vld [vmem:[%s1806_s2 + $0x8] sm:$0xf] }
  0x30   :  { %v1190_v18 = vsel %vm1079_vm2, %v300_v56, %v304_v51  ;;  %v327_v39 = vor.u32 %v326_v24, %v323_v53  ;;  %v340_v33 = vrot.slane %v338_v28, 5  ;;  %v352_v46 = vshll.u32 %v1040_v41, 16  ;;  %v1239_v56 = vld [vmem:[%s1806_s2] sm:$0xf] }
  0x31   :  { %1898 = vst [vmem:[#allocation39_spill] sm:$0xff] %v1190_v18  ;;  %v346_v22 = vrot.slane %v344_v27, 5  ;;  %v358_v26 = vshll.u32 %v50_v37, 16  ;;  %v1196_v25 = vsel %vm1079_vm2, %v314_v49, %v318_v48  ;;  %v351_v57 = vrot.slane %v349_v23, 4 }
  0x32   :  { %1899 = vst [vmem:[#allocation40_spill] sm:$0xff] %v1196_v25  ;;  %v328_v34 = vrot.slane %v327_v39, 4  ;;  %v1900_v58 = vmax.bf16 %v863_v0, %v883_v4  ;;  %v1901_v51 = vsel %vm1079_vm2, %v1084_v54, %v1070_v62  ;;  %v341_v43 = vor.u32 %v340_v33, %v337_v38 }
  0x33   :  { %v354_v53 = vrot.slane %v352_v46, 5  ;;  %v360_v30 = vrot.slane %v358_v26, 5  ;;  %v1902_v37 = vmax.bf16 %v868_v1, %v888_v5  ;;  %v1904_v0 = vmax.bf16 %v873_v2, %v893_v6  ;;  %v1261_v46 = vld [vmem:[%s1806_s2 + $0x10] sm:$0xf]  ;;  %v1266_v26 = vld [vmem:[%s1806_s2 + $0x18] sm:$0xf] }
  0x34   :  { %v1206_v61 = vmax.bf16 %v1901_v51, %v1900_v58  ;;  %v1216_v23 = vsel %vm1079_vm2, %v328_v34, %v332_v36  ;;  %v1905_v33 = vmax.bf16 %v878_v3, %v898_v7  ;;  %v1906_v62 = vmax.bf16 %v903_v8, %v918_v11  ;;  %v1271_v34 = vld [vmem:[%s1806_s2 + $0x20] sm:$0xf]  ;;  %v110_v8 = vld [vmem:[%s1807_s3 + $0x38] sm:$0xf]  ;;  %v111_v3 = vld [vmem:[%s1807_s3 + $0x48] sm:$0xf] }
  0x35   :  { %v1212_v48 = vmax.bf16 %v1099_v45, %v1902_v37  ;;  %1903 = vst [vmem:[#allocation41_spill] sm:$0xff] %v1216_v23  ;;  %v1222_v4 = vmax.bf16 %v1103_v63, %v1904_v0  ;;  %v342_v24 = vrot.slane %v341_v43, 4  ;;  %v355_v36 = vor.u32 %v354_v53, %v351_v57  ;;  %v114_v2 = vld [vmem:[%s1807_s3 + $0x60] sm:$0xf] }
  0x36   :  { %v1228_v39 = vmax.bf16 %v1114_v42, %v1905_v33  ;;  %v1234_v54 = vmax.bf16 %v1127_v52, %v1906_v62  ;;  %v1907_v38 = vmax.bf16 %v908_v9, %v923_v12  ;;  %v1908_v27 = vmax.bf16 %v913_v10, %v928_v13 }
  0x37   :  { %v1909_v57 = vmax.bf16 %v938_v15, %v933_v14  ;;  %v1910_v51 = vmax.bf16 %v943_v16, %v956_v19  ;;  %v1911_v43 = vsel %vm1079_vm2, %v1154_v44, %v1143_v59  ;;  %v1912_v37 = vmax.bf16 %v948_v17, %v961_v20  ;;  %v1304_v16 = vld [vmem:[%s1806_s2 + $0x28] sm:$0xf]  ;;  %v1309_v19 = vld [vmem:[%s1806_s2 + $0x30] sm:$0xf]  ;;  %v1314_v59 = vld [vmem:[%s1806_s2 + $0x38] sm:$0xf] }
  0x38   :  { %v1250_v28 = vmax.bf16 %v1132_v55, %v1907_v38  ;;  %v1256_v49 = vmax.bf16 %v1141_v29, %v1908_v27  ;;  %v1913_v33 = vmax.bf16 %v966_v21, %v1007_v32  ;;  %v1318_v44 = vsel %vm1079_vm2, %v342_v24, %v346_v22  ;;  %v1915_v27 = vld [vmem:[#allocation19_spill] sm:$0xff]  ;;  %v1336_v22 = vld [vmem:[%s1806_s2 + $0x50] sm:$0xf]  ;;  %v1341_v24 = vld [vmem:[%s1806_s2 + $0x58] sm:$0xf] }
  0x39   :  { %v1277_v58 = vmax.bf16 %v1152_v31, %v1909_v57  ;;  %v1287_v53 = vmax.bf16 %v1911_v43, %v1910_v51  ;;  %v1293_v0 = vmax.bf16 %v1172_v60, %v1912_v37  ;;  %1914 = vst [vmem:[#allocation42_spill] sm:$0xff] %v1318_v44  ;;  %v356_v38 = vrot.slane %v355_v36, 4  ;;  %v1916_v57 = vld [vmem:[#allocation25_spill] sm:$0xff]  ;;  %v1918_v37 = vld [vmem:[#allocation20_spill] sm:$0xff]  ;;  %v1331_v31 = vld [vmem:[%s1806_s2 + $0x48] sm:$0xf] }
  0x3a   :  { %v1299_v62 = vmax.bf16 %v1185_v35, %v1913_v33  ;;  %v1917_v51 = vmax.bf16 %v1915_v27, %v1916_v57  ;;  %v1919_v33 = vld [vmem:[#allocation26_spill] sm:$0xff]  ;;  %v394_v63 = vmax.bf16 %v1206_v61, %v1239_v56  ;;  %v395_v45 = vmax.bf16 %v1212_v48, %v1244_v47  ;;  %v104_v48 = vld [vmem:[%s1807_s3 + $0x8] sm:$0xf] }
  0x3b   :  { %v1920_v35 = vmax.bf16 %v1918_v37, %v1919_v33  ;;  %v1346_v36 = vld [vmem:[%s1806_s2 + $0x60] sm:$0xf]  ;;  %v1366_v37 = vld [vmem:[%s1806_s2 + $0x68] sm:$0xf]  ;;  %v397_v27 = vmax.bf16 %v1228_v39, %v1266_v26  ;;  %v398_v21 = vmax.bf16 %v1234_v54, %v1271_v34  ;;  %v399_v54 = vmax.bf16 %v1250_v28, %v1304_v16 }
  0x3c   :  { %v389_v43 = vmax.bf16 %v1190_v18, %v1917_v51  ;;  %v1921_v51 = vld [vmem:[#allocation21_spill] sm:$0xff]  ;;  %v1924_v55 = vld [vmem:[#allocation22_spill] sm:$0xff]  ;;  %v108_v15 = vld [vmem:[%s1807_s3 + $0x28] sm:$0xf]  ;;  %v400_v10 = vmax.bf16 %v1256_v49, %v1309_v19  ;;  %v401_v9 = vmax.bf16 %v1277_v58, %v1314_v59  ;;  %v402_v28 = vmax.bf16 %v1287_v53, %v1331_v31 }
  0x3d   :  { %v390_v60 = vmax.bf16 %v1196_v25, %v1920_v35  ;;  %v103_v35 = vld [vmem:[%s1807_s3] sm:$0xf]  ;;  %v1922_v25 = vld [vmem:[#allocation27_spill] sm:$0xff]  ;;  %v1925_v52 = vmax.bf16 %v1924_v55, %v1035_v40  ;;  %v1394_v55 = vsel %vm1079_vm2, %v356_v38, %v360_v30  ;;  %v109_v30 = vld [vmem:[%s1807_s3 + $0x30] sm:$0xf]  ;;  %v403_v49 = vmax.bf16 %v1293_v0, %v1336_v22 }
  0x3e   :  { %v1923_v18 = vmax.bf16 %v1921_v51, %v1922_v25  ;;  %v1381_v61 = vld [vmem:[%s1806_s2 + $0x80] sm:$0xf]  ;;  %1926 = vst [vmem:[#allocation43_spill] sm:$0xff] %v1394_v55  ;;  %v396_v51 = vmax.bf16 %v1222_v4, %v1261_v46  ;;  %v1927_v38 = vld [vmem:[#allocation23_spill] sm:$0xff]  ;;  %v404_v58 = vmax.bf16 %v1299_v62, %v1341_v24  ;;  %v117_v40 = vld [vmem:[%s1807_s3 + $0x78] sm:$0xf]  ;;  %v1459_v33 = vmax.bf16 %v394_v63, %v103_v35 }
  0x3f   :  { %v392_v42 = vmax.bf16 %v1318_v44, %v1925_v52  ;;  %v1376_v52 = vld [vmem:[%s1806_s2 + $0x78] sm:$0xf]  ;;  %v105_v44 = vld [vmem:[%s1807_s3 + $0x10] sm:$0xf]  ;;  %v107_v17 = vld [vmem:[%s1807_s3 + $0x20] sm:$0xf]  ;;  %v1928_v4 = vmax.bf16 %v1927_v38, %v1040_v41  ;;  %v406_v1 = vmax.bf16 %v390_v60, %v1366_v37  ;;  %v1461_v60 = vmax.bf16 %v395_v45, %v104_v48 }
  0x40   :  { %v391_v29 = vmax.bf16 %v1216_v23, %v1923_v18  ;;  %v1371_v18 = vld [vmem:[%s1806_s2 + $0x70] sm:$0xf]  ;;  %v106_v23 = vld [vmem:[%s1807_s3 + $0x18] sm:$0xf]  ;;  %v115_v53 = vld [vmem:[%s1807_s3 + $0x68] sm:$0xf]  ;;  %v1470_v57 = vmax.bf16 %v398_v21, %v107_v17  ;;  %v1472_v32 = vmax.bf16 %v399_v54, %v108_v15  ;;  %v1474_v20 = vmax.bf16 %v400_v10, %v109_v30 }
  0x41   :  { %v393_v39 = vmax.bf16 %v1394_v55, %v1928_v4  ;;  %v112_v4 = vld [vmem:[%s1807_s3 + $0x50] sm:$0xf]  ;;  %v405_v55 = vmax.bf16 %v389_v43, %v1346_v36  ;;  %v113_v38 = vld [vmem:[%s1807_s3 + $0x58] sm:$0xf]  ;;  %v408_v62 = vmax.bf16 %v392_v42, %v1376_v52  ;;  %v118_v25 = vld [vmem:[%s1807_s3 + $0x80] sm:$0xf]  ;;  %v1465_v42 = vmax.bf16 %v397_v27, %v106_v23 }
  0x42   :  { %v407_v0 = vmax.bf16 %v391_v29, %v1371_v18  ;;  %v116_v41 = vld [vmem:[%s1807_s3 + $0x70] sm:$0xf]  ;;  %v1463_v29 = vmax.bf16 %v396_v51, %v105_v44  ;;  %v1476_v14 = vmax.bf16 %v401_v9, %v110_v8  ;;  %v74_v45 = vld [vmem:[%s1806_s2 + $0xc] sm:$0x1]  ;;  %v1481_v63 = vmax.bf16 %v402_v28, %v111_v3 }
  0x43   :  { %v409_v43 = vmax.bf16 %v393_v39, %v1381_v61  ;;  %v72_v39 = vld [vmem:[%s1806_s2 + $0x4] sm:$0x1]  ;;  %v1483_v23 = vmax.bf16 %v403_v49, %v112_v4  ;;  %v1485_v44 = vmax.bf16 %v404_v58, %v113_v38  ;;  %v1487_v27 = vmax.bf16 %v405_v55, %v114_v2  ;;  %v76_v2 = vld [vmem:[%s1806_s2 + $0x14] sm:$0x1] }
  0x44   :  { %v1489_v17 = vmax.bf16 %v406_v1, %v115_v53  ;;  %v1491_v15 = vmax.bf16 %v407_v0, %v116_v41  ;;  %v1493_v10 = vmax.bf16 %v408_v62, %v117_v40  ;;  %v427_v9 = vshrl.u32 %v1239_v56, 16  ;;  %v80_v53 = vld [vmem:[%s1806_s2 + $0x24] sm:$0x1] }
  0x45   :  { %v1495_v8 = vmax.bf16 %v409_v43, %v118_v25  ;;  %v430_v21 = vshll.u32 %v1239_v56, 16  ;;  %v436_v3 = vshll.u32 %v72_v39, 16  ;;  %v441_v35 = vshrl.u32 %v1244_v47, 16  ;;  %v78_v25 = vld [vmem:[%s1806_s2 + $0x1c] sm:$0x1] }
  0x46   :  { %v444_v1 = vshll.u32 %v1244_v47, 16  ;;  %v450_v55 = vshll.u32 %v74_v45, 16  ;;  %v455_v41 = vshrl.u32 %v1261_v46, 16  ;;  %v458_v40 = vshll.u32 %v1261_v46, 16 }
  0x47   :  { %1929 = vst [vmem:[#allocation44_spill] sm:$0xff] %v1495_v8  ;;  %v429_v51 = vrot.slane %v427_v9, 4  ;;  %v432_v56 = vrot.slane %v430_v21, 5  ;;  %v1509_v48 = vrot.slane %v436_v3, 5  ;;  %v443_v30 = vrot.slane %v441_v35, 4 }
  0x48   :  { %v446_v38 = vrot.slane %v444_v1, 5  ;;  %v1511_v54 = vrot.slane %v450_v55, 5  ;;  %v457_v4 = vrot.slane %v455_v41, 4  ;;  %v460_v28 = vrot.slane %v458_v40, 5  ;;  %v82_v35 = vld [vmem:[%s1806_s2 + $0x2c] sm:$0x1] }
  0x49   :  { %v433_v47 = vor.u32 %v432_v56, %v429_v51  ;;  %v464_v49 = vshll.u32 %v76_v2, 16  ;;  %v469_v58 = vshrl.u32 %v1266_v26, 16  ;;  %v472_v46 = vshll.u32 %v1266_v26, 16  ;;  %v84_v56 = vld [vmem:[%s1806_s2 + $0x34] sm:$0x1] }
  0x4a   :  { %v447_v0 = vor.u32 %v446_v38, %v443_v30  ;;  %v461_v62 = vor.u32 %v460_v28, %v457_v4  ;;  %v478_v43 = vshll.u32 %v78_v25, 16  ;;  %v483_v39 = vshrl.u32 %v1271_v34, 16 }
  0x4b   :  { %v1519_v45 = vrot.slane %v433_v47, 4  ;;  %v1521_v9 = vrot.slane %v464_v49, 5  ;;  %v471_v21 = vrot.slane %v469_v58, 4  ;;  %v474_v3 = vrot.slane %v472_v46, 5  ;;  %v86_v46 = vld [vmem:[%s1806_s2 + $0x3c] sm:$0x1] }
  0x4c   :  { %v1526_v26 = vrot.slane %v447_v0, 4  ;;  %v1528_v2 = vrot.slane %v461_v62, 4  ;;  %v1530_v1 = vrot.slane %v478_v43, 5  ;;  %v485_v55 = vrot.slane %v483_v39, 4 }
  0x4d   :  { %v475_v40 = vor.u32 %v474_v3, %v471_v21  ;;  %v486_v25 = vshll.u32 %v1271_v34, 16  ;;  %v492_v51 = vshll.u32 %v80_v53, 16  ;;  %v497_v4 = vshrl.u32 %v1304_v16, 16 }
  0x4e   :  { %v500_v28 = vshll.u32 %v1304_v16, 16  ;;  %v506_v58 = vshll.u32 %v82_v35, 16  ;;  %v511_v62 = vshrl.u32 %v1309_v19, 16  ;;  %v514_v43 = vshll.u32 %v1309_v19, 16 }
  0x4f   :  { %v1550_v34 = vrot.slane %v475_v40, 4  ;;  %v488_v47 = vrot.slane %v486_v25, 5  ;;  %v1552_v49 = vrot.slane %v492_v51, 5  ;;  %v499_v53 = vrot.slane %v497_v4, 4  ;;  %v88_v4 = vld [vmem:[%s1806_s2 + $0x4c] sm:$0x1] }
  0x50   :  { %v502_v0 = vrot.slane %v500_v28, 5  ;;  %v1563_v21 = vrot.slane %v506_v58, 5  ;;  %v520_v3 = vshll.u32 %v84_v56, 16  ;;  %v513_v40 = vrot.slane %v511_v62, 4 }
  0x51   :  { %v489_v39 = vor.u32 %v488_v47, %v485_v55  ;;  %v516_v25 = vrot.slane %v514_v43, 5  ;;  %v525_v51 = vshrl.u32 %v1314_v59, 16  ;;  %v528_v38 = vshll.u32 %v1314_v59, 16 }
  0x52   :  { %v503_v35 = vor.u32 %v502_v0, %v499_v53  ;;  %v1571_v19 = vrot.slane %v520_v3, 5  ;;  %v534_v16 = vshll.u32 %v86_v46, 16  ;;  %v539_v58 = vshrl.u32 %v1331_v31, 16  ;;  %v90_v53 = vld [vmem:[%s1806_s2 + $0x54] sm:$0x1] }
  0x53   :  { %v1569_v28 = vrot.slane %v489_v39, 4  ;;  %v517_v47 = vor.u32 %v516_v25, %v513_v40  ;;  %v527_v56 = vrot.slane %v525_v51, 4  ;;  %v530_v62 = vrot.slane %v528_v38, 5  ;;  %v92_v40 = vld [vmem:[%s1806_s2 + $0x5c] sm:$0x1] }
  0x54   :  { %v1574_v55 = vrot.slane %v503_v35, 4  ;;  %v1584_v43 = vrot.slane %v534_v16, 5  ;;  %v542_v59 = vshll.u32 %v1331_v31, 16  ;;  %v541_v3 = vrot.slane %v539_v58, 4  ;;  %v94_v58 = vld [vmem:[%s1806_s2 + $0x64] sm:$0x1] }
  0x55   :  { %v1591_v39 = vrot.slane %v517_v47, 4  ;;  %v548_v35 = vshll.u32 %v88_v4, 16  ;;  %v531_v25 = vor.u32 %v530_v62, %v527_v56  ;;  %v553_v38 = vshrl.u32 %v1336_v22, 16 }
  0x56   :  { %v544_v51 = vrot.slane %v542_v59, 5  ;;  %v556_v16 = vshll.u32 %v1336_v22, 16  ;;  %v562_v47 = vshll.u32 %v90_v53, 16  ;;  %v567_v4 = vshrl.u32 %v1341_v24, 16 }
  0x57   :  { %v1602_v46 = vrot.slane %v548_v35, 5  ;;  %v1608_v56 = vrot.slane %v531_v25, 4  ;;  %v555_v59 = vrot.slane %v553_v38, 4  ;;  %v570_v41 = vshll.u32 %v1341_v24, 16 }
  0x58   :  { %v545_v62 = vor.u32 %v544_v51, %v541_v3  ;;  %v558_v0 = vrot.slane %v556_v16, 5  ;;  %v1610_v22 = vrot.slane %v562_v47, 5  ;;  %v569_v30 = vrot.slane %v567_v4, 4  ;;  %v96_v3 = vld [vmem:[%s1806_s2 + $0x6c] sm:$0x1] }
  0x59   :  { %v576_v31 = vshll.u32 %v92_v40, 16  ;;  %v581_v25 = vshrl.u32 %v1346_v36, 16  ;;  %v572_v51 = vrot.slane %v570_v41, 5  ;;  %v584_v16 = vshll.u32 %v1346_v36, 16 }
  0x5a   :  { %v1617_v35 = vrot.slane %v545_v62, 4  ;;  %v559_v13 = vor.u32 %v558_v0, %v555_v59  ;;  %v590_v24 = vshll.u32 %v94_v58, 16  ;;  %v595_v0 = vshrl.u32 %v1366_v37, 16  ;;  %v98_v62 = vld [vmem:[%s1806_s2 + $0x74] sm:$0x1] }
  0x5b   :  { %v578_v38 = vrot.slane %v576_v31, 5  ;;  %v583_v4 = vrot.slane %v581_v25, 4  ;;  %v573_v59 = vor.u32 %v572_v51, %v569_v30  ;;  %v586_v53 = vrot.slane %v584_v16, 5 }
  0x5c   :  { %v551_v40 = vsel %vm1079_vm2, %v1617_v35, %v1602_v46  ;;  %v560_v47 = vrot.slane %v559_v13, 4  ;;  %v592_v41 = vrot.slane %v590_v24, 5  ;;  %v598_v31 = vshll.u32 %v1366_v37, 16  ;;  %v100_v46 = vld [vmem:[%s1806_s2 + $0x7c] sm:$0x1] }
  0x5d   :  { %v597_v58 = vrot.slane %v595_v0, 4  ;;  %v604_v8 = vshll.u32 %v96_v3, 16  ;;  %v609_v13 = vshrl.u32 %v1371_v18, 16  ;;  %v574_v35 = vrot.slane %v573_v59, 4 }
  0x5e   :  { %v565_v36 = vsel %vm1079_vm2, %v560_v47, %v1610_v22  ;;  %v587_v25 = vor.u32 %v586_v53, %v583_v4  ;;  %v600_v12 = vrot.slane %v598_v31, 5  ;;  %v612_v30 = vshll.u32 %v1371_v18, 16  ;;  %v102_v22 = vld [vmem:[%s1806_s2 + $0x84] sm:$0x1] }
  0x5f   :  { %v606_v51 = vrot.slane %v604_v8, 5  ;;  %v611_v16 = vrot.slane %v609_v13, 4  ;;  %v618_v37 = vshll.u32 %v98_v62, 16  ;;  %v623_v24 = vshrl.u32 %v1376_v52, 16 }
  0x60   :  { %v579_v3 = vsel %vm1079_vm2, %v574_v35, %v578_v38  ;;  %v588_v47 = vrot.slane %v587_v25, 4  ;;  %v601_v0 = vor.u32 %v600_v12, %v597_v58  ;;  %v614_v11 = vrot.slane %v612_v30, 5 }
  0x61   :  { %v620_v59 = vrot.slane %v618_v37, 5  ;;  %v625_v53 = vrot.slane %v623_v24, 4  ;;  %v626_v4 = vshll.u32 %v1376_v52, 16  ;;  %v632_v18 = vshll.u32 %v100_v46, 16 }
  0x62   :  { %v593_v8 = vsel %vm1079_vm2, %v588_v47, %v592_v41  ;;  %v602_v62 = vrot.slane %v601_v0, 4  ;;  %v615_v31 = vor.u32 %v614_v11, %v611_v16  ;;  %v637_v13 = vshrl.u32 %v1381_v61, 16  ;;  %v51_v0 = vld [vmem:[%s1805_s0 + $0x88] sm:$0xf] }
  0x63   :  { %v628_v7 = vrot.slane %v626_v4, 5  ;;  %v634_v6 = vrot.slane %v632_v18, 5  ;;  %v640_v5 = vshll.u32 %v1381_v61, 16  ;;  %v646_v38 = vshll.u32 %v102_v22, 16  ;;  %v1945_v22 = vld [vmem:[#allocation14_spill] sm:$0xff]  ;;  %v1947_v18 = vld [vmem:[#allocation24_spill] sm:$0xff] }
  0x64   :  { %v607_v12 = vsel %vm1079_vm2, %v602_v62, %v606_v51  ;;  %v616_v58 = vrot.slane %v615_v31, 4  ;;  %v639_v35 = vrot.slane %v637_v13, 4  ;;  %v1930_v52 = vsel %vm1079_vm2, %v1519_v45, %v1509_v48  ;;  %v1948_v62 = vld [vmem:[#allocation25_spill] sm:$0xff]  ;;  %v1949_v13 = vld [vmem:[#allocation26_spill] sm:$0xff] }
  0x65   :  { %v666_v41 = vmax.bf16 %v1930_v52, %v1459_v33  ;;  %v629_v11 = vor.u32 %v628_v7, %v625_v53  ;;  %v642_v46 = vrot.slane %v640_v5, 5  ;;  %v648_v25 = vrot.slane %v646_v38, 5  ;;  %v1946_v53 = vld [vmem:[#allocation17_spill] sm:$0xff] }
  0x66   :  { %v1931_v61 = vsel %vm1079_vm2, %v1526_v26, %v1511_v54  ;;  %v621_v51 = vsel %vm1079_vm2, %v616_v58, %v620_v59  ;;  %v1932_v48 = vsel %vm1079_vm2, %v1528_v2, %v1521_v9  ;;  %v1933_v5 = vsel %vm1079_vm2, %v1550_v34, %v1530_v1  ;;  %v61_v59 = vld [vmem:[%s1804_s1 + $0x40] sm:$0xf] }
  0x67   :  { %v667_v30 = vmax.bf16 %v1931_v61, %v1461_v60  ;;  %v668_v33 = vmax.bf16 %v1932_v48, %v1463_v29  ;;  %v669_v7 = vmax.bf16 %v1933_v5, %v1465_v42  ;;  %v1934_v60 = vsel %vm1079_vm2, %v1569_v28, %v1552_v49  ;;  %v1953_v61 = vld [vmem:[#allocation2_spill] sm:$0xff] }
  0x68   :  { %v670_v54 = vmax.bf16 %v1934_v60, %v1470_v57  ;;  %v630_v45 = vrot.slane %v629_v11, 4  ;;  %v643_v26 = vor.u32 %v642_v46, %v639_v35  ;;  %v1935_v29 = vsel %vm1079_vm2, %v1574_v55, %v1563_v21  ;;  %v1951_v35 = vld [vmem:[#allocation28_spill] sm:$0xff] }
  0x69   :  { %v671_v9 = vmax.bf16 %v1935_v29, %v1472_v32  ;;  %v1936_v42 = vsel %vm1079_vm2, %v1591_v39, %v1571_v19  ;;  %v1937_v57 = vsel %vm1079_vm2, %v1608_v56, %v1584_v43  ;;  %v674_v34 = vmax.bf16 %v551_v40, %v1481_v63  ;;  %v1938_v43 = vld [vmem:[#allocation5_spill] sm:$0xff]  ;;  %v1939_v56 = vld [vmem:[#allocation6_spill] sm:$0xff] }
  0x6a   :  { %v672_v2 = vmax.bf16 %v1936_v42, %v1474_v20  ;;  %v673_v1 = vmax.bf16 %v1937_v57, %v1476_v14  ;;  %v675_v49 = vmax.bf16 %v565_v36, %v1483_v23  ;;  %v676_v32 = vmax.bf16 %v579_v3, %v1485_v44  ;;  %v33_v23 = vld [vmem:[%s1805_s0 + $0x40] sm:$0xf]  ;;  %v1940_v44 = vld [vmem:[#allocation7_spill] sm:$0xff] }
  0x6b   :  { %v635_v21 = vsel %vm1079_vm2, %v630_v45, %v634_v6  ;;  %v644_v28 = vrot.slane %v643_v26, 4  ;;  %v677_v19 = vmax.bf16 %v593_v8, %v1487_v27  ;;  %v678_v20 = vmax.bf16 %v607_v12, %v1489_v17  ;;  %v1941_v27 = vld [vmem:[#allocation11_spill] sm:$0xff]  ;;  %v1942_v17 = vld [vmem:[#allocation12_spill] sm:$0xff]  ;;  %v1957_v45 = vld [vmem:[#allocation9_spill] sm:$0xff] }
  0x6c   :  { %v679_v55 = vmax.bf16 %v621_v51, %v1491_v15  ;;  %v680_v39 = vmax.bf16 %v635_v21, %v1493_v10  ;;  %v682_v14 = vmax.bf16 %v666_v41, %v1938_v43  ;;  %v683_v63 = vmax.bf16 %v667_v30, %v1939_v56  ;;  %v1943_v15 = vld [vmem:[#allocation44_spill] sm:$0xff]  ;;  %v1944_v10 = vld [vmem:[#allocation13_spill] sm:$0xff]  ;;  %v1950_v12 = vld [vmem:[#allocation27_spill] sm:$0xff] }
  0x6d   :  { %v649_v6 = vsel %vm1079_vm2, %v644_v28, %v648_v25  ;;  %v684_v40 = vmax.bf16 %v668_v33, %v1940_v44  ;;  %v685_v36 = vmax.bf16 %v669_v7, %v1941_v27  ;;  %v686_v16 = vmax.bf16 %v670_v54, %v1942_v17  ;;  %v1952_v41 = vld [vmem:[#allocation29_spill] sm:$0xff]  ;;  %v70_v25 = vld [vmem:[%s1804_s1 + $0x88] sm:$0xf]  ;;  %v1955_v33 = vld [vmem:[#allocation4_spill] sm:$0xff] }
  0x6e   :  { %v681_v37 = vmax.bf16 %v649_v6, %v1943_v15  ;;  %v687_v24 = vmax.bf16 %v671_v9, %v1944_v10  ;;  %v688_v3 = vmax.bf16 %v672_v2, %v1945_v22  ;;  %v689_v47 = vmax.bf16 %v673_v1, %v33_v23  ;;  %v1954_v51 = vld [vmem:[#allocation3_spill] sm:$0xff]  ;;  %v1956_v7 = vld [vmem:[#allocation8_spill] sm:$0xff]  ;;  %v34_v54 = vld [vmem:[%s1805_s0 + $0x44] sm:$0x1] }
  0x6f   :  { %v690_v4 = vmax.bf16 %v674_v34, %v1946_v53  ;;  %v691_v8 = vmax.bf16 %v675_v49, %v1947_v18  ;;  %v692_v31 = vmax.bf16 %v676_v32, %v1948_v62  ;;  %v693_v38 = vmax.bf16 %v677_v19, %v1949_v13  ;;  %v1958_v29 = vld [vmem:[#allocation10_spill] sm:$0xff]  ;;  %v1959_v42 = vld [vmem:[#allocation15_spill] sm:$0xff]  ;;  %v1960_v34 = vld [vmem:[#allocation16_spill] sm:$0xff] }
  0x70   :  { %v694_v58 = vmax.bf16 %v678_v20, %v1950_v12  ;;  %v695_v52 = vmax.bf16 %v679_v55, %v1951_v35  ;;  %v696_v11 = vmax.bf16 %v680_v39, %v1952_v41  ;;  %v697_v46 = vmax.bf16 %v681_v37, %v51_v0  ;;  %v52_v1 = vld [vmem:[%s1805_s0 + $0x8c] sm:$0x1]  ;;  %v1961_v32 = vld [vmem:[#allocation18_spill] sm:$0xff]  ;;  %v1963_v20 = vld [vmem:[#allocation20_spill] sm:$0xff] }
  0x71   :  { %v698_v30 = vmax.bf16 %v682_v14, %v1953_v61  ;;  %v699_v48 = vmax.bf16 %v683_v63, %v1954_v51  ;;  %v700_v5 = vmax.bf16 %v684_v40, %v1955_v33  ;;  %v701_v60 = vmax.bf16 %v685_v36, %v1956_v7  ;;  %v1962_v28 = vld [vmem:[#allocation19_spill] sm:$0xff]  ;;  %v1964_v39 = vld [vmem:[#allocation21_spill] sm:$0xff]  ;;  %v1965_v14 = vld [vmem:[#allocation22_spill] sm:$0xff] }
  0x72   :  { %v702_v26 = vmax.bf16 %v686_v16, %v1957_v45  ;;  %v703_v9 = vmax.bf16 %v687_v24, %v1958_v29  ;;  %v704_v2 = vmax.bf16 %v688_v3, %v1959_v42  ;;  %v705_v57 = vmax.bf16 %v689_v47, %v61_v59  ;;  %v1966_v63 = vld [vmem:[#allocation23_spill] sm:$0xff]  ;;  %v1967_v37 = vld [vmem:[#allocation30_spill] sm:$0xff]  ;;  %v1973_v35 = vld [vmem:[#allocation36_spill] sm:$0xff] }
  0x73   :  { %v706_v49 = vmax.bf16 %v690_v4, %v1960_v34  ;;  %v707_v21 = vmax.bf16 %v691_v8, %v1961_v32  ;;  %v708_v19 = vmax.bf16 %v692_v31, %v1962_v28  ;;  %v709_v55 = vmax.bf16 %v693_v38, %v1963_v20  ;;  %v1968_v24 = vld [vmem:[#allocation31_spill] sm:$0xff]  ;;  %v1969_v8 = vld [vmem:[#allocation32_spill] sm:$0xff]  ;;  %v1970_v31 = vld [vmem:[#allocation33_spill] sm:$0xff] }
  0x74   :  { %v710_v43 = vmax.bf16 %v694_v58, %v1964_v39  ;;  %v711_v56 = vmax.bf16 %v695_v52, %v1965_v14  ;;  %v712_v6 = vmax.bf16 %v696_v11, %v1966_v63  ;;  %v713_v44 = vmax.bf16 %v697_v46, %v70_v25  ;;  %v1972_v58 = vld [vmem:[#allocation35_spill] sm:$0xff]  ;;  %v1974_v11 = vld [vmem:[#allocation37_spill] sm:$0xff]  ;;  %v1975_v25 = vld [vmem:[#allocation38_spill] sm:$0xff] }
  0x75   :  { %v715_v40 = vshrl.u32 %v33_v23, 16  ;;  %v718_v27 = vshll.u32 %v33_v23, 16  ;;  %v724_v36 = vshll.u32 %v34_v54, 16  ;;  %v729_v17 = vshrl.u32 %v51_v0, 16  ;;  %v1971_v23 = vld [vmem:[#allocation34_spill] sm:$0xff]  ;;  %v1977_v33 = vld [vmem:[#allocation40_spill] sm:$0xff] }
  0x76   :  { %v732_v16 = vshll.u32 %v51_v0, 16  ;;  %v738_v15 = vshll.u32 %v52_v1, 16  ;;  %v744_v10 = vmax.bf16 %v698_v30, %v1967_v37  ;;  %v745_v22 = vmax.bf16 %v699_v48, %v1968_v24  ;;  %v1976_v30 = vld [vmem:[#allocation39_spill] sm:$0xff] }
  0x77   :  { %v717_v3 = vrot.slane %v715_v40, 4  ;;  %v720_v47 = vrot.slane %v718_v27, 5  ;;  %v726_v59 = vrot.slane %v724_v36, 5  ;;  %v731_v53 = vrot.slane %v729_v17, 4 }
  0x78   :  { %v734_v4 = vrot.slane %v732_v16, 5  ;;  %v740_v18 = vrot.slane %v738_v15, 5  ;;  %v746_v62 = vmax.bf16 %v700_v5, %v1969_v8  ;;  %v747_v13 = vmax.bf16 %v701_v60, %v1970_v31  ;;  %v1978_v5 = vld [vmem:[#allocation41_spill] sm:$0xff]  ;;  %v1979_v60 = vld [vmem:[#allocation42_spill] sm:$0xff] }
  0x79   :  { %v721_v38 = vor.u32 %v720_v47, %v717_v3  ;;  %v748_v12 = vmax.bf16 %v702_v26, %v1971_v23  ;;  %v749_v0 = vmax.bf16 %v703_v9, %v1972_v58  ;;  %v750_v52 = vmax.bf16 %v704_v2, %v1973_v35  ;;  %v1980_v26 = vld [vmem:[#allocation43_spill] sm:$0xff] }
  0x7a   :  { %v735_v41 = vor.u32 %v734_v4, %v731_v53  ;;  %v752_v46 = vmax.bf16 %v706_v49, %v1974_v11  ;;  %v753_v61 = vmax.bf16 %v707_v21, %v1975_v25  ;;  %v754_v51 = vmax.bf16 %v708_v19, %v1976_v30 }
  0x7b   :  { %v722_v48 = vrot.slane %v721_v38, 4  ;;  %v755_v7 = vmax.bf16 %v709_v55, %v1977_v33  ;;  %v756_v54 = vmax.bf16 %v710_v43, %v1978_v5  ;;  %v757_v45 = vmax.bf16 %v711_v56, %v1979_v60 }
  0x7c   :  { %v736_v29 = vrot.slane %v735_v41, 4  ;;  %v758_v42 = vmax.bf16 %v712_v6, %v1980_v26  ;;  %v820_v9 = vcombine.low %v744_v10, %v745_v22  ;;  %v821_v1 = vcombine.low %v746_v62, %v747_v13 }
  0x7d   :  { %v727_v2 = vsel %vm1079_vm2, %v722_v48, %v726_v59  ;;  %v823_v34 = vcombine.low %v748_v12, %v749_v0  ;;  %v827_v49 = vcombine.low %v752_v46, %v753_v61  ;;  %v829_v32 = vcombine.low %v754_v51, %v755_v7 }
  0x7e   :  { %v741_v21 = vsel %vm1079_vm2, %v736_v29, %v740_v18  ;;  %v751_v28 = vmax.bf16 %v727_v2, %v705_v57  ;;  %784 = vst [vmem:[%s1808_s4] sm:$0xff] %v820_v9   ;;  %822 = vst [vmem:[%s1808_s4 + $0x8] sm:$0xff] %v821_v1   ;;  %v831_v19 = vcombine.low %v756_v54, %v757_v45 }
  0x7f   :  { %v759_v20 = vmax.bf16 %v741_v21, %v713_v44  ;;  %824 = vst [vmem:[%s1808_s4 + $0x10] sm:$0xff] %v823_v34   ;;  %828 = vst [vmem:[%s1808_s4 + $0x20] sm:$0xff] %v827_v49  }
  0x80   :  { %830 = vst [vmem:[%s1808_s4 + $0x28] sm:$0xff] %v829_v32   ;;  %v825_v50 = vcombine.low %v750_v52, %v751_v28  ;;  %832 = vst [vmem:[%s1808_s4 + $0x30] sm:$0xff] %v831_v19  }
  0x81   :  { %v833_v57 = vcombine.low %v758_v42, %v759_v20 }
  0x82   :  { %826 = vst [vmem:[%s1808_s4 + $0x18] sm:$0xff] %v825_v50  }
  0x83   :  { %834 = vst [vmem:[%s1808_s4 + $0x38] sm:$0xff] %v833_v57  }

// kernel: _lambda_.16
= control target key start
LH: loop header
LB: loop body
LE: loop exit
PB: predicated region body
PF: predicated region fallthrough
CT: control target
= control target key end

     0   :  { %s1180_s1 = inlined_call_operand.vmem [shape: bf16[128,128], index: 1, kind: input, shape index: {}]   ;;  %s1181_s5 = inlined_call_operand.vmem [shape: bf16[128,128], index: 5, kind: input, shape index: {}]   ;;  %s1182_s0 = inlined_call_operand.vmem [shape: bf16[128,128], index: 0, kind: input, shape index: {}]   ;;  %s1183_s4 = inlined_call_operand.vmem [shape: bf16[128,128], index: 4, kind: input, shape index: {}]   ;;  %s1184_s2 = inlined_call_operand.vmem [shape: f32[1,128], index: 2, kind: input, shape index: {}, may-alias: {2,6}]   ;;  %s1185_s6 = inlined_call_operand.vmem [shape: f32[1,128], index: 6, kind: input, shape index: {}, may-alias: {2,6}]   ;;  %s1186_s3 = inlined_call_operand.vmem [shape: f32[1,128], index: 3, kind: input, shape index: {}]   ;;  %s1187_s7 = inlined_call_operand.vmem [shape: f32[1,128], index: 7, kind: input, shape index: {}]   ;;  %s1188_s8 = inlined_call_operand.vmem [shape: bf16[128,128], index: 8, kind: output, shape index: {}]  }
   0x1   :  { %v899_v0 = vld [vmem:[%s1180_s1 + $0x38] sm:$0xff]   ;;  %v901_v2 = vld [vmem:[%s1180_s1 + $0x30] sm:$0xff]   ;;  %v903_v4 = vld [vmem:[%s1180_s1 + $0x28] sm:$0xff]  }
   0x2   :  { %v900_v1 = vld [vmem:[%s1181_s5 + $0x38] sm:$0xff]   ;;  %835 = vmatprep.subr.bf16.mxu0 %v899_v0  ;;  %v902_v3 = vld [vmem:[%s1181_s5 + $0x30] sm:$0xff]   ;;  %v904_v5 = vld [vmem:[%s1181_s5 + $0x28] sm:$0xff]  }
   0x3   :  { %867 = vmatprep.subr.bf16.mxu1 %v900_v1  ;;  %836 = vmatpush3.bf16.msra.mxu0 %v899_v0  ;;  %v905_v6 = vld [vmem:[%s1180_s1 + $0x20] sm:$0xff]   ;;  %v907_v8 = vld [vmem:[%s1180_s1 + $0x18] sm:$0xff]   ;;  %v909_v10 = vld [vmem:[%s1180_s1 + $0x10] sm:$0xff]  }
   0x4   :  { %868 = vmatpush3.bf16.msra.mxu1 %v900_v1  ;;  %837 = vmatprep.subr.bf16.mxu0 %v901_v2  ;;  %v906_v7 = vld [vmem:[%s1181_s5 + $0x20] sm:$0xff]   ;;  %v908_v9 = vld [vmem:[%s1181_s5 + $0x18] sm:$0xff]   ;;  %v910_v11 = vld [vmem:[%s1181_s5 + $0x10] sm:$0xff]  }
   0x5   :  { %869 = vmatprep.subr.bf16.mxu1 %v902_v3  ;;  %v915_v12 = vld [vmem:[%s1182_s0] sm:$0xff]   ;;  %v911_v14 = vld [vmem:[%s1180_s1 + $0x8] sm:$0xff]   ;;  %v919_v20 = vld [vmem:[%s1182_s0 + $0x10] sm:$0xff]  }
   0x6   :  { %v916_v13 = vld [vmem:[%s1183_s4] sm:$0xff]   ;;  %851 = vmatprep.mubr.bf16.mxu0 %v915_v12  ;;  %v912_v15 = vld [vmem:[%s1181_s5 + $0x8] sm:$0xff]   ;;  %v920_v21 = vld [vmem:[%s1183_s4 + $0x10] sm:$0xff]  }
   0x7   :  { %838 = vmatpush3.bf16.msra.mxu0 %v901_v2  ;;  %883 = vmatprep.mubr.bf16.mxu1 %v916_v13  ;;  %v913_v16 = vld [vmem:[%s1180_s1] sm:$0xff]   ;;  %v917_v18 = vld [vmem:[%s1182_s0 + $0x8] sm:$0xff]   ;;  %v921_v22 = vld [vmem:[%s1182_s0 + $0x18] sm:$0xff]  }
   0x8   :  { %870 = vmatpush3.bf16.msra.mxu1 %v902_v3  ;;  %839 = vmatprep.subr.bf16.mxu0 %v903_v4  ;;  %v914_v17 = vld [vmem:[%s1181_s5] sm:$0xff]   ;;  %v918_v19 = vld [vmem:[%s1183_s4 + $0x8] sm:$0xff]   ;;  %v922_v23 = vld [vmem:[%s1183_s4 + $0x18] sm:$0xff]  }
   0x9   :  { %871 = vmatprep.subr.bf16.mxu1 %v904_v5  ;;  %v923_v24 = vld [vmem:[%s1182_s0 + $0x20] sm:$0xff]   ;;  %v925_v26 = vld [vmem:[%s1182_s0 + $0x28] sm:$0xff]   ;;  %v927_v28 = vld [vmem:[%s1182_s0 + $0x30] sm:$0xff]  }
   0xa   :  { %v924_v25 = vld [vmem:[%s1183_s4 + $0x20] sm:$0xff]   ;;  %v926_v27 = vld [vmem:[%s1183_s4 + $0x28] sm:$0xff]   ;;  %v928_v29 = vld [vmem:[%s1183_s4 + $0x30] sm:$0xff]  }
   0xb   :  { %840 = vmatpush3.bf16.msra.mxu0 %v903_v4  ;;  %v929_v30 = vld [vmem:[%s1182_s0 + $0x38] sm:$0xff]   ;;  %v1075_v32 = vld [vmem:[%s1184_s2] ss:$0 sm:$0xff] }
   0xc   :  { %872 = vmatpush3.bf16.msra.mxu1 %v904_v5  ;;  %841 = vmatprep.subr.bf16.mxu0 %v905_v6  ;;  %v930_v31 = vld [vmem:[%s1183_s4 + $0x38] sm:$0xff]   ;;  %v1080_v33 = vld [vmem:[%s1185_s6] ss:$0 sm:$0xff] }
   0xd   :  { %873 = vmatprep.subr.bf16.mxu1 %v906_v7  ;;  %v1085_v35 = vld [vmem:[%s1186_s3] ss:$0 sm:$0xff] }
   0xe   :  { %v1091_v38 = vld [vmem:[%s1187_s7] ss:$0 sm:$0xff] }
   0xf   :  { %842 = vmatpush3.bf16.msra.mxu0 %v905_v6 }
  0x10   :  { %874 = vmatpush3.bf16.msra.mxu1 %v906_v7  ;;  %843 = vmatprep.subr.bf16.mxu0 %v907_v8 }
  0x11   :  { %875 = vmatprep.subr.bf16.mxu1 %v908_v9 }
  0x13   :  { %844 = vmatpush3.bf16.msra.mxu0 %v907_v8 }
  0x14   :  { %876 = vmatpush3.bf16.msra.mxu1 %v908_v9  ;;  %845 = vmatprep.subr.bf16.mxu0 %v909_v10 }
  0x15   :  { %877 = vmatprep.subr.bf16.mxu1 %v910_v11 }
  0x17   :  { %846 = vmatpush3.bf16.msra.mxu0 %v909_v10 }
  0x18   :  { %878 = vmatpush3.bf16.msra.mxu1 %v910_v11  ;;  %847 = vmatprep.subr.bf16.mxu0 %v911_v14 }
  0x19   :  { %879 = vmatprep.subr.bf16.mxu1 %v912_v15 }
  0x1b   :  { %848 = vmatpush3.bf16.msra.mxu0 %v911_v14 }
  0x1c   :  { %880 = vmatpush3.bf16.msra.mxu1 %v912_v15  ;;  %849 = vmatprep.subr.bf16.mxu0 %v913_v16 }
  0x1d   :  { %881 = vmatprep.subr.bf16.mxu1 %v914_v17 }
  0x1f   :  { %850 = vmatpush3.bf16.msra.mxu0 %v913_v16 }
  0x20   :  { %882 = vmatpush3.bf16.msra.mxu1 %v914_v17 }
  0x22   :  { %852 = vmatmul.mubr.bf16.vlgmr.msra.gmra.mxu0 %v917_v18 }
  0x23   :  { %884 = vmatmul.mubr.bf16.vlgmr.msra.gmra.mxu1 %v918_v19  ;;  %855 = vmatprep.mubr.bf16.mxu0 %v919_v20 }
  0x24   :  { %887 = vmatprep.mubr.bf16.mxu1 %v920_v21 }
  0x2a   :  { %856 = vmatmul.mubr.bf16.gmra.mxu0 %v921_v22 }
  0x2b   :  { %888 = vmatmul.mubr.bf16.gmra.mxu1 %v922_v23  ;;  %859 = vmatprep.mubr.bf16.mxu0 %v923_v24 }
  0x2c   :  { %891 = vmatprep.mubr.bf16.mxu1 %v924_v25 }
  0x32   :  { %860 = vmatmul.mubr.bf16.gmra.mxu0 %v925_v26 }
  0x33   :  { %892 = vmatmul.mubr.bf16.gmra.mxu1 %v926_v27  ;;  %863 = vmatprep.mubr.bf16.mxu0 %v927_v28 }
  0x34   :  { %895 = vmatprep.mubr.bf16.mxu1 %v928_v29 }
  0x3a   :  { %864 = vmatmul.mubr.bf16.gmra.mxu0 %v929_v30 }
  0x3b   :  { %896 = vmatmul.mubr.bf16.gmra.mxu1 %v930_v31 }
  0xe2   :  { %v853_v34 = vpop.f32.mrf.mxu0 }
  0xe3   :  { %v264_v36 = vmul.f32 %v853_v34, %v1075_v32  ;;  %v885_v37 = vpop.f32.mrf.mxu1 }
  0xe4   :  { %v535_v39 = vmul.f32 %v885_v37, %v1080_v33  ;;  %v192_v40 = vpop.f32.mrf.mxu0 }
  0xe5   :  { %v287_v41 = vadd.f32 %v1085_v35, %v264_v36  ;;  %v262_v42 = vmul.f32 %v1075_v32, %v192_v40  ;;  %v463_v43 = vpop.f32.mrf.mxu1 }
  0xe6   :  { %v558_v44 = vadd.f32 %v1091_v38, %v535_v39  ;;  %v533_v45 = vmul.f32 %v1080_v33, %v463_v43  ;;  %v854_v46 = vpop.f32.mrf.mxu0 }
  0xe7   :  { %v265_v47 = vmul.f32 %v854_v46, %v1075_v32  ;;  %v886_v48 = vpop.f32.mrf.mxu1  ;;  %v285_v49 = vadd.f32 %v1085_v35, %v262_v42 }
  0xe8   :  { %v556_v50 = vadd.f32 %v1091_v38, %v533_v45  ;;  %v536_v51 = vmul.f32 %v886_v48, %v1080_v33  ;;  %v195_v52 = vpop.f32.mrf.mxu0  ;;  %v574_v53 = vadd.f32 %v558_v44, %v287_v41 }
  0xe9   :  { %v288_v54 = vadd.f32 %v1085_v35, %v265_v47  ;;  %v263_v55 = vmul.f32 %v1075_v32, %v195_v52  ;;  %v466_v56 = vpop.f32.mrf.mxu1 }
  0xea   :  { %v559_v57 = vadd.f32 %v1091_v38, %v536_v51  ;;  %v534_v58 = vmul.f32 %v1080_v33, %v466_v56  ;;  %v857_v59 = vpop.f32.mrf.mxu0  ;;  %v572_v63 = vadd.f32 %v556_v50, %v285_v49  ;;  %v590_v4 = vmax.f32 %v574_v53, 0.0 }
  0xeb   :  { %v286_v60 = vadd.f32 %v1085_v35, %v263_v55  ;;  %v268_v61 = vmul.f32 %v857_v59, %v1075_v32  ;;  %v889_v62 = vpop.f32.mrf.mxu1 }
  0xec   :  { %v575_v0 = vadd.f32 %v559_v57, %v288_v54  ;;  %v557_v1 = vadd.f32 %v1091_v38, %v534_v58  ;;  %v539_v2 = vmul.f32 %v889_v62, %v1080_v33  ;;  %v208_v3 = vpop.f32.mrf.mxu0  ;;  %v588_v16 = vmax.f32 %v572_v63, 0.0 }
  0xed   :  { %v291_v5 = vadd.f32 %v1085_v35, %v268_v61  ;;  %v266_v6 = vmul.f32 %v1075_v32, %v208_v3  ;;  %v479_v7 = vpop.f32.mrf.mxu1 }
  0xee   :  { %v591_v8 = vmax.f32 %v575_v0, 0.0  ;;  %v573_v9 = vadd.f32 %v557_v1, %v286_v60  ;;  %v562_v10 = vadd.f32 %v1091_v38, %v539_v2  ;;  %v537_v11 = vmul.f32 %v1080_v33, %v479_v7  ;;  %v858_v12 = vpop.f32.mrf.mxu0 }
  0xef   :  { %v289_v13 = vadd.f32 %v1085_v35, %v266_v6  ;;  %v269_v14 = vmul.f32 %v858_v12, %v1075_v32  ;;  %v890_v15 = vpop.f32.mrf.mxu1 }
  0xf0   :  { %v764_v17 = vpack.c.bf16 %v591_v8, %v590_v4  ;;  %v589_v18 = vmax.f32 %v573_v9, 0.0  ;;  %v560_v19 = vadd.f32 %v1091_v38, %v537_v11  ;;  %v211_v20 = vpop.f32.mrf.mxu0  ;;  %v540_v22 = vmul.f32 %v890_v15, %v1080_v33 }
  0xf1   :  { %v292_v21 = vadd.f32 %v1085_v35, %v269_v14  ;;  %v267_v23 = vmul.f32 %v1075_v32, %v211_v20  ;;  %v482_v24 = vpop.f32.mrf.mxu1  ;;  %v578_v26 = vadd.f32 %v562_v10, %v291_v5 }
  0xf2   :  { %796 = vst [vmem:[%s1188_s8 + $0x8] sm:$0xff] %v764_v17   ;;  %v759_v25 = vpack.c.bf16 %v589_v18, %v588_v16  ;;  %v538_v27 = vmul.f32 %v1080_v33, %v482_v24  ;;  %v861_v28 = vpop.f32.mrf.mxu0  ;;  %v576_v29 = vadd.f32 %v560_v19, %v289_v13  ;;  %v563_v30 = vadd.f32 %v1091_v38, %v540_v22 }
  0xf3   :  { %v290_v31 = vadd.f32 %v1085_v35, %v267_v23  ;;  %v272_v34 = vmul.f32 %v861_v28, %v1075_v32  ;;  %v893_v36 = vpop.f32.mrf.mxu1  ;;  %v594_v49 = vmax.f32 %v578_v26, 0.0 }
  0xf4   :  { %760 = vst [vmem:[%s1188_s8] sm:$0xff] %v759_v25   ;;  %v561_v37 = vadd.f32 %v1091_v38, %v538_v27  ;;  %v543_v39 = vmul.f32 %v893_v36, %v1080_v33  ;;  %v224_v40 = vpop.f32.mrf.mxu0  ;;  %v579_v41 = vadd.f32 %v563_v30, %v292_v21  ;;  %v592_v50 = vmax.f32 %v576_v29, 0.0 }
  0xf5   :  { %v295_v42 = vadd.f32 %v1085_v35, %v272_v34  ;;  %v270_v43 = vmul.f32 %v1075_v32, %v224_v40  ;;  %v495_v44 = vpop.f32.mrf.mxu1 }
  0xf6   :  { %v577_v45 = vadd.f32 %v561_v37, %v290_v31  ;;  %v566_v46 = vadd.f32 %v1091_v38, %v543_v39  ;;  %v541_v47 = vmul.f32 %v1080_v33, %v495_v44  ;;  %v862_v48 = vpop.f32.mrf.mxu0  ;;  %v595_v51 = vmax.f32 %v579_v41, 0.0 }
  0xf7   :  { %v273_v52 = vmul.f32 %v862_v48, %v1075_v32  ;;  %v894_v53 = vpop.f32.mrf.mxu1  ;;  %v293_v56 = vadd.f32 %v1085_v35, %v270_v43 }
  0xf8   :  { %v593_v54 = vmax.f32 %v577_v45, 0.0  ;;  %v582_v55 = vadd.f32 %v566_v46, %v295_v42  ;;  %v544_v57 = vmul.f32 %v894_v53, %v1080_v33  ;;  %v227_v58 = vpop.f32.mrf.mxu0  ;;  %v774_v59 = vpack.c.bf16 %v595_v51, %v594_v49 }
  0xf9   :  { %v564_v60 = vadd.f32 %v1091_v38, %v541_v47  ;;  %v296_v61 = vadd.f32 %v1085_v35, %v273_v52  ;;  %v271_v62 = vmul.f32 %v1075_v32, %v227_v58  ;;  %v498_v63 = vpop.f32.mrf.mxu1 }
  0xfa   :  { %v769_v0 = vpack.c.bf16 %v593_v54, %v592_v50  ;;  %v567_v1 = vadd.f32 %v1091_v38, %v544_v57  ;;  %v865_v2 = vpop.f32.mrf.mxu0  ;;  %798 = vst [vmem:[%s1188_s8 + $0x18] sm:$0xff] %v774_v59   ;;  %v542_v4 = vmul.f32 %v1080_v33, %v498_v63  ;;  %v598_v10 = vmax.f32 %v582_v55, 0.0 }
  0xfb   :  { %v294_v3 = vadd.f32 %v1085_v35, %v271_v62  ;;  %v276_v5 = vmul.f32 %v865_v2, %v1075_v32  ;;  %v897_v6 = vpop.f32.mrf.mxu1  ;;  %v580_v11 = vadd.f32 %v564_v60, %v293_v56 }
  0xfc   :  { %797 = vst [vmem:[%s1188_s8 + $0x10] sm:$0xff] %v769_v0   ;;  %v583_v7 = vadd.f32 %v567_v1, %v296_v61  ;;  %v547_v8 = vmul.f32 %v897_v6, %v1080_v33  ;;  %v240_v9 = vpop.f32.mrf.mxu0  ;;  %v565_v12 = vadd.f32 %v1091_v38, %v542_v4 }
  0xfd   :  { %v274_v13 = vmul.f32 %v1075_v32, %v240_v9  ;;  %v511_v14 = vpop.f32.mrf.mxu1  ;;  %v299_v16 = vadd.f32 %v1085_v35, %v276_v5  ;;  %v596_v28 = vmax.f32 %v580_v11, 0.0 }
  0xfe   :  { %v599_v15 = vmax.f32 %v583_v7, 0.0  ;;  %v570_v17 = vadd.f32 %v1091_v38, %v547_v8  ;;  %v545_v18 = vmul.f32 %v1080_v33, %v511_v14  ;;  %v866_v19 = vpop.f32.mrf.mxu0  ;;  %v581_v20 = vadd.f32 %v565_v12, %v294_v3 }
  0xff   :  { %v277_v21 = vmul.f32 %v866_v19, %v1075_v32  ;;  %v898_v22 = vpop.f32.mrf.mxu1  ;;  %v297_v24 = vadd.f32 %v1085_v35, %v274_v13 }
 0x100   :  { %v784_v23 = vpack.c.bf16 %v599_v15, %v598_v10  ;;  %v568_v25 = vadd.f32 %v1091_v38, %v545_v18  ;;  %v548_v26 = vmul.f32 %v898_v22, %v1080_v33  ;;  %v243_v27 = vpop.f32.mrf.mxu0  ;;  %v597_v29 = vmax.f32 %v581_v20, 0.0 }
 0x101   :  { %v300_v30 = vadd.f32 %v1085_v35, %v277_v21  ;;  %v275_v31 = vmul.f32 %v1075_v32, %v243_v27  ;;  %v514_v34 = vpop.f32.mrf.mxu1  ;;  %v586_v36 = vadd.f32 %v570_v17, %v299_v16 }
 0x102   :  { %800 = vst [vmem:[%s1188_s8 + $0x28] sm:$0xff] %v784_v23   ;;  %v571_v37 = vadd.f32 %v1091_v38, %v548_v26  ;;  %v546_v39 = vmul.f32 %v1080_v33, %v514_v34  ;;  %v779_v40 = vpack.c.bf16 %v597_v29, %v596_v28  ;;  %v584_v42 = vadd.f32 %v568_v25, %v297_v24 }
 0x103   :  { %v298_v41 = vadd.f32 %v1085_v35, %v275_v31  ;;  %v602_v32 = vmax.f32 %v586_v36, 0.0 }
 0x104   :  { %v587_v43 = vadd.f32 %v571_v37, %v300_v30  ;;  %v569_v44 = vadd.f32 %v1091_v38, %v546_v39  ;;  %799 = vst [vmem:[%s1188_s8 + $0x20] sm:$0xff] %v779_v40   ;;  %v600_v47 = vmax.f32 %v584_v42, 0.0 }
 0x106   :  { %v603_v45 = vmax.f32 %v587_v43, 0.0  ;;  %v585_v46 = vadd.f32 %v569_v44, %v298_v41 }
 0x108   :  { %v794_v48 = vpack.c.bf16 %v603_v45, %v602_v32  ;;  %v601_v49 = vmax.f32 %v585_v46, 0.0 }
 0x10a   :  { %802 = vst [vmem:[%s1188_s8 + $0x38] sm:$0xff] %v794_v48   ;;  %v789_v33 = vpack.c.bf16 %v601_v49, %v600_v47 }
 0x10c   :  { %801 = vst [vmem:[%s1188_s8 + $0x30] sm:$0xff] %v789_v33  }

// kernel: _lambda_.15
= control target key start
LH: loop header
LB: loop body
LE: loop exit
PB: predicated region body
PF: predicated region fallthrough
CT: control target
= control target key end

     0   :  { %s889_s1 = inlined_call_operand.vmem [shape: bf16[256,128], index: 1, kind: input, shape index: {}]   ;;  %s890_s0 = inlined_call_operand.vmem [shape: bf16[128,256], index: 0, kind: input, shape index: {}]   ;;  %s891_s2 = inlined_call_operand.vmem [shape: f32[1,128], index: 2, kind: input, shape index: {}]   ;;  %s892_s3 = inlined_call_operand.vmem [shape: f32[1,128], index: 3, kind: input, shape index: {}]   ;;  %s893_s4 = inlined_call_operand.vmem [shape: bf16[128,128], index: 4, kind: output, shape index: {}]  }
   0x1   :  { %v662_v0 = vld [vmem:[%s889_s1 + $0x78] sm:$0xff]   ;;  %v664_v2 = vld [vmem:[%s889_s1 + $0x70] sm:$0xff]   ;;  %v666_v4 = vld [vmem:[%s889_s1 + $0x68] sm:$0xff]  }
   0x2   :  { %v663_v1 = vld [vmem:[%s889_s1 + $0x38] sm:$0xff]   ;;  %582 = vmatprep.subr.bf16.mxu0 %v662_v0  ;;  %646 = vmatprep.subr.bf16.mxu1 %v662_v0  ;;  %v665_v3 = vld [vmem:[%s889_s1 + $0x30] sm:$0xff]   ;;  %v667_v5 = vld [vmem:[%s889_s1 + $0x28] sm:$0xff]  }
   0x3   :  { %583 = vmatpush3.bf16.msra.mxu0 %v663_v1  ;;  %654 = vmatpush3.bf16.msra.mxu1 %v663_v1  ;;  %v668_v6 = vld [vmem:[%s889_s1 + $0x60] sm:$0xff]   ;;  %v670_v8 = vld [vmem:[%s889_s1 + $0x58] sm:$0xff]   ;;  %v672_v10 = vld [vmem:[%s889_s1 + $0x50] sm:$0xff]  }
   0x4   :  { %584 = vmatprep.subr.bf16.mxu0 %v664_v2  ;;  %647 = vmatprep.subr.bf16.mxu1 %v664_v2  ;;  %v669_v7 = vld [vmem:[%s889_s1 + $0x20] sm:$0xff]   ;;  %v671_v9 = vld [vmem:[%s889_s1 + $0x18] sm:$0xff]   ;;  %v673_v13 = vld [vmem:[%s889_s1 + $0x10] sm:$0xff]  }
   0x5   :  { %v680_v11 = vld [vmem:[%s890_s0 + $0x4] ss:$8 sps:$4 sm:$0xff]   ;;  %v678_v18 = vld [vmem:[%s890_s0] ss:$8 sps:$4 sm:$0xff]   ;;  %v684_v20 = vld [vmem:[%s890_s0 + $0x14] ss:$8 sps:$4 sm:$0xff]  }
   0x6   :  { %v683_v12 = vld [vmem:[%s890_s0 + $0x44] ss:$8 sps:$4 sm:$0xff]   ;;  %274 = vmatprep.mubr.bf16.mxu0 %v680_v11  ;;  %v681_v19 = vld [vmem:[%s890_s0 + $0x40] ss:$8 sps:$4 sm:$0xff]   ;;  %v686_v21 = vld [vmem:[%s890_s0 + $0x54] ss:$8 sps:$4 sm:$0xff]  }
   0x7   :  { %585 = vmatpush3.bf16.msra.mxu0 %v665_v3  ;;  %655 = vmatpush3.bf16.msra.mxu1 %v665_v3  ;;  %v674_v14 = vld [vmem:[%s889_s1 + $0x48] sm:$0xff]   ;;  %v676_v16 = vld [vmem:[%s889_s1 + $0x40] sm:$0xff]   ;;  %v688_v22 = vld [vmem:[%s890_s0 + $0x10] ss:$8 sps:$4 sm:$0xff]  }
   0x8   :  { %586 = vmatprep.subr.bf16.mxu0 %v666_v4  ;;  %648 = vmatprep.subr.bf16.mxu1 %v666_v4  ;;  %v675_v15 = vld [vmem:[%s889_s1 + $0x8] sm:$0xff]   ;;  %v677_v17 = vld [vmem:[%s889_s1] sm:$0xff]   ;;  %v689_v23 = vld [vmem:[%s890_s0 + $0x50] ss:$8 sps:$4 sm:$0xff]  }
   0x9   :  { %306 = vmatprep.mubr.bf16.mxu1 %v683_v12  ;;  %v690_v24 = vld [vmem:[%s890_s0 + $0x24] ss:$8 sps:$4 sm:$0xff]   ;;  %v694_v26 = vld [vmem:[%s890_s0 + $0x20] ss:$8 sps:$4 sm:$0xff]   ;;  %v696_v28 = vld [vmem:[%s890_s0 + $0x34] ss:$8 sps:$4 sm:$0xff]  }
   0xa   :  { %v692_v25 = vld [vmem:[%s890_s0 + $0x64] ss:$8 sps:$4 sm:$0xff]   ;;  %v695_v27 = vld [vmem:[%s890_s0 + $0x60] ss:$8 sps:$4 sm:$0xff]   ;;  %v698_v29 = vld [vmem:[%s890_s0 + $0x74] ss:$8 sps:$4 sm:$0xff]  }
   0xb   :  { %587 = vmatpush3.bf16.msra.mxu0 %v667_v5  ;;  %656 = vmatpush3.bf16.msra.mxu1 %v667_v5  ;;  %v700_v30 = vld [vmem:[%s890_s0 + $0x30] ss:$8 sps:$4 sm:$0xff]   ;;  %v826_v37 = vld [vmem:[%s891_s2] ss:$0 sm:$0xff] }
   0xc   :  { %588 = vmatprep.subr.bf16.mxu0 %v668_v6  ;;  %649 = vmatprep.subr.bf16.mxu1 %v668_v6  ;;  %v701_v31 = vld [vmem:[%s890_s0 + $0x70] ss:$8 sps:$4 sm:$0xff]   ;;  %v833_v45 = vld [vmem:[%s892_s3] ss:$0 sm:$0xff] }
   0xf   :  { %589 = vmatpush3.bf16.msra.mxu0 %v669_v7  ;;  %657 = vmatpush3.bf16.msra.mxu1 %v669_v7 }
  0x10   :  { %590 = vmatprep.subr.bf16.mxu0 %v670_v8  ;;  %650 = vmatprep.subr.bf16.mxu1 %v670_v8 }
  0x13   :  { %591 = vmatpush3.bf16.msra.mxu0 %v671_v9  ;;  %658 = vmatpush3.bf16.msra.mxu1 %v671_v9 }
  0x14   :  { %592 = vmatprep.subr.bf16.mxu0 %v672_v10  ;;  %651 = vmatprep.subr.bf16.mxu1 %v672_v10 }
  0x17   :  { %593 = vmatpush3.bf16.msra.mxu0 %v673_v13  ;;  %659 = vmatpush3.bf16.msra.mxu1 %v673_v13 }
  0x18   :  { %594 = vmatprep.subr.bf16.mxu0 %v674_v14  ;;  %652 = vmatprep.subr.bf16.mxu1 %v674_v14 }
  0x1b   :  { %595 = vmatpush3.bf16.msra.mxu0 %v675_v15  ;;  %660 = vmatpush3.bf16.msra.mxu1 %v675_v15 }
  0x1c   :  { %596 = vmatprep.subr.bf16.mxu0 %v676_v16  ;;  %653 = vmatprep.subr.bf16.mxu1 %v676_v16 }
  0x1f   :  { %597 = vmatpush3.bf16.msra.mxu0 %v677_v17  ;;  %661 = vmatpush3.bf16.msra.mxu1 %v677_v17 }
  0x22   :  { %275 = vmatmul.mubr.bf16.vlgmr.msra.gmra.mxu0 %v678_v18  ;;  %307 = vmatmul.mubr.bf16.vlgmr.msra.gmra.mxu1 %v681_v19 }
  0x23   :  { %282 = vmatprep.mubr.bf16.mxu0 %v684_v20  ;;  %314 = vmatprep.mubr.bf16.mxu1 %v686_v21 }
  0x2a   :  { %283 = vmatmul.mubr.bf16.gmra.mxu0 %v688_v22  ;;  %315 = vmatmul.mubr.bf16.gmra.mxu1 %v689_v23 }
  0x2b   :  { %290 = vmatprep.mubr.bf16.mxu0 %v690_v24  ;;  %322 = vmatprep.mubr.bf16.mxu1 %v692_v25 }
  0x32   :  { %291 = vmatmul.mubr.bf16.gmra.mxu0 %v694_v26  ;;  %323 = vmatmul.mubr.bf16.gmra.mxu1 %v695_v27 }
  0x33   :  { %298 = vmatprep.mubr.bf16.mxu0 %v696_v28  ;;  %330 = vmatprep.mubr.bf16.mxu1 %v698_v29 }
  0x3a   :  { %299 = vmatmul.mubr.bf16.gmra.mxu0 %v700_v30  ;;  %331 = vmatmul.mubr.bf16.gmra.mxu1 %v701_v31 }
  0xe2   :  { %v598_v32 = vpop.f32.mrf.mxu0  ;;  %v622_v33 = vpop.f32.mrf.mxu1 }
  0xe4   :  { %v599_v34 = vpop.f32.mrf.mxu0  ;;  %v623_v35 = vpop.f32.mrf.mxu1 }
  0xe5   :  { %v600_v36 = vadd.f32 %v599_v34, %v598_v32  ;;  %v624_v38 = vadd.f32 %v623_v35, %v622_v33 }
  0xe6   :  { %v601_v39 = vpop.f32.mrf.mxu0  ;;  %v625_v40 = vpop.f32.mrf.mxu1 }
  0xe7   :  { %v346_v41 = vmul.f32 %v600_v36, %v826_v37  ;;  %v354_v42 = vmul.f32 %v624_v38, %v826_v37 }
  0xe8   :  { %v602_v43 = vpop.f32.mrf.mxu0  ;;  %v626_v44 = vpop.f32.mrf.mxu1 }
  0xe9   :  { %v603_v46 = vadd.f32 %v602_v43, %v601_v39  ;;  %v627_v47 = vadd.f32 %v626_v44, %v625_v40  ;;  %v369_v52 = vadd.f32 %v833_v45, %v346_v41  ;;  %v377_v53 = vadd.f32 %v833_v45, %v354_v42 }
  0xea   :  { %v604_v48 = vpop.f32.mrf.mxu0  ;;  %v628_v49 = vpop.f32.mrf.mxu1 }
  0xeb   :  { %v347_v50 = vmul.f32 %v603_v46, %v826_v37  ;;  %v355_v51 = vmul.f32 %v627_v47, %v826_v37 }
  0xec   :  { %v605_v54 = vpop.f32.mrf.mxu0  ;;  %v629_v55 = vpop.f32.mrf.mxu1 }
  0xed   :  { %v370_v56 = vadd.f32 %v833_v45, %v347_v50  ;;  %v378_v57 = vadd.f32 %v833_v45, %v355_v51  ;;  %v606_v58 = vadd.f32 %v605_v54, %v604_v48  ;;  %v630_v59 = vadd.f32 %v629_v55, %v628_v49 }
  0xee   :  { %v607_v60 = vpop.f32.mrf.mxu0  ;;  %v631_v61 = vpop.f32.mrf.mxu1 }
  0xef   :  { %v538_v62 = vpack.c.bf16 %v370_v56, %v369_v52  ;;  %v558_v63 = vpack.c.bf16 %v378_v57, %v377_v53  ;;  %v348_v0 = vmul.f32 %v606_v58, %v826_v37  ;;  %v356_v1 = vmul.f32 %v630_v59, %v826_v37 }
  0xf0   :  { %v608_v2 = vpop.f32.mrf.mxu0  ;;  %v632_v3 = vpop.f32.mrf.mxu1 }
  0xf1   :  { %539 = vst [vmem:[%s893_s4] sm:$0xff] %v538_v62   ;;  %578 = vst [vmem:[%s893_s4 + $0x20] sm:$0xff] %v558_v63   ;;  %v609_v4 = vadd.f32 %v608_v2, %v607_v60  ;;  %v633_v5 = vadd.f32 %v632_v3, %v631_v61  ;;  %v371_v10 = vadd.f32 %v833_v45, %v348_v0 }
  0xf2   :  { %v610_v6 = vpop.f32.mrf.mxu0  ;;  %v634_v7 = vpop.f32.mrf.mxu1  ;;  %v379_v11 = vadd.f32 %v833_v45, %v356_v1 }
  0xf3   :  { %v349_v8 = vmul.f32 %v609_v4, %v826_v37  ;;  %v357_v9 = vmul.f32 %v633_v5, %v826_v37 }
  0xf4   :  { %v611_v12 = vpop.f32.mrf.mxu0  ;;  %v635_v13 = vpop.f32.mrf.mxu1 }
  0xf5   :  { %v372_v14 = vadd.f32 %v833_v45, %v349_v8  ;;  %v380_v15 = vadd.f32 %v833_v45, %v357_v9  ;;  %v612_v16 = vadd.f32 %v611_v12, %v610_v6  ;;  %v636_v17 = vadd.f32 %v635_v13, %v634_v7 }
  0xf6   :  { %v613_v18 = vpop.f32.mrf.mxu0  ;;  %v637_v19 = vpop.f32.mrf.mxu1 }
  0xf7   :  { %v543_v20 = vpack.c.bf16 %v372_v14, %v371_v10  ;;  %v563_v21 = vpack.c.bf16 %v380_v15, %v379_v11  ;;  %v350_v22 = vmul.f32 %v612_v16, %v826_v37  ;;  %v358_v23 = vmul.f32 %v636_v17, %v826_v37 }
  0xf8   :  { %v614_v24 = vpop.f32.mrf.mxu0  ;;  %v638_v25 = vpop.f32.mrf.mxu1 }
  0xf9   :  { %575 = vst [vmem:[%s893_s4 + $0x8] sm:$0xff] %v543_v20   ;;  %579 = vst [vmem:[%s893_s4 + $0x28] sm:$0xff] %v563_v21   ;;  %v615_v26 = vadd.f32 %v614_v24, %v613_v18  ;;  %v639_v27 = vadd.f32 %v638_v25, %v637_v19  ;;  %v373_v32 = vadd.f32 %v833_v45, %v350_v22 }
  0xfa   :  { %v616_v28 = vpop.f32.mrf.mxu0  ;;  %v640_v29 = vpop.f32.mrf.mxu1  ;;  %v381_v33 = vadd.f32 %v833_v45, %v358_v23 }
  0xfb   :  { %v351_v30 = vmul.f32 %v615_v26, %v826_v37  ;;  %v359_v31 = vmul.f32 %v639_v27, %v826_v37 }
  0xfc   :  { %v617_v34 = vpop.f32.mrf.mxu0  ;;  %v641_v35 = vpop.f32.mrf.mxu1 }
  0xfd   :  { %v374_v36 = vadd.f32 %v833_v45, %v351_v30  ;;  %v382_v38 = vadd.f32 %v833_v45, %v359_v31  ;;  %v618_v39 = vadd.f32 %v617_v34, %v616_v28  ;;  %v642_v40 = vadd.f32 %v641_v35, %v640_v29 }
  0xfe   :  { %v619_v41 = vpop.f32.mrf.mxu0  ;;  %v643_v42 = vpop.f32.mrf.mxu1 }
  0xff   :  { %v548_v43 = vpack.c.bf16 %v374_v36, %v373_v32  ;;  %v568_v44 = vpack.c.bf16 %v382_v38, %v381_v33  ;;  %v352_v48 = vmul.f32 %v618_v39, %v826_v37  ;;  %v360_v49 = vmul.f32 %v642_v40, %v826_v37 }
 0x100   :  { %v620_v46 = vpop.f32.mrf.mxu0  ;;  %v644_v47 = vpop.f32.mrf.mxu1 }
 0x101   :  { %576 = vst [vmem:[%s893_s4 + $0x10] sm:$0xff] %v548_v43   ;;  %580 = vst [vmem:[%s893_s4 + $0x30] sm:$0xff] %v568_v44   ;;  %v621_v50 = vadd.f32 %v620_v46, %v619_v41  ;;  %v645_v51 = vadd.f32 %v644_v47, %v643_v42  ;;  %v375_v54 = vadd.f32 %v833_v45, %v352_v48 }
 0x102   :  { %v383_v55 = vadd.f32 %v833_v45, %v360_v49 }
 0x103   :  { %v353_v52 = vmul.f32 %v621_v50, %v826_v37  ;;  %v361_v53 = vmul.f32 %v645_v51, %v826_v37 }
 0x105   :  { %v376_v56 = vadd.f32 %v833_v45, %v353_v52  ;;  %v384_v57 = vadd.f32 %v833_v45, %v361_v53 }
 0x107   :  { %v553_v58 = vpack.c.bf16 %v376_v56, %v375_v54  ;;  %v573_v59 = vpack.c.bf16 %v384_v57, %v383_v55 }
 0x109   :  { %577 = vst [vmem:[%s893_s4 + $0x18] sm:$0xff] %v553_v58   ;;  %581 = vst [vmem:[%s893_s4 + $0x38] sm:$0xff] %v573_v59  }

// kernel: _lambda_.20
= control target key start
LH: loop header
LB: loop body
LE: loop exit
PB: predicated region body
PF: predicated region fallthrough
CT: control target
= control target key end

     0   :  { %s331_s1 = inlined_call_operand.vmem [shape: bf16[128,128], index: 1, kind: input, shape index: {}]   ;;  %s332_s0 = inlined_call_operand.vmem [shape: bf16[32,128], index: 0, kind: input, shape index: {}]   ;;  %s333_s2 = inlined_call_operand.vmem [shape: f32[1,128], index: 2, kind: input, shape index: {}]   ;;  %s334_s3 = inlined_call_operand.vmem [shape: f32[1,128], index: 3, kind: input, shape index: {}]   ;;  %s335_s4 = inlined_call_operand.vmem [shape: bf16[32,128], index: 4, kind: output, shape index: {}]  }
   0x1   :  { %v254_v0 = vld [vmem:[%s331_s1 + $0x38] sm:$0xff]   ;;  %v255_v1 = vld [vmem:[%s331_s1 + $0x30] sm:$0xff]   ;;  %v256_v2 = vld [vmem:[%s331_s1 + $0x28] sm:$0xff]  }
   0x2   :  { %234 = vmatprep.subr.bf16.mxu0 %v254_v0  ;;  %v257_v3 = vld [vmem:[%s331_s1 + $0x20] sm:$0xff]   ;;  %v258_v5 = vld [vmem:[%s331_s1 + $0x18] sm:$0xff]   ;;  %v259_v6 = vld [vmem:[%s331_s1 + $0x10] sm:$0xff]  }
   0x3   :  { %235 = vmatpush3.bf16.msra.mxu0 %v254_v0  ;;  %v262_v4 = vld [vmem:[%s332_s0] sm:$0xff]   ;;  %v260_v7 = vld [vmem:[%s331_s1 + $0x8] sm:$0xff]  }
   0x4   :  { %236 = vmatprep.subr.bf16.mxu0 %v255_v1  ;;  %250 = vmatprep.mubr.bf16.mxu0 %v262_v4  ;;  %v261_v8 = vld [vmem:[%s331_s1] sm:$0xff]   ;;  %v263_v9 = vld [vmem:[%s332_s0 + $0x8] sm:$0xff]  }
   0x5   :  { %v203_v11 = vld [vmem:[%s333_s2] ss:$0 sm:$0xff] }
   0x6   :  { %v204_v14 = vld [vmem:[%s334_s3] ss:$0 sm:$0xff] }
   0x7   :  { %237 = vmatpush3.bf16.msra.mxu0 %v255_v1 }
   0x8   :  { %238 = vmatprep.subr.bf16.mxu0 %v256_v2 }
   0xb   :  { %239 = vmatpush3.bf16.msra.mxu0 %v256_v2 }
   0xc   :  { %240 = vmatprep.subr.bf16.mxu0 %v257_v3 }
   0xf   :  { %241 = vmatpush3.bf16.msra.mxu0 %v257_v3 }
  0x10   :  { %242 = vmatprep.subr.bf16.mxu0 %v258_v5 }
  0x13   :  { %243 = vmatpush3.bf16.msra.mxu0 %v258_v5 }
  0x14   :  { %244 = vmatprep.subr.bf16.mxu0 %v259_v6 }
  0x17   :  { %245 = vmatpush3.bf16.msra.mxu0 %v259_v6 }
  0x18   :  { %246 = vmatprep.subr.bf16.mxu0 %v260_v7 }
  0x1b   :  { %247 = vmatpush3.bf16.msra.mxu0 %v260_v7 }
  0x1c   :  { %248 = vmatprep.subr.bf16.mxu0 %v261_v8 }
  0x1f   :  { %249 = vmatpush3.bf16.msra.mxu0 %v261_v8 }
  0x22   :  { %251 = vmatmul.mubr.bf16.vlgmr.msra.gmra.mxu0 %v263_v9 }
  0xe2   :  { %v252_v10 = vpop.f32.mrf.mxu0 }
  0xe3   :  { %v156_v13 = vmul.f32 %v252_v10, %v203_v11 }
  0xe4   :  { %v132_v12 = vpop.f32.mrf.mxu0 }
  0xe5   :  { %v154_v16 = vmul.f32 %v203_v11, %v132_v12  ;;  %v167_v19 = vadd.f32 %v204_v14, %v156_v13 }
  0xe6   :  { %v253_v15 = vpop.f32.mrf.mxu0 }
  0xe7   :  { %v157_v17 = vmul.f32 %v253_v15, %v203_v11  ;;  %v165_v22 = vadd.f32 %v204_v14, %v154_v16 }
  0xe8   :  { %v135_v18 = vpop.f32.mrf.mxu0 }
  0xe9   :  { %v168_v20 = vadd.f32 %v204_v14, %v157_v17  ;;  %v155_v21 = vmul.f32 %v203_v11, %v135_v18 }
  0xeb   :  { %v221_v23 = vpack.c.bf16 %v168_v20, %v167_v19  ;;  %v166_v24 = vadd.f32 %v204_v14, %v155_v21 }
  0xed   :  { %223 = vst [vmem:[%s335_s4 + $0x8] sm:$0xff] %v221_v23   ;;  %v216_v25 = vpack.c.bf16 %v166_v24, %v165_v22 }
  0xef   :  { %217 = vst [vmem:[%s335_s4] sm:$0xff] %v216_v25  }

// kernel: _lambda_.18
= control target key start
LH: loop header
LB: loop body
LE: loop exit
PB: predicated region body
PF: predicated region fallthrough
CT: control target
= control target key end

     0   :  { %s865_s15 = smov 0   ;;  %s867_s16 = smov 0   ;;  %s961_s0 = inlined_call_operand.vmem [shape: bf16[32,384], index: 0, kind: input, shape index: {}]   ;;  %s962_s1 = inlined_call_operand.vmem [shape: bf16[384,128], index: 1, kind: input, shape index: {}]   ;;  %s963_s2 = inlined_call_operand.vmem [shape: f32[1,128], index: 2, kind: input, shape index: {}]   ;;  %s964_s3 = inlined_call_operand.vmem [shape: f32[1,128], index: 3, kind: input, shape index: {}]   ;;  %s965_s4 = inlined_call_operand.vmem [shape: bf16[32,128], index: 4, kind: output, shape index: {}]  }
   0x1   :  { %s869_s17 = smov 0   ;;  %s871_s18 = smov 0  }
   0x2   :  { %s873_s19 = smov 0  }
   0x3 LB: > { %s26_s20 = sadd.s32 1, %s833_s18  ;;  %p49_p1 = scmp.ne.s32.totalorder %s825_s16, %s821_s15  ;;  %s837_s19 = sphi %s873_s19, %s14_s19   ;;  %s833_s18 = sphi %s871_s18, %s969_s18   ;;  %s829_s17 = sphi %s869_s17, %s968_s17   ;;  %s825_s16 = sphi %s867_s16, %s967_s16   ;;  %s821_s15 = sphi %s865_s15, %s966_s15  }
   0x4   : > { %p27_p0 = scmp.ge.s32.totalorder %s26_s20, 3  ;;  %p50_p2 = scmp.eq.s32.totalorder %s837_s19, 0 }
   0x5   : > { %s42_s22 = sadd.s32 1, %s825_s16  ;;  %p674_p5 = scmp.ge.s32.totalorder %s837_s19, 3 }
   0x6   : > { %s971_s20 = smov (%p27_p0, %s26_s20), 0  ;;  %p51_p3 = por %p50_p2, %p49_p1 }
   0x7   : > { %s38_s21 = ssub.s32 %s833_s18, %s971_s20  ;;  %195 = sbr.rel (%p674_p5) target bundleno = 18 (0x12), region = 24 }
   0x8   : > { %p40_p4 = scmp.eq.s32.totalorder %s38_s21, 0 }
   0xa   : > { %s900_s23 = scalar_select %p40_p4, %s825_s16, %s42_s22  }
   0xc   : > { %198 = sbr.rel (!%p51_p3) target bundleno = 18 (0x12), region = 28  ;;  %s200_s24 = sand.u32 (%p51_p3), 1, %s825_s16  }
   0xd   : > { %s676_s25 = sshll.u32 (%p51_p3), %s833_s18, 2  ;;  %s675_s26 = sshll.u32 (%p51_p3), %s200_s24, 4 }
   0xe   : > { %s207_s29 = scalar_lea.vmem (%p51_p3), %s961_s0, %s676_s25  ;;  %s202_s30 = scalar_lea.vmem (%p51_p3), [#allocation3], %s675_s26 }
   0xf   : > { %v224_v0 = vld [vmem:[%s207_s29] sm:$0xf] (%p51_p3)  ;;  %v226_v1 = vld [vmem:[%s207_s29 + $0xc] sm:$0xf] (%p51_p3)  ;;  %v228_v2 = vld [vmem:[%s207_s29 + $0x18] sm:$0xf] (%p51_p3) }
  0x10   : > { %225 = vst [vmem:[%s202_s30] sm:$0xf] (%p51_p3), %v224_v0  ;;  %227 = vst [vmem:[%s202_s30 + $0x4] sm:$0xf] (%p51_p3), %v226_v1  ;;  %v230_v3 = vld [vmem:[%s207_s29 + $0x24] sm:$0xf] (%p51_p3) }
  0x11   : > { %229 = vst [vmem:[%s202_s30 + $0x8] sm:$0xf] %v228_v2  ;;  %231 = vst [vmem:[%s202_s30 + $0xc] sm:$0xf] %v230_v3 }
  0x12 PF: > { %p677_p6 = scmp.ge.s32.totalorder %s837_s19, 1  ;;  %p274_p7 = scmp.lt.s32.totalorder %s837_s19, 4 }
  0x14   : > { %p275_p8 = pnand %p677_p6, %p274_p7 }
  0x15   : > { %s281_s5 = sand.u32 (!%p275_p8), 1, %s821_s15   ;;  %s679_s6 = sshll.u32 (!%p275_p8), %s829_s17, 4 }
  0x16   : > { %278 = sbr.rel (%p275_p8) target bundleno = 284 (0x11c), region = 73  ;;  %s912_s7 = sshll.u32 (!%p275_p8), %s281_s5, 4 }
  0x17   : > { %p325_p9 = scmp.lt.s32.totalorder (!%p275_p8), %s679_s6, 47  ;;  %s283_s12 = scalar_lea.vmem (!%p275_p8), [#allocation3], %s912_s7 }
  0x18   : > { %p681_p10 = scmp.ne.s32.totalorder (!%p275_p8), %s829_s17, 0 }
  0x1b   : > { %s973_s6 = smov (!%p325_p9, %s679_s6), 47  ;;  %352 = sbr.rel (%p681_p10) target bundleno = 35 (0x23), region = 81 }
  0x1c   : > { %s680_s8 = sshll.u32 %s973_s6, 2 }
  0x1d   : > { %s917_s11 = scalar_lea.vmem %s962_s1, %s680_s8 }
  0x20   : > { %v839_v4 = vmov 0.0  }
  0x21   : > { %353 = vst [vmem:[#allocation2 + $0x10] sm:$0xff] %v839_v4  ;;  %354 = vst [vmem:[#allocation2] sm:$0xff] %v839_v4 }
  0x22   : > { %355 = vst [vmem:[#allocation2 + $0x18] sm:$0xff] %v839_v4  ;;  %356 = vst [vmem:[#allocation2 + $0x8] sm:$0xff] %v839_v4 }
  0x23 PF: > { %v789_v5 = vld [vmem:[%s917_s11 + $0x38] sm:$0xff]   ;;  %v790_v6 = vld [vmem:[%s917_s11 + $0x30] sm:$0xff]   ;;  %v791_v7 = vld [vmem:[%s917_s11 + $0x28] sm:$0xff]   ;;  %p692_p11 = scmp.ne.s32.totalorder %s829_s17, 2 }
  0x24   : > { %728 = vmatprep.subr.bf16.mxu0 %v789_v5  ;;  %v792_v8 = vld [vmem:[%s917_s11 + $0x20] sm:$0xff]   ;;  %v793_v10 = vld [vmem:[%s917_s11 + $0x18] sm:$0xff]   ;;  %v794_v11 = vld [vmem:[%s917_s11 + $0x10] sm:$0xff]  }
  0x25   : > { %729 = vmatpush3.bf16.msra.mxu0 %v789_v5  ;;  %v797_v9 = vld [vmem:[%s283_s12] sm:$0xff]   ;;  %v795_v12 = vld [vmem:[%s917_s11 + $0x8] sm:$0xff]  }
  0x26   : > { %730 = vmatprep.subr.bf16.mxu0 %v790_v6  ;;  %744 = vmatprep.mubr.bf16.mxu0 %v797_v9  ;;  %v796_v13 = vld [vmem:[%s917_s11] sm:$0xff]   ;;  %v798_v14 = vld [vmem:[%s283_s12 + $0x8] sm:$0xff]  }
  0x28   : > { %v357_v17 = vld [vmem:[#allocation2 + $0x10] sm:$0xff]  ;;  %v358_v23 = vld [vmem:[#allocation2] sm:$0xff] }
  0x29   : > { %731 = vmatpush3.bf16.msra.mxu0 %v790_v6  ;;  %v359_v15 = vld [vmem:[#allocation2 + $0x18] sm:$0xff]  ;;  %v360_v20 = vld [vmem:[#allocation2 + $0x8] sm:$0xff] }
  0x2a   : > { %732 = vmatprep.subr.bf16.mxu0 %v791_v7 }
  0x2d   : > { %733 = vmatpush3.bf16.msra.mxu0 %v791_v7 }
  0x2e   : > { %734 = vmatprep.subr.bf16.mxu0 %v792_v8 }
  0x31   : > { %735 = vmatpush3.bf16.msra.mxu0 %v792_v8 }
  0x32   : > { %736 = vmatprep.subr.bf16.mxu0 %v793_v10 }
  0x35   : > { %737 = vmatpush3.bf16.msra.mxu0 %v793_v10 }
  0x36   : > { %738 = vmatprep.subr.bf16.mxu0 %v794_v11 }
  0x39   : > { %739 = vmatpush3.bf16.msra.mxu0 %v794_v11 }
  0x3a   : > { %740 = vmatprep.subr.bf16.mxu0 %v795_v12 }
  0x3d   : > { %741 = vmatpush3.bf16.msra.mxu0 %v795_v12 }
  0x3e   : > { %742 = vmatprep.subr.bf16.mxu0 %v796_v13 }
  0x41   : > { %743 = vmatpush3.bf16.msra.mxu0 %v796_v13 }
  0x44   : > { %745 = vmatmul.mubr.bf16.vlgmr.msra.gmra.mxu0 %v798_v14 }
 0x104   : > { %v746_v16 = vpop.f32.mrf.mxu0 }
 0x105   : > { %v492_v18 = vadd.f32 %v746_v16, %v359_v15 }
 0x106   : > { %v475_v19 = vpop.f32.mrf.mxu0 }
 0x107   : > { %496 = vst [vmem:[#allocation2 + $0x18] sm:$0xff] %v492_v18  ;;  %v490_v21 = vadd.f32 %v475_v19, %v357_v17 }
 0x108   : > { %v747_v22 = vpop.f32.mrf.mxu0 }
 0x109   : > { %494 = vst [vmem:[#allocation2 + $0x10] sm:$0xff] %v490_v21  ;;  %v493_v24 = vadd.f32 %v747_v22, %v360_v20  ;;  %501 = sbr.rel (%p692_p11) target bundleno = 284 (0x11c), region = 85 }
 0x10a   : > { %v478_v25 = vpop.f32.mrf.mxu0 }
 0x10b   : > { %497 = vst [vmem:[#allocation2 + $0x8] sm:$0xff] %v493_v24  ;;  %v491_v26 = vadd.f32 %v478_v25, %v358_v23 }
 0x10d   : > { %495 = vst [vmem:[#allocation2] sm:$0xff] %v491_v26 }
 0x10e   : > { %v693_v29 = vld [vmem:[%s963_s2] ss:$0 sm:$0xff]  ;;  %v504_v33 = vld [vmem:[#allocation2 + $0x18] sm:$0xff] }
 0x10f   : > { %v694_v32 = vld [vmem:[%s964_s3] ss:$0 sm:$0xff]  ;;  %v515_v35 = vmul.f32 %v693_v29, %v504_v33 }
 0x110   : > { %v502_v27 = vld [vmem:[#allocation2 + $0x10] sm:$0xff] }
 0x111   : > { %v513_v30 = vmul.f32 %v693_v29, %v502_v27  ;;  %v526_v39 = vadd.f32 %v694_v32, %v515_v35 }
 0x112   : > { %v505_v34 = vld [vmem:[#allocation2 + $0x8] sm:$0xff] }
 0x113   : > { %v516_v36 = vmul.f32 %v693_v29, %v505_v34  ;;  %v524_v37 = vadd.f32 %v694_v32, %v513_v30 }
 0x114   : > { %v503_v28 = vld [vmem:[#allocation2] sm:$0xff] }
 0x115   : > { %v514_v31 = vmul.f32 %v693_v29, %v503_v28  ;;  %v527_v40 = vadd.f32 %v694_v32, %v516_v36 }
 0x117   : > { %v525_v38 = vadd.f32 %v694_v32, %v514_v31  ;;  %v715_v42 = vpack.c.bf16 %v527_v40, %v526_v39 }
 0x119   : > { %v710_v41 = vpack.c.bf16 %v525_v38, %v524_v37  ;;  %717 = vst [vmem:[%s965_s4 + $0x8] sm:$0xff] %v715_v42  }
 0x11b   : > { %711 = vst [vmem:[%s965_s4] sm:$0xff] %v710_v41  }
 0x11c PF: > { %s14_s19 = sadd.s32 1, %s837_s19   ;;  %s966_s15 = smov %s825_s16 }
 0x11d   : > { %p11_p12 = scmp.ge.s32.totalorder %s14_s19, 5   ;;  %s967_s16 = smov %s900_s23 }
 0x11e   : > { %s968_s17 = smov %s833_s18  ;;  %s969_s18 = smov %s971_s20 }
 0x11f   :  { %13 = sbr.rel (!%p11_p12) target bundleno = 3 (0x3), region = 129 }

// kernel: _lambda_.19
= control target key start
LH: loop header
LB: loop body
LE: loop exit
PB: predicated region body
PF: predicated region fallthrough
CT: control target
= control target key end

     0   :  { %s610_s1 = inlined_call_operand.vmem [shape: bf16[128,128], index: 1, kind: input, shape index: {}]   ;;  %s611_s5 = inlined_call_operand.vmem [shape: bf16[128,128], index: 5, kind: input, shape index: {}]   ;;  %s612_s0 = inlined_call_operand.vmem [shape: bf16[32,128], index: 0, kind: input, shape index: {}]   ;;  %s613_s4 = inlined_call_operand.vmem [shape: bf16[32,128], index: 4, kind: input, shape index: {}]   ;;  %s614_s2 = inlined_call_operand.vmem [shape: f32[1,128], index: 2, kind: input, shape index: {}, may-alias: {2,6}]   ;;  %s615_s6 = inlined_call_operand.vmem [shape: f32[1,128], index: 6, kind: input, shape index: {}, may-alias: {2,6}]   ;;  %s616_s3 = inlined_call_operand.vmem [shape: f32[1,128], index: 3, kind: input, shape index: {}]   ;;  %s617_s7 = inlined_call_operand.vmem [shape: f32[1,128], index: 7, kind: input, shape index: {}]   ;;  %s618_s8 = inlined_call_operand.vmem [shape: bf16[32,128], index: 8, kind: output, shape index: {}]  }
   0x1   :  { %v467_v0 = vld [vmem:[%s610_s1 + $0x38] sm:$0xff]   ;;  %v469_v2 = vld [vmem:[%s610_s1 + $0x30] sm:$0xff]   ;;  %v471_v4 = vld [vmem:[%s610_s1 + $0x28] sm:$0xff]  }
   0x2   :  { %v468_v1 = vld [vmem:[%s611_s5 + $0x38] sm:$0xff]   ;;  %427 = vmatprep.subr.bf16.mxu0 %v467_v0  ;;  %v470_v3 = vld [vmem:[%s611_s5 + $0x30] sm:$0xff]   ;;  %v472_v5 = vld [vmem:[%s611_s5 + $0x28] sm:$0xff]  }
   0x3   :  { %447 = vmatprep.subr.bf16.mxu1 %v468_v1  ;;  %428 = vmatpush3.bf16.msra.mxu0 %v467_v0  ;;  %v473_v6 = vld [vmem:[%s610_s1 + $0x20] sm:$0xff]   ;;  %v475_v8 = vld [vmem:[%s610_s1 + $0x18] sm:$0xff]   ;;  %v477_v10 = vld [vmem:[%s610_s1 + $0x10] sm:$0xff]  }
   0x4   :  { %448 = vmatpush3.bf16.msra.mxu1 %v468_v1  ;;  %429 = vmatprep.subr.bf16.mxu0 %v469_v2  ;;  %v474_v7 = vld [vmem:[%s611_s5 + $0x20] sm:$0xff]   ;;  %v476_v9 = vld [vmem:[%s611_s5 + $0x18] sm:$0xff]   ;;  %v478_v11 = vld [vmem:[%s611_s5 + $0x10] sm:$0xff]  }
   0x5   :  { %449 = vmatprep.subr.bf16.mxu1 %v470_v3  ;;  %v483_v12 = vld [vmem:[%s612_s0] sm:$0xff]   ;;  %v479_v14 = vld [vmem:[%s610_s1 + $0x8] sm:$0xff]  }
   0x6   :  { %v484_v13 = vld [vmem:[%s613_s4] sm:$0xff]   ;;  %443 = vmatprep.mubr.bf16.mxu0 %v483_v12  ;;  %v480_v15 = vld [vmem:[%s611_s5 + $0x8] sm:$0xff]  }
   0x7   :  { %430 = vmatpush3.bf16.msra.mxu0 %v469_v2  ;;  %463 = vmatprep.mubr.bf16.mxu1 %v484_v13  ;;  %v481_v16 = vld [vmem:[%s610_s1] sm:$0xff]   ;;  %v485_v18 = vld [vmem:[%s612_s0 + $0x8] sm:$0xff]  }
   0x8   :  { %450 = vmatpush3.bf16.msra.mxu1 %v470_v3  ;;  %431 = vmatprep.subr.bf16.mxu0 %v471_v4  ;;  %v482_v17 = vld [vmem:[%s611_s5] sm:$0xff]   ;;  %v486_v19 = vld [vmem:[%s613_s4 + $0x8] sm:$0xff]  }
   0x9   :  { %451 = vmatprep.subr.bf16.mxu1 %v472_v5  ;;  %v374_v20 = vld [vmem:[%s614_s2] ss:$0 sm:$0xff] }
   0xa   :  { %v386_v21 = vld [vmem:[%s615_s6] ss:$0 sm:$0xff] }
   0xb   :  { %432 = vmatpush3.bf16.msra.mxu0 %v471_v4  ;;  %v375_v24 = vld [vmem:[%s616_s3] ss:$0 sm:$0xff] }
   0xc   :  { %452 = vmatpush3.bf16.msra.mxu1 %v472_v5  ;;  %433 = vmatprep.subr.bf16.mxu0 %v473_v6  ;;  %v387_v26 = vld [vmem:[%s617_s7] ss:$0 sm:$0xff] }
   0xd   :  { %453 = vmatprep.subr.bf16.mxu1 %v474_v7 }
   0xf   :  { %434 = vmatpush3.bf16.msra.mxu0 %v473_v6 }
  0x10   :  { %454 = vmatpush3.bf16.msra.mxu1 %v474_v7  ;;  %435 = vmatprep.subr.bf16.mxu0 %v475_v8 }
  0x11   :  { %455 = vmatprep.subr.bf16.mxu1 %v476_v9 }
  0x13   :  { %436 = vmatpush3.bf16.msra.mxu0 %v475_v8 }
  0x14   :  { %456 = vmatpush3.bf16.msra.mxu1 %v476_v9  ;;  %437 = vmatprep.subr.bf16.mxu0 %v477_v10 }
  0x15   :  { %457 = vmatprep.subr.bf16.mxu1 %v478_v11 }
  0x17   :  { %438 = vmatpush3.bf16.msra.mxu0 %v477_v10 }
  0x18   :  { %458 = vmatpush3.bf16.msra.mxu1 %v478_v11  ;;  %439 = vmatprep.subr.bf16.mxu0 %v479_v14 }
  0x19   :  { %459 = vmatprep.subr.bf16.mxu1 %v480_v15 }
  0x1b   :  { %440 = vmatpush3.bf16.msra.mxu0 %v479_v14 }
  0x1c   :  { %460 = vmatpush3.bf16.msra.mxu1 %v480_v15  ;;  %441 = vmatprep.subr.bf16.mxu0 %v481_v16 }
  0x1d   :  { %461 = vmatprep.subr.bf16.mxu1 %v482_v17 }
  0x1f   :  { %442 = vmatpush3.bf16.msra.mxu0 %v481_v16 }
  0x20   :  { %462 = vmatpush3.bf16.msra.mxu1 %v482_v17 }
  0x22   :  { %444 = vmatmul.mubr.bf16.vlgmr.msra.gmra.mxu0 %v485_v18 }
  0x23   :  { %464 = vmatmul.mubr.bf16.vlgmr.msra.gmra.mxu1 %v486_v19 }
  0xe2   :  { %v445_v22 = vpop.f32.mrf.mxu0 }
  0xe3   :  { %v168_v23 = vmul.f32 %v445_v22, %v374_v20  ;;  %v465_v25 = vpop.f32.mrf.mxu1 }
  0xe4   :  { %v319_v27 = vmul.f32 %v465_v25, %v386_v21  ;;  %v144_v28 = vpop.f32.mrf.mxu0 }
  0xe5   :  { %v166_v29 = vmul.f32 %v374_v20, %v144_v28  ;;  %v295_v30 = vpop.f32.mrf.mxu1  ;;  %v179_v31 = vadd.f32 %v375_v24, %v168_v23 }
  0xe6   :  { %v330_v32 = vadd.f32 %v387_v26, %v319_v27  ;;  %v317_v33 = vmul.f32 %v386_v21, %v295_v30  ;;  %v446_v34 = vpop.f32.mrf.mxu0 }
  0xe7   :  { %v169_v35 = vmul.f32 %v446_v34, %v374_v20  ;;  %v466_v36 = vpop.f32.mrf.mxu1  ;;  %v177_v37 = vadd.f32 %v375_v24, %v166_v29 }
  0xe8   :  { %v328_v38 = vadd.f32 %v387_v26, %v317_v33  ;;  %v320_v39 = vmul.f32 %v466_v36, %v386_v21  ;;  %v147_v40 = vpop.f32.mrf.mxu0  ;;  %v334_v44 = vadd.f32 %v330_v32, %v179_v31 }
  0xe9   :  { %v180_v41 = vadd.f32 %v375_v24, %v169_v35  ;;  %v167_v42 = vmul.f32 %v374_v20, %v147_v40  ;;  %v298_v43 = vpop.f32.mrf.mxu1 }
  0xea   :  { %v331_v45 = vadd.f32 %v387_v26, %v320_v39  ;;  %v318_v46 = vmul.f32 %v386_v21, %v298_v43  ;;  %v332_v48 = vadd.f32 %v328_v38, %v177_v37  ;;  %v338_v51 = vmax.f32 %v334_v44, 0.0 }
  0xeb   :  { %v178_v47 = vadd.f32 %v375_v24, %v167_v42 }
  0xec   :  { %v335_v49 = vadd.f32 %v331_v45, %v180_v41  ;;  %v329_v50 = vadd.f32 %v387_v26, %v318_v46  ;;  %v336_v54 = vmax.f32 %v332_v48, 0.0 }
  0xee   :  { %v339_v52 = vmax.f32 %v335_v49, 0.0  ;;  %v333_v53 = vadd.f32 %v329_v50, %v178_v47 }
  0xf0   :  { %v404_v55 = vpack.c.bf16 %v339_v52, %v338_v51  ;;  %v337_v56 = vmax.f32 %v333_v53, 0.0 }
  0xf2   :  { %406 = vst [vmem:[%s618_s8 + $0x8] sm:$0xff] %v404_v55   ;;  %v399_v57 = vpack.c.bf16 %v337_v56, %v336_v54 }
  0xf4   :  { %400 = vst [vmem:[%s618_s8] sm:$0xff] %v399_v57  }

// kernel: _lambda_.21
= control target key start
LH: loop header
LB: loop body
LE: loop exit
PB: predicated region body
PF: predicated region fallthrough
CT: control target
= control target key end

     0   :  { %s808_s15 = smov 0   ;;  %s810_s16 = smov 0   ;;  %s899_s0 = inlined_call_operand.vmem [shape: bf16[16,640], index: 0, kind: input, shape index: {}]   ;;  %s900_s1 = inlined_call_operand.vmem [shape: bf16[640,128], index: 1, kind: input, shape index: {}]   ;;  %s901_s2 = inlined_call_operand.vmem [shape: f32[1,128], index: 2, kind: input, shape index: {}]   ;;  %s902_s3 = inlined_call_operand.vmem [shape: f32[1,128], index: 3, kind: input, shape index: {}]   ;;  %s903_s4 = inlined_call_operand.vmem [shape: bf16[16,128], index: 4, kind: output, shape index: {}]  }
   0x1   :  { %s812_s17 = smov 0   ;;  %s814_s18 = smov 0  }
   0x2   :  { %s816_s19 = smov 0  }
   0x3 LB: > { %s26_s20 = sadd.s32 1, %s774_s18  ;;  %p49_p1 = scmp.ne.s32.totalorder %s766_s16, %s762_s15  ;;  %s778_s19 = sphi %s816_s19, %s14_s19   ;;  %s774_s18 = sphi %s814_s18, %s907_s18   ;;  %s770_s17 = sphi %s812_s17, %s906_s17   ;;  %s766_s16 = sphi %s810_s16, %s905_s16   ;;  %s762_s15 = sphi %s808_s15, %s904_s15  }
   0x4   : > { %p27_p0 = scmp.ge.s32.totalorder %s26_s20, 5  ;;  %p50_p2 = scmp.eq.s32.totalorder %s778_s19, 0 }
   0x5   : > { %s42_s22 = sadd.s32 1, %s766_s16  ;;  %p626_p5 = scmp.ge.s32.totalorder %s778_s19, 5 }
   0x6   : > { %s909_s20 = smov (%p27_p0, %s26_s20), 0  ;;  %p51_p3 = por %p50_p2, %p49_p1 }
   0x7   : > { %s38_s21 = ssub.s32 %s774_s18, %s909_s20  ;;  %195 = sbr.rel (%p626_p5) target bundleno = 17 (0x11), region = 24 }
   0x8   : > { %p40_p4 = scmp.eq.s32.totalorder %s38_s21, 0 }
   0xa   : > { %s843_s23 = scalar_select %p40_p4, %s766_s16, %s42_s22  }
   0xc   : > { %198 = sbr.rel (!%p51_p3) target bundleno = 17 (0x11), region = 28  ;;  %s200_s24 = sand.u32 (%p51_p3), 1, %s766_s16  }
   0xd   : > { %s628_s25 = sshll.u32 (%p51_p3), %s774_s18, 2  ;;  %s627_s26 = sshll.u32 (%p51_p3), %s200_s24, 3 }
   0xe   : > { %s207_s29 = scalar_lea.vmem (%p51_p3), %s899_s0, %s628_s25  ;;  %s202_s30 = scalar_lea.vmem (%p51_p3), [#allocation3], %s627_s26 }
   0xf   : > { %v224_v0 = vld [vmem:[%s207_s29] sm:$0xf] (%p51_p3)  ;;  %v226_v1 = vld [vmem:[%s207_s29 + $0x14] sm:$0xf] (%p51_p3) }
  0x10   : > { %225 = vst [vmem:[%s202_s30] sm:$0xf] (%p51_p3), %v224_v0  ;;  %227 = vst [vmem:[%s202_s30 + $0x4] sm:$0xf] (%p51_p3), %v226_v1 }
  0x11 PF: > { %p629_p6 = scmp.ge.s32.totalorder %s778_s19, 1  ;;  %p266_p7 = scmp.lt.s32.totalorder %s778_s19, 6 }
  0x13   : > { %p267_p8 = pnand %p629_p6, %p266_p7 }
  0x14   : > { %s273_s5 = sand.u32 (!%p267_p8), 1, %s762_s15   ;;  %s631_s6 = sshll.u32 (!%p267_p8), %s770_s17, 4 }
  0x15   : > { %270 = sbr.rel (%p267_p8) target bundleno = 280 (0x118), region = 73  ;;  %s855_s7 = sshll.u32 (!%p267_p8), %s273_s5, 3 }
  0x16   : > { %p317_p9 = scmp.lt.s32.totalorder (!%p267_p8), %s631_s6, 79  ;;  %s275_s12 = scalar_lea.vmem (!%p267_p8), [#allocation3], %s855_s7 }
  0x17   : > { %p633_p10 = scmp.ne.s32.totalorder (!%p267_p8), %s770_s17, 0 }
  0x1a   : > { %s911_s6 = smov (!%p317_p9, %s631_s6), 79  ;;  %344 = sbr.rel (%p633_p10) target bundleno = 33 (0x21), region = 81 }
  0x1b   : > { %s632_s8 = sshll.u32 %s911_s6, 2 }
  0x1c   : > { %s860_s11 = scalar_lea.vmem %s900_s1, %s632_s8 }
  0x1f   : > { %v780_v2 = vmov 0.0  }
  0x20   : > { %345 = vst [vmem:[#allocation2] sm:$0xff] %v780_v2  ;;  %346 = vst [vmem:[#allocation2 + $0x8] sm:$0xff] %v780_v2 }
  0x21 PF: > { %v731_v3 = vld [vmem:[%s860_s11 + $0x38] sm:$0xff]   ;;  %v781_v4 = vmov 0.0   ;;  %v732_v5 = vld [vmem:[%s860_s11 + $0x30] sm:$0xff]   ;;  %vm782_vm0 = vmmov 0   ;;  %v733_v6 = vld [vmem:[%s860_s11 + $0x28] sm:$0xff]   ;;  %p643_p11 = scmp.ne.s32.totalorder %s770_s17, 4 }
  0x22   : > { %668 = vmatprep.subr.bf16.mxu0 %v781_v4  ;;  %684 = vmatprep.mubr.msk.bf16.mxu0 %vm782_vm0, %v781_v4  ;;  %v734_v7 = vld [vmem:[%s860_s11 + $0x20] sm:$0xff]   ;;  %v735_v8 = vld [vmem:[%s860_s11 + $0x18] sm:$0xff]   ;;  %v736_v9 = vld [vmem:[%s860_s11 + $0x10] sm:$0xff]  }
  0x23   : > { %669 = vmatpush3.bf16.msra.mxu0 %v731_v3  ;;  %v737_v10 = vld [vmem:[%s860_s11 + $0x8] sm:$0xff]   ;;  %v738_v11 = vld [vmem:[%s860_s11] sm:$0xff]   ;;  %v739_v12 = vld [vmem:[%s275_s12] sm:$0xff]  }
  0x24   : > { %670 = vmatprep.subr.bf16.mxu0 %v781_v4 }
  0x27   : > { %671 = vmatpush3.bf16.msra.mxu0 %v732_v5  ;;  %v347_v13 = vld [vmem:[#allocation2] sm:$0xff]  ;;  %v348_v17 = vld [vmem:[#allocation2 + $0x8] sm:$0xff] }
  0x28   : > { %672 = vmatprep.subr.bf16.mxu0 %v781_v4 }
  0x2b   : > { %673 = vmatpush3.bf16.msra.mxu0 %v733_v6 }
  0x2c   : > { %674 = vmatprep.subr.bf16.mxu0 %v781_v4 }
  0x2f   : > { %675 = vmatpush3.bf16.msra.mxu0 %v734_v7 }
  0x30   : > { %676 = vmatprep.subr.bf16.mxu0 %v781_v4 }
  0x33   : > { %677 = vmatpush3.bf16.msra.mxu0 %v735_v8 }
  0x34   : > { %678 = vmatprep.subr.bf16.mxu0 %v781_v4 }
  0x37   : > { %679 = vmatpush3.bf16.msra.mxu0 %v736_v9 }
  0x38   : > { %680 = vmatprep.subr.bf16.mxu0 %v781_v4 }
  0x3b   : > { %681 = vmatpush3.bf16.msra.mxu0 %v737_v10 }
  0x3c   : > { %682 = vmatprep.subr.bf16.mxu0 %v781_v4 }
  0x3f   : > { %683 = vmatpush3.bf16.msra.mxu0 %v738_v11 }
  0x42   : > { %685 = vmatmul.mubr.bf16.vlgmr.msra.gmra.mxu0 %v739_v12 }
 0x102   : > { %v455_v14 = vpop.f32.mrf.mxu0 }
 0x103   : > { %v462_v15 = vadd.f32 %v455_v14, %v347_v13 }
 0x104   : > { %v686_v16 = vpop.f32.mrf.mxu0 }
 0x105   : > { %464 = vst [vmem:[#allocation2] sm:$0xff] %v462_v15  ;;  %469 = sbr.rel (%p643_p11) target bundleno = 280 (0x118), region = 85 }
 0x106   : > { %v458_v18 = vpop.f32.mrf.mxu0 }
 0x107   : > { %v463_v19 = vadd.f32 %v458_v18, %v348_v17 }
 0x108   : > { %v687_v20 = vpop.f32.mrf.mxu0 }
 0x109   : > { %465 = vst [vmem:[#allocation2 + $0x8] sm:$0xff] %v463_v19 }
 0x10a   : > { %v644_v23 = vld [vmem:[%s901_s2] ss:$0 sm:$0xff] }
 0x10b   : > { %v645_v26 = vld [vmem:[%s902_s3] ss:$0 sm:$0xff] }
 0x10c   : > { %v470_v21 = vld [vmem:[#allocation2] sm:$0xff] }
 0x10d   : > { %v479_v24 = vmul.f32 %v644_v23, %v470_v21 }
 0x10f   : > { %v488_v27 = vadd.f32 %v645_v26, %v479_v24 }
 0x110   : > { %v471_v22 = vld [vmem:[#allocation2 + $0x8] sm:$0xff] }
 0x111   : > { %v480_v25 = vmul.f32 %v644_v23, %v471_v22 }
 0x113   : > { %v489_v28 = vadd.f32 %v645_v26, %v480_v25 }
 0x115   : > { %v657_v29 = vpack.c.bf16 %v489_v28, %v488_v27 }
 0x117   : > { %658 = vst [vmem:[%s903_s4] sm:$0xff] %v657_v29  }
 0x118 PF: > { %s14_s19 = sadd.s32 1, %s778_s19   ;;  %s904_s15 = smov %s766_s16 }
 0x119   : > { %p11_p12 = scmp.ge.s32.totalorder %s14_s19, 7   ;;  %s905_s16 = smov %s843_s23 }
 0x11a   : > { %s906_s17 = smov %s774_s18  ;;  %s907_s18 = smov %s909_s20 }
 0x11b   :  { %13 = sbr.rel (!%p11_p12) target bundleno = 3 (0x3), region = 129 }

// kernel: _lambda_.22
= control target key start
LH: loop header
LB: loop body
LE: loop exit
PB: predicated region body
PF: predicated region fallthrough
CT: control target
= control target key end

     0   :  { %v503_v1 = vmov 0   ;;  %v179_v35 = vlaneseq  ;;  %s669_s1 = inlined_call_operand.vmem [shape: bf16[128,256], index: 1, kind: input, shape index: {}]   ;;  %s670_s5 = inlined_call_operand.vmem [shape: bf16[128,256], index: 5, kind: input, shape index: {}]   ;;  %s671_s0 = inlined_call_operand.vmem [shape: bf16[16,128], index: 0, kind: input, shape index: {}]   ;;  %s672_s4 = inlined_call_operand.vmem [shape: bf16[16,128], index: 4, kind: input, shape index: {}]   ;;  %s673_s2 = inlined_call_operand.vmem [shape: f32[1,256], index: 2, kind: input, shape index: {}, may-alias: {2,6}]   ;;  %s674_s6 = inlined_call_operand.vmem [shape: f32[1,256], index: 6, kind: input, shape index: {}, may-alias: {2,6}]   ;;  %s675_s3 = inlined_call_operand.vmem [shape: f32[1,256], index: 3, kind: input, shape index: {}]   ;;  %s676_s7 = inlined_call_operand.vmem [shape: f32[1,256], index: 7, kind: input, shape index: {}]   ;;  %s677_s8 = inlined_call_operand.vmem [shape: bf16[16,256], index: 8, kind: output, shape index: {}]  }
   0x1   :  { %v453_v0 = vld [vmem:[%s669_s1 + $0x74] ss:$8 sps:$4 sm:$0xff]   ;;  %166 = vmatprep.mubr.bf16.mxu0 %v503_v1  ;;  %345 = vmatprep.mubr.bf16.mxu1 %v503_v1  ;;  %v457_v3 = vld [vmem:[%s669_s1 + $0x70] ss:$8 sps:$4 sm:$0xff]   ;;  %v459_v5 = vld [vmem:[%s669_s1 + $0x64] ss:$8 sps:$4 sm:$0xff]  }
   0x2   :  { %v455_v2 = vld [vmem:[%s670_s5 + $0x74] ss:$8 sps:$4 sm:$0xff]   ;;  %134 = vmatprep.subr.bf16.mxu0 %v453_v0  ;;  %v458_v4 = vld [vmem:[%s670_s5 + $0x70] ss:$8 sps:$4 sm:$0xff]   ;;  %v461_v6 = vld [vmem:[%s670_s5 + $0x64] ss:$8 sps:$4 sm:$0xff]  }
   0x3   :  { %313 = vmatprep.subr.bf16.mxu1 %v455_v2  ;;  %135 = vmatpush1.bf16.msra.mxu0 %v457_v3  ;;  %v463_v7 = vld [vmem:[%s669_s1 + $0x60] ss:$8 sps:$4 sm:$0xff]   ;;  %v465_v9 = vld [vmem:[%s669_s1 + $0x54] ss:$8 sps:$4 sm:$0xff]   ;;  %v469_v11 = vld [vmem:[%s669_s1 + $0x50] ss:$8 sps:$4 sm:$0xff]  }
   0x4   :  { %314 = vmatpush1.bf16.msra.mxu1 %v458_v4  ;;  %136 = vmatprep.subr.bf16.mxu0 %v459_v5  ;;  %v464_v8 = vld [vmem:[%s670_s5 + $0x60] ss:$8 sps:$4 sm:$0xff]   ;;  %v467_v10 = vld [vmem:[%s670_s5 + $0x54] ss:$8 sps:$4 sm:$0xff]   ;;  %v470_v12 = vld [vmem:[%s670_s5 + $0x50] ss:$8 sps:$4 sm:$0xff]  }
   0x5   :  { %315 = vmatprep.subr.bf16.mxu1 %v461_v6  ;;  %v471_v13 = vld [vmem:[%s669_s1 + $0x44] ss:$8 sps:$4 sm:$0xff]   ;;  %v475_v15 = vld [vmem:[%s669_s1 + $0x40] ss:$8 sps:$4 sm:$0xff]   ;;  %v477_v17 = vld [vmem:[%s669_s1 + $0x34] ss:$8 sps:$4 sm:$0xff]  }
   0x6   :  { %v473_v14 = vld [vmem:[%s670_s5 + $0x44] ss:$8 sps:$4 sm:$0xff]   ;;  %v476_v16 = vld [vmem:[%s670_s5 + $0x40] ss:$8 sps:$4 sm:$0xff]   ;;  %v479_v18 = vld [vmem:[%s670_s5 + $0x34] ss:$8 sps:$4 sm:$0xff]  }
   0x7   :  { %137 = vmatpush1.bf16.msra.mxu0 %v463_v7  ;;  %v481_v19 = vld [vmem:[%s669_s1 + $0x30] ss:$8 sps:$4 sm:$0xff]   ;;  %v483_v21 = vld [vmem:[%s669_s1 + $0x24] ss:$8 sps:$4 sm:$0xff]   ;;  %v487_v23 = vld [vmem:[%s669_s1 + $0x20] ss:$8 sps:$4 sm:$0xff]  }
   0x8   :  { %316 = vmatpush1.bf16.msra.mxu1 %v464_v8  ;;  %138 = vmatprep.subr.bf16.mxu0 %v465_v9  ;;  %v482_v20 = vld [vmem:[%s670_s5 + $0x30] ss:$8 sps:$4 sm:$0xff]   ;;  %v485_v22 = vld [vmem:[%s670_s5 + $0x24] ss:$8 sps:$4 sm:$0xff]   ;;  %v488_v24 = vld [vmem:[%s670_s5 + $0x20] ss:$8 sps:$4 sm:$0xff]  }
   0x9   :  { %317 = vmatprep.subr.bf16.mxu1 %v467_v10  ;;  %v489_v25 = vld [vmem:[%s669_s1 + $0x14] ss:$8 sps:$4 sm:$0xff]   ;;  %v493_v27 = vld [vmem:[%s669_s1 + $0x10] ss:$8 sps:$4 sm:$0xff]   ;;  %v495_v29 = vld [vmem:[%s669_s1 + $0x4] ss:$8 sps:$4 sm:$0xff]  }
   0xa   :  { %v491_v26 = vld [vmem:[%s670_s5 + $0x14] ss:$8 sps:$4 sm:$0xff]   ;;  %v494_v28 = vld [vmem:[%s670_s5 + $0x10] ss:$8 sps:$4 sm:$0xff]   ;;  %v497_v30 = vld [vmem:[%s670_s5 + $0x4] ss:$8 sps:$4 sm:$0xff]  }
   0xb   :  { %139 = vmatpush1.bf16.msra.mxu0 %v469_v11  ;;  %v499_v31 = vld [vmem:[%s669_s1] ss:$8 sps:$4 sm:$0xff]   ;;  %v180_v36 = vshrl.u32 %v179_v35, 7 }
   0xc   :  { %318 = vmatpush1.bf16.msra.mxu1 %v470_v12  ;;  %140 = vmatprep.subr.bf16.mxu0 %v471_v13  ;;  %v500_v32 = vld [vmem:[%s670_s5] ss:$8 sps:$4 sm:$0xff]  }
   0xd   :  { %319 = vmatprep.subr.bf16.mxu1 %v473_v14  ;;  %v501_v33 = vld [vmem:[%s671_s0] sm:$0xff]   ;;  %v181_v37 = vsub.s32 0, %v180_v36  ;;  %v185_v40 = vsub.s32 1, %v180_v36 }
   0xe   :  { %v502_v34 = vld [vmem:[%s672_s4] sm:$0xff]  }
   0xf   :  { %141 = vmatpush1.bf16.msra.mxu0 %v475_v15  ;;  %v177_v38 = vld [vmem:[%s673_s2] sm:$0x3] }
  0x10   :  { %320 = vmatpush1.bf16.msra.mxu1 %v476_v16  ;;  %142 = vmatprep.subr.bf16.mxu0 %v477_v17  ;;  %v356_v39 = vld [vmem:[%s674_s6] sm:$0x3]  ;;  %v182_v43 = vrot.slane %v177_v38, %v181_v37  ;;  %v186_v47 = vrot.slane %v177_v38, %v185_v40 }
  0x11   :  { %321 = vmatprep.subr.bf16.mxu1 %v479_v18  ;;  %v193_v41 = vld [vmem:[%s675_s3] sm:$0x3]  ;;  %v361_v44 = vrot.slane %v356_v39, %v181_v37  ;;  %v365_v48 = vrot.slane %v356_v39, %v185_v40 }
  0x12   :  { %v372_v42 = vld [vmem:[%s676_s7] sm:$0x3]  ;;  %v198_v45 = vrot.slane %v193_v41, %v181_v37  ;;  %v202_v53 = vrot.slane %v193_v41, %v185_v40 }
  0x13   :  { %143 = vmatpush1.bf16.msra.mxu0 %v481_v19  ;;  %v377_v46 = vrot.slane %v372_v42, %v181_v37  ;;  %v381_v54 = vrot.slane %v372_v42, %v185_v40 }
  0x14   :  { %322 = vmatpush1.bf16.msra.mxu1 %v482_v20  ;;  %144 = vmatprep.subr.bf16.mxu0 %v483_v21 }
  0x15   :  { %323 = vmatprep.subr.bf16.mxu1 %v485_v22 }
  0x17   :  { %145 = vmatpush1.bf16.msra.mxu0 %v487_v23 }
  0x18   :  { %324 = vmatpush1.bf16.msra.mxu1 %v488_v24  ;;  %146 = vmatprep.subr.bf16.mxu0 %v489_v25 }
  0x19   :  { %325 = vmatprep.subr.bf16.mxu1 %v491_v26 }
  0x1b   :  { %147 = vmatpush1.bf16.msra.mxu0 %v493_v27 }
  0x1c   :  { %326 = vmatpush1.bf16.msra.mxu1 %v494_v28  ;;  %148 = vmatprep.subr.bf16.mxu0 %v495_v29 }
  0x1d   :  { %327 = vmatprep.subr.bf16.mxu1 %v497_v30 }
  0x1f   :  { %149 = vmatpush1.bf16.msra.mxu0 %v499_v31 }
  0x20   :  { %328 = vmatpush1.bf16.msra.mxu1 %v500_v32 }
  0x22   :  { %167 = vmatmul.mubr.bf16.vlgmr.msra.gmra.mxu0 %v501_v33 }
  0x23   :  { %346 = vmatmul.mubr.bf16.vlgmr.msra.gmra.mxu1 %v502_v34 }
  0xe2   :  { %v168_v49 = vpop.f32.mrf.mxu0 }
  0xe3   :  { %v347_v50 = vpop.f32.mrf.mxu1  ;;  %v189_v51 = vmul.f32 %v182_v43, %v168_v49 }
  0xe4   :  { %v368_v52 = vmul.f32 %v361_v44, %v347_v50  ;;  %v170_v55 = vpop.f32.mrf.mxu0 }
  0xe5   :  { %v349_v56 = vpop.f32.mrf.mxu1  ;;  %v205_v57 = vadd.f32 %v198_v45, %v189_v51  ;;  %v190_v59 = vmul.f32 %v186_v47, %v170_v55 }
  0xe6   :  { %v384_v58 = vadd.f32 %v377_v46, %v368_v52  ;;  %v369_v60 = vmul.f32 %v365_v48, %v349_v56  ;;  %v172_v61 = vpop.f32.mrf.mxu0 }
  0xe7   :  { %v351_v62 = vpop.f32.mrf.mxu1  ;;  %v206_v0 = vadd.f32 %v202_v53, %v190_v59  ;;  %v191_v2 = vmul.f32 %v182_v43, %v172_v61 }
  0xe8   :  { %v388_v63 = vadd.f32 %v384_v58, %v205_v57  ;;  %v385_v1 = vadd.f32 %v381_v54, %v369_v60  ;;  %v370_v3 = vmul.f32 %v361_v44, %v351_v62  ;;  %v174_v4 = vpop.f32.mrf.mxu0 }
  0xe9   :  { %v353_v5 = vpop.f32.mrf.mxu1  ;;  %v207_v7 = vadd.f32 %v198_v45, %v191_v2  ;;  %v192_v8 = vmul.f32 %v186_v47, %v174_v4 }
  0xea   :  { %v389_v6 = vadd.f32 %v385_v1, %v206_v0  ;;  %v386_v9 = vadd.f32 %v377_v46, %v370_v3  ;;  %v371_v10 = vmul.f32 %v365_v48, %v353_v5  ;;  %v392_v11 = vmax.f32 %v388_v63, 0.0 }
  0xeb   :  { %v208_v13 = vadd.f32 %v202_v53, %v192_v8 }
  0xec   :  { %v393_v12 = vmax.f32 %v389_v6, 0.0  ;;  %v390_v14 = vadd.f32 %v386_v9, %v207_v7  ;;  %v387_v15 = vadd.f32 %v381_v54, %v371_v10 }
  0xee   :  { %v450_v16 = vpack.c.bf16 %v393_v12, %v392_v11  ;;  %v391_v17 = vadd.f32 %v387_v15, %v208_v13  ;;  %v394_v18 = vmax.f32 %v390_v14, 0.0 }
  0xf0   :  { %408 = vst [vmem:[%s677_s8] sm:$0xff] %v450_v16  ;;  %v395_v19 = vmax.f32 %v391_v17, 0.0 }
  0xf2   :  { %v451_v20 = vpack.c.bf16 %v395_v19, %v394_v18 }
  0xf4   :  { %409 = vst [vmem:[%s677_s8 + $0x8] sm:$0xff] %v451_v20 }

// kernel: _lambda_.23
= control target key start
LH: loop header
LB: loop body
LE: loop exit
PB: predicated region body
PF: predicated region fallthrough
CT: control target
= control target key end

     0   :  { %vm55_vm0 = vcmask 1043456   ;;  %vm271_vm1 = vcmask 1041409   ;;  %vm273_vm2 = vcmask 1042434   ;;  %vm275_vm3 = vcmask 1043459   ;;  %s682_s1 = inlined_call_operand.vmem [shape: bf16[256,128], index: 1, kind: input, shape index: {}]   ;;  %s683_s0 = inlined_call_operand.vmem [shape: bf16[8,4,256], index: 0, kind: input, shape index: {}]   ;;  %s684_s2 = inlined_call_operand.vmem [shape: f32[1,128], index: 2, kind: input, shape index: {}]   ;;  %s685_s3 = inlined_call_operand.vmem [shape: f32[8,128], index: 3, kind: output, shape index: {}]  }
   0x1   :  { %v504_v0 = vld [vmem:[%s682_s1 + $0x78] sm:$0xff]   ;;  %v506_v2 = vld [vmem:[%s682_s1 + $0x70] sm:$0xff]   ;;  %v508_v4 = vld [vmem:[%s682_s1 + $0x68] sm:$0xff]   ;;  %vm277_vm4 = vcmask 1044484   ;;  %vm279_vm5 = vcmask 1045509   ;;  %vm281_vm6 = vcmask 1046534  }
   0x2   :  { %v505_v1 = vld [vmem:[%s682_s1 + $0x38] sm:$0xff]   ;;  %482 = vmatprep.subr.bf16.mxu0 %v504_v0  ;;  %v507_v3 = vld [vmem:[%s682_s1 + $0x30] sm:$0xff]   ;;  %v509_v5 = vld [vmem:[%s682_s1 + $0x28] sm:$0xff]   ;;  %vm283_vm7 = vcmask 1047559  }
   0x3   :  { %483 = vmatpush3.bf16.msra.mxu0 %v505_v1  ;;  %v510_v6 = vld [vmem:[%s682_s1 + $0x60] sm:$0xff]   ;;  %v512_v8 = vld [vmem:[%s682_s1 + $0x58] sm:$0xff]   ;;  %v514_v10 = vld [vmem:[%s682_s1 + $0x50] sm:$0xff]  }
   0x4   :  { %484 = vmatprep.subr.bf16.mxu0 %v506_v2  ;;  %v511_v7 = vld [vmem:[%s682_s1 + $0x20] sm:$0xff]   ;;  %v513_v9 = vld [vmem:[%s682_s1 + $0x18] sm:$0xff]   ;;  %v479_v12 = vld [vmem:[%s683_s0 + $0x8] sm:$0xff]  }
   0x5   :  { %v464_v11 = vld [vmem:[%s683_s0] sm:$0xff]   ;;  %v480_v13 = vld [vmem:[%s683_s0 + $0x10] sm:$0xff]   ;;  %v586_v16 = vunpack.c.l.bf16 %v479_v12  ;;  %v588_v17 = vunpack.c.h.bf16 %v479_v12  ;;  %v481_v18 = vld [vmem:[%s683_s0 + $0x18] sm:$0xff]  }
   0x6   :  { %v465_v14 = vunpack.c.l.bf16 %v464_v11  ;;  %v466_v15 = vunpack.c.h.bf16 %v464_v11  ;;  %v593_v19 = vunpack.c.l.bf16 %v480_v13  ;;  %v595_v20 = vunpack.c.h.bf16 %v480_v13  ;;  %v515_v23 = vld [vmem:[%s682_s1 + $0x10] sm:$0xff]   ;;  %v516_v28 = vld [vmem:[%s682_s1 + $0x48] sm:$0xff]   ;;  %v518_v46 = vld [vmem:[%s682_s1 + $0x40] sm:$0xff]  }
   0x7   :  { %485 = vmatpush3.bf16.msra.mxu0 %v507_v3  ;;  %v597_v21 = vunpack.c.l.bf16 %v481_v18  ;;  %v599_v22 = vunpack.c.h.bf16 %v481_v18  ;;  %v41_v26 = vcombine.high %v586_v16, %v586_v16  ;;  %v42_v27 = vcombine.high %v588_v17, %v588_v17  ;;  %v517_v41 = vld [vmem:[%s682_s1 + $0x8] sm:$0xff]   ;;  %v519_v59 = vld [vmem:[%s682_s1] sm:$0xff]  }
   0x8   :  { %486 = vmatprep.subr.bf16.mxu0 %v508_v4  ;;  %v39_v24 = vcombine.high %v465_v14, %v465_v14  ;;  %v40_v25 = vcombine.high %v466_v15, %v466_v15  ;;  %v43_v29 = vcombine.high %v593_v19, %v593_v19  ;;  %v44_v30 = vcombine.high %v595_v20, %v595_v20 }
   0x9   :  { %v45_v31 = vcombine.high %v597_v21, %v597_v21  ;;  %v46_v32 = vcombine.high %v599_v22, %v599_v22  ;;  %v620_v33 = vsel %vm55_vm0, %v465_v14, 0.0  ;;  %v624_v35 = vsel %vm55_vm0, %v466_v15, 0.0 }
   0xa   :  { %v63_v34 = vsel %vm55_vm0, %v39_v24, 0.0  ;;  %v77_v36 = vsel %vm55_vm0, %v40_v25, 0.0  ;;  %v57_v37 = vrot.slane %v620_v33, 4  ;;  %v71_v39 = vrot.slane %v624_v35, 4 }
   0xb   :  { %487 = vmatpush3.bf16.msra.mxu0 %v509_v5  ;;  %v64_v38 = vrot.slane %v63_v34, 4  ;;  %v78_v40 = vrot.slane %v77_v36, 4  ;;  %v91_v42 = vsel %vm55_vm0, %v41_v26, 0.0  ;;  %v105_v43 = vsel %vm55_vm0, %v42_v27, 0.0 }
   0xc   :  { %488 = vmatprep.subr.bf16.mxu0 %v510_v6  ;;  %v119_v44 = vsel %vm55_vm0, %v43_v29, 0.0  ;;  %v133_v45 = vsel %vm55_vm0, %v44_v30, 0.0  ;;  %v92_v49 = vrot.slane %v91_v42, 4  ;;  %v106_v50 = vrot.slane %v105_v43, 4 }
   0xd   :  { %v65_v47 = vadd.f32 %v64_v38, %v63_v34  ;;  %v79_v48 = vadd.f32 %v78_v40, %v77_v36  ;;  %v120_v51 = vrot.slane %v119_v44, 4  ;;  %v134_v52 = vrot.slane %v133_v45, 4 }
   0xe   :  { %v147_v53 = vsel %vm55_vm0, %v45_v31, 0.0  ;;  %v161_v54 = vsel %vm55_vm0, %v46_v32, 0.0  ;;  %v93_v57 = vadd.f32 %v92_v49, %v91_v42  ;;  %v107_v58 = vadd.f32 %v106_v50, %v105_v43 }
   0xf   :  { %489 = vmatpush3.bf16.msra.mxu0 %v511_v7  ;;  %v66_v55 = vrot.slane %v65_v47, 2  ;;  %v80_v56 = vrot.slane %v79_v48, 2  ;;  %v121_v60 = vadd.f32 %v120_v51, %v119_v44  ;;  %v135_v61 = vadd.f32 %v134_v52, %v133_v45 }
  0x10   :  { %490 = vmatprep.subr.bf16.mxu0 %v512_v8  ;;  %v148_v62 = vrot.slane %v147_v53, 4  ;;  %v162_v63 = vrot.slane %v161_v54, 4  ;;  %v94_v2 = vrot.slane %v93_v57, 2  ;;  %v108_v3 = vrot.slane %v107_v58, 2 }
  0x11   :  { %v67_v0 = vadd.f32 %v66_v55, %v65_v47  ;;  %v81_v1 = vadd.f32 %v80_v56, %v79_v48  ;;  %v122_v4 = vrot.slane %v121_v60, 2  ;;  %v136_v5 = vrot.slane %v135_v61, 2 }
  0x12   :  { %v149_v6 = vadd.f32 %v148_v62, %v147_v53  ;;  %v163_v7 = vadd.f32 %v162_v63, %v161_v54  ;;  %v109_v11 = vadd.f32 %v108_v3, %v107_v58 }
  0x13   :  { %491 = vmatpush3.bf16.msra.mxu0 %v513_v9  ;;  %v68_v8 = vrot.slane %v67_v0, 1  ;;  %v82_v9 = vrot.slane %v81_v1, 1  ;;  %v123_v12 = vadd.f32 %v122_v4, %v121_v60  ;;  %v137_v13 = vadd.f32 %v136_v5, %v135_v61 }
  0x14   :  { %492 = vmatprep.subr.bf16.mxu0 %v514_v10  ;;  %v95_v10 = vadd.f32 %v94_v2, %v93_v57  ;;  %v150_v14 = vrot.slane %v149_v6, 2  ;;  %v164_v15 = vrot.slane %v163_v7, 2  ;;  %v110_v25 = vrot.slane %v109_v11, 1 }
  0x15   :  { %v69_v18 = vadd.f32 %v68_v8, %v67_v0  ;;  %v124_v26 = vrot.slane %v123_v12, 1  ;;  %v138_v27 = vrot.slane %v137_v13, 1  ;;  %v58_v61 = vadd.f32 %v57_v37, %v620_v33 }
  0x16   :  { %v96_v24 = vrot.slane %v95_v10, 1  ;;  %v165_v29 = vadd.f32 %v164_v15, %v163_v7  ;;  %v111_v31 = vadd.f32 %v110_v25, %v109_v11  ;;  %v72_v4 = vadd.f32 %v71_v39, %v624_v35 }
  0x17   :  { %493 = vmatpush3.bf16.msra.mxu0 %v515_v23  ;;  %v83_v23 = vadd.f32 %v82_v9, %v81_v1  ;;  %v169_v32 = vmul.f32 0.25, %v69_v18  ;;  %v125_v36 = vadd.f32 %v124_v26, %v123_v12  ;;  %v139_v38 = vadd.f32 %v138_v27, %v137_v13 }
  0x18   :  { %494 = vmatprep.subr.bf16.mxu0 %v516_v28  ;;  %v151_v28 = vadd.f32 %v150_v14, %v149_v6  ;;  %v97_v30 = vadd.f32 %v96_v24, %v95_v10  ;;  %v175_v43 = vmul.f32 0.25, %v111_v31  ;;  %v59_v3 = vrot.slane %v58_v61, 2 }
  0x19   :  { %v171_v34 = vmul.f32 0.25, %v83_v23  ;;  %v185_v44 = vpack.c.bf16 %v169_v32, %v169_v32  ;;  %v177_v48 = vmul.f32 0.25, %v125_v36  ;;  %v179_v49 = vmul.f32 0.25, %v139_v38 }
  0x1a   :  { %v152_v40 = vrot.slane %v151_v28, 1  ;;  %v173_v42 = vmul.f32 0.25, %v97_v30  ;;  %v191_v51 = vpack.c.bf16 %v175_v43, %v175_v43  ;;  %v84_v5 = vsel %vm55_vm0, %v586_v16, 0.0 }
  0x1b   :  { %495 = vmatpush3.bf16.msra.mxu0 %v517_v41  ;;  %v166_v41 = vrot.slane %v165_v29, 1  ;;  %v187_v45 = vpack.c.bf16 %v171_v34, %v171_v34  ;;  %v256_v52 = vunpack.c.l.b16 %v185_v44  ;;  %v193_v56 = vpack.c.bf16 %v177_v48, %v177_v48 }
  0x1c   :  { %496 = vmatprep.subr.bf16.mxu0 %v518_v46  ;;  %v153_v46 = vadd.f32 %v152_v40, %v151_v28  ;;  %v189_v50 = vpack.c.bf16 %v173_v42, %v173_v42  ;;  %v195_v57 = vpack.c.bf16 %v179_v49, %v179_v49  ;;  %v85_v9 = vrot.slane %v84_v5, 4 }
  0x1d   :  { %v167_v47 = vadd.f32 %v166_v41, %v165_v29  ;;  %v258_v53 = vunpack.c.l.b16 %v187_v45  ;;  %v264_v0 = vunpack.c.l.b16 %v193_v56  ;;  %v60_v37 = vadd.f32 %v59_v3, %v58_v61 }
  0x1e   :  { %v181_v54 = vmul.f32 0.25, %v153_v46  ;;  %v260_v58 = vunpack.c.l.b16 %v189_v50  ;;  %v266_v1 = vunpack.c.l.b16 %v195_v57  ;;  %v73_v10 = vrot.slane %v72_v4, 2 }
  0x1f   :  { %497 = vmatpush3.bf16.msra.mxu0 %v519_v59  ;;  %v183_v55 = vmul.f32 0.25, %v167_v47  ;;  %v262_v59 = vunpack.c.l.b16 %v191_v51  ;;  %v285_v60 = vsel %vm271_vm1, %v258_v53, %v256_v52  ;;  %v98_v11 = vsel %vm55_vm0, %v588_v17, 0.0 }
  0x20   :  { %v197_v62 = vpack.c.bf16 %v181_v54, %v181_v54  ;;  %v286_v2 = vsel %vm273_vm2, %v260_v58, %v285_v60  ;;  %v86_v13 = vadd.f32 %v85_v9, %v84_v5  ;;  %v99_v14 = vrot.slane %v98_v11, 4 }
  0x21   :  { %v199_v63 = vpack.c.bf16 %v183_v55, %v183_v55  ;;  %v287_v8 = vsel %vm275_vm3, %v262_v59, %v286_v2  ;;  %v112_v35 = vsel %vm55_vm0, %v593_v19, 0.0  ;;  %v61_v39 = vrot.slane %v60_v37, 1 }
  0x22   :  { %v268_v6 = vunpack.c.l.b16 %v197_v62  ;;  %v288_v33 = vsel %vm277_vm4, %v264_v0, %v287_v8  ;;  %v74_v15 = vadd.f32 %v73_v10, %v72_v4  ;;  %v113_v18 = vrot.slane %v112_v35, 4 }
  0x23   :  { %v270_v7 = vunpack.c.l.b16 %v199_v63  ;;  %v289_v12 = vsel %vm279_vm5, %v266_v1, %v288_v33  ;;  %v87_v24 = vrot.slane %v86_v13, 2  ;;  %v100_v25 = vadd.f32 %v99_v14, %v98_v11 }
  0x24   :  { %v290_v16 = vsel %vm281_vm6, %v268_v6, %v289_v12  ;;  %v126_v26 = vsel %vm55_vm0, %v595_v20, 0.0  ;;  %v62_v27 = vadd.f32 %v61_v39, %v60_v37  ;;  %v75_v28 = vrot.slane %v74_v15, 1 }
  0x25   :  { %v291_v23 = vsel %vm283_vm7, %v270_v7, %v290_v16  ;;  %v114_v29 = vadd.f32 %v113_v18, %v112_v35  ;;  %v88_v30 = vadd.f32 %v87_v24, %v86_v13  ;;  %v101_v31 = vrot.slane %v100_v25, 2 }
  0x26   :  { %v293_v17 = vpack.c.b16 %v291_v23, %v291_v23  ;;  %v127_v32 = vrot.slane %v126_v26, 4  ;;  %v140_v19 = vsel %vm55_vm0, %v597_v21, 0.0  ;;  %v76_v34 = vadd.f32 %v75_v28, %v74_v15 }
  0x27   :  { %v115_v36 = vrot.slane %v114_v29, 2  ;;  %v141_v38 = vrot.slane %v140_v19, 4  ;;  %v154_v40 = vsel %vm55_vm0, %v599_v22, 0.0  ;;  %v89_v41 = vrot.slane %v88_v30, 1 }
  0x28   :  { %424 = vmatprep.mubr.bf16.mxu0 %v293_v17  ;;  %v102_v42 = vadd.f32 %v101_v31, %v100_v25  ;;  %v128_v20 = vadd.f32 %v127_v32, %v126_v26  ;;  %v155_v43 = vrot.slane %v154_v40, 4  ;;  %v168_v46 = vmul.f32 0.25, %v62_v27  ;;  %v446_v31 = vld [vmem:[%s684_s2] ss:$0 sm:$0xff] }
  0x29   :  { %v116_v44 = vadd.f32 %v115_v36, %v114_v29  ;;  %v142_v45 = vadd.f32 %v141_v38, %v140_v19  ;;  %v170_v47 = vmul.f32 0.25, %v76_v34  ;;  %v90_v48 = vadd.f32 %v89_v41, %v88_v30 }
  0x2a   :  { %v103_v49 = vrot.slane %v102_v42, 1  ;;  %v129_v50 = vrot.slane %v128_v20, 2  ;;  %v156_v51 = vadd.f32 %v155_v43, %v154_v40  ;;  %v184_v53 = vpack.c.bf16 %v168_v46, %v168_v46 }
  0x2b   :  { %v117_v21 = vrot.slane %v116_v44, 1  ;;  %v143_v52 = vrot.slane %v142_v45, 2  ;;  %v186_v54 = vpack.c.bf16 %v170_v47, %v170_v47  ;;  %v172_v22 = vmul.f32 0.25, %v90_v48 }
  0x2c   :  { %v104_v55 = vadd.f32 %v103_v49, %v102_v42  ;;  %v130_v56 = vadd.f32 %v129_v50, %v128_v20  ;;  %v157_v57 = vrot.slane %v156_v51, 2  ;;  %v255_v60 = vunpack.c.l.b16 %v184_v53 }
  0x2d   :  { %v118_v58 = vadd.f32 %v117_v21, %v116_v44  ;;  %v144_v59 = vadd.f32 %v143_v52, %v142_v45  ;;  %v257_v61 = vunpack.c.l.b16 %v186_v54  ;;  %v188_v1 = vpack.c.bf16 %v172_v22, %v172_v22 }
  0x2e   :  { %v131_v62 = vrot.slane %v130_v56, 1  ;;  %v158_v63 = vadd.f32 %v157_v57, %v156_v51  ;;  %v174_v0 = vmul.f32 0.25, %v104_v55 }
  0x2f   :  { %v145_v2 = vrot.slane %v144_v59, 1  ;;  %v176_v3 = vmul.f32 0.25, %v118_v58  ;;  %v272_v4 = vsel %vm271_vm1, %v257_v61, %v255_v60  ;;  %v259_v8 = vunpack.c.l.b16 %v188_v1 }
  0x30   :  { %v132_v5 = vadd.f32 %v131_v62, %v130_v56  ;;  %v159_v6 = vrot.slane %v158_v63, 1  ;;  %v190_v7 = vpack.c.bf16 %v174_v0, %v174_v0 }
  0x31   :  { %v146_v9 = vadd.f32 %v145_v2, %v144_v59  ;;  %v192_v33 = vpack.c.bf16 %v176_v3, %v176_v3  ;;  %v274_v12 = vsel %vm273_vm2, %v259_v8, %v272_v4 }
  0x32   :  { %v160_v37 = vadd.f32 %v159_v6, %v158_v63  ;;  %v178_v10 = vmul.f32 0.25, %v132_v5  ;;  %v261_v11 = vunpack.c.l.b16 %v190_v7 }
  0x33   :  { %v180_v13 = vmul.f32 0.25, %v146_v9  ;;  %v263_v14 = vunpack.c.l.b16 %v192_v33 }
  0x34   :  { %v182_v35 = vmul.f32 0.25, %v160_v37  ;;  %v194_v16 = vpack.c.bf16 %v178_v10, %v178_v10  ;;  %v276_v39 = vsel %vm275_vm3, %v261_v11, %v274_v12 }
  0x35   :  { %v196_v15 = vpack.c.bf16 %v180_v13, %v180_v13  ;;  %v278_v18 = vsel %vm277_vm4, %v263_v14, %v276_v39 }
  0x36   :  { %v198_v23 = vpack.c.bf16 %v182_v35, %v182_v35  ;;  %v265_v24 = vunpack.c.l.b16 %v194_v16 }
  0x37   :  { %v267_v25 = vunpack.c.l.b16 %v196_v15 }
  0x38   :  { %v269_v26 = vunpack.c.l.b16 %v198_v23  ;;  %v280_v17 = vsel %vm279_vm5, %v265_v24, %v278_v18 }
  0x39   :  { %v282_v27 = vsel %vm281_vm6, %v267_v25, %v280_v17 }
  0x3a   :  { %v284_v28 = vsel %vm283_vm7, %v269_v26, %v282_v27 }
  0x3b   :  { %v292_v29 = vpack.c.b16 %v284_v28, %v284_v28 }
  0x3d   :  { %425 = vmatmul.mubr.bf16.vlgmr.msra.gmra.mxu0 %v292_v29 }
  0xfd   :  { %v498_v30 = vpop.f32.mrf.mxu0 }
  0xff   :  { %v499_v32 = vpop.f32.mrf.mxu0 }
 0x100   :  { %v500_v19 = vadd.f32 %v499_v32, %v498_v30 }
 0x101   :  { %v501_v34 = vpop.f32.mrf.mxu0 }
 0x102   :  { %v427_v36 = vadd.f32 %v500_v19, %v446_v31 }
 0x103   :  { %v502_v38 = vpop.f32.mrf.mxu0 }
 0x104   :  { %v432_v40 = vand.u32 2147483647, %v427_v36  ;;  %vm438_vm8 = vcmp.ge.f32.partialorder %v427_v36, 0.0 }
 0x106   :  { %v433_v41 = vsub.f32 0.0, %v432_v40 }
 0x108   :  { %v434_v42 = vmul.f32 1.442695, %v433_v41 }
 0x10a   :  { %520 = vpow2.f32 %v434_v42 }
 0x117   :  { %v521_v20 = vpop.eup %520 }
 0x118   :  { %v436_v43 = vadd.f32 1.0, %v521_v20 }
 0x11a   :  { %522 = vrcp.f32 %v436_v43 }
 0x127   :  { %v523_v44 = vpop.eup %522 }
 0x128   :  { %v439_v45 = vmul.f32 %v523_v44, %v521_v20 }
 0x12a   :  { %v440_v46 = vsel %vm438_vm8, %v523_v44, %v439_v45 }
 0x12b   :  { %441 = vst [vmem:[%s685_s3] sm:$0xff] %v440_v46 }

</bundles_post_ra>
